<compile_context>
chip_gen: v7x
topology: tpu7x:2x2x1
jax: 0.10.0
libtpu: 0.0.40
codegen_flags: <defaults>
</compile_context>

<pallas_src>
import math

import jax
import jax.numpy as jnp
from jax.experimental import pallas as pl
from jax.experimental.pallas import tpu as pltpu


# ----------------------------- helpers (init-time) ---------------------------
def _bilinear_matrix(n_in, factor):
    """Interpolation matrix for nn.Upsample(mode='bilinear', align_corners=True)."""
    n_out = n_in * factor
    if n_in == 1:                                             # degenerate-size guard
        return jnp.ones((n_out, 1), jnp.float32)
    idx = jnp.arange(n_out, dtype=jnp.float32)
    src = idx * (n_in - 1) / (n_out - 1)
    i0 = jnp.clip(jnp.floor(src).astype(jnp.int32), 0, n_in - 2)
    frac = src - i0.astype(jnp.float32)
    U = jnp.zeros((n_out, n_in), jnp.float32)
    r = jnp.arange(n_out)
    U = U.at[r, i0].add(1.0 - frac)
    U = U.at[r, i0 + 1].add(frac)
    return U


def prepare_params(params, h, w, factor, eps=1e-5):
    """One-time (init) rearrangement of weights into kernel-friendly layouts."""
    w5 = params['conv1_w']                                    # (G, CPG, 5, 5) torch layout
    s = params['bn_gamma'] * jax.lax.rsqrt(params['bn_var'] + eps)
    b = params['bn_beta'] - params['bn_mean'] * s
    # Fold the BN scale into the (bias-free) grouped-conv weights; only the bias survives.
    w5s = w5 * s[:, None, None, None]
    w5k = jnp.transpose(w5s, (2, 3, 1, 0)).astype(jnp.float32)        # (KH, KW, CPG, G)
    w1t = params['conv2_w'].reshape(params['conv2_w'].shape[0], -1)   # (NC, G)
    # Merged constants: row 0 = folded BN bias, rows 1..NC = 1x1-conv weights.
    consts = jnp.concatenate([b[None, :], w1t], axis=0).astype(jnp.float32)  # (NC+1, G)
    # Kronecker bilinear-x16 matrix, pre-transposed: ukt[h*W+w, p*Q+q] = Uh[p,h]*Uw[q,w].
    uh = _bilinear_matrix(h, factor)                                  # (P, H)
    uw = _bilinear_matrix(w, factor)                                  # (Q, W)
    ukt = jnp.einsum('ph,qw->hwpq', uh, uw).reshape(h * w, h * factor * w * factor)
    return {'w5': w5k, 'consts': consts, 'ukt': ukt}


# --------------------------------- kernel ------------------------------------
def _semantic_head_kernel(x_ref, w5_ref, c_ref, ukt_ref, o_ref, xpad_ref, y_ref):
    # x_ref:    (H, W, CPG, G)            unpadded input, group axis lane-dense
    # w5_ref:   (KH, KW, CPG, G)          grouped-conv weights, BN scale pre-folded
    # c_ref:    (1+NC, G)                 row 0 = folded BN bias, rows 1..NC = 1x1 weights
    # ukt_ref:  (H*W, P*Q)                kron(Uh, Uw)^T bilinear x16 (align_corners=True)
    # o_ref:    (NC, P*Q)                 flat lane-dense output (single unmasked store)
    # xpad_ref: (H+KH-1, W+KW-1, CPG, G)  VMEM scratch: zero-padded input (conv halo)
    # y_ref:    (H*W, G)                  VMEM scratch: packed post-conv/BN/ReLU activations
    kh, kw, cpg, G = w5_ref.shape
    H, W = x_ref.shape[0], x_ref.shape[1]
    pad = (kh - 1) // 2
    nc = o_ref.shape[0]

    # ---- build the 5x5 halo in VMEM (input arrives unpadded from HBM) ----
    xpad_ref[...] = jnp.zeros_like(xpad_ref)
    xpad_ref[pad:pad + H, pad:pad + W, :, :] = x_ref[...]

    # ---- grouped 5x5 conv, one output row at a time ----
    # (W, CPG, G) row accumulator: 25 full-width VPU FMAs, ONE sublane reduce over CPG,
    # folded-BN bias + ReLU, stored straight into the packed (H*W, G) scratch.
    for h in range(H):
        acc = jnp.zeros((W, cpg, G), jnp.float32)
        for ki in range(kh):
            for kj in range(kw):
                acc = acc + xpad_ref[h + ki, kj:kj + W, :, :] * w5_ref[ki, kj, :, :]
        y_ref[h * W:(h + 1) * W, :] = jnp.maximum(
            jnp.sum(acc, axis=1) + c_ref[0, :], 0.0)

    # ---- 1x1 conv (single K=G MXU matmul) + Kronecker bilinear x16 upsample ----
    # Produces the lane-dense (NC, P*Q) output block in one chain of two matmuls.
    z = jnp.dot(c_ref[1:1 + nc, :], y_ref[...].T,
                preferred_element_type=jnp.float32)                    # (NC, H*W)
    o_ref[...] = jnp.dot(z, ukt_ref[...],
                         preferred_element_type=jnp.float32).astype(o_ref.dtype)


# -------------------------------- wrapper -------------------------------------
@jax.jit
def semantic_head_forward(prep, x):
    """x: (B, C_in, H, W) NCHW float32  ->  (B, n_classes, H*16, W*16) NCHW."""
    B, c_in, H, W = x.shape
    kh, kw, cpg, G = prep['w5'].shape
    nc = prep['consts'].shape[0] - 1
    HW, PQ = prep['ukt'].shape
    factor = math.isqrt(PQ // HW)                 # static upsample scale (= 16)
    P_out, Q_out = H * factor, W * factor

    # Single layout-plumbing op (no spatial pad): split channels into
    # (group, within-group) and make the group axis the fast (lane) axis.
    # TODO(synk): if the producing layer can emit this layout (or NHWC) directly,
    #             this transpose collapses to a cheap minor-dim swap.
    xg = x.reshape(B, G, cpg, H, W).transpose(0, 3, 4, 2, 1)           # (B, H, W, CPG, G)

    out_flat = pl.pallas_call(
        _semantic_head_kernel,
        out_shape=jax.ShapeDtypeStruct((B, nc, PQ), jnp.float32),
        grid=(B,),
        in_specs=[
            pl.BlockSpec((None, H, W, cpg, G), lambda b: (b, 0, 0, 0, 0)),
            pl.BlockSpec((kh, kw, cpg, G), lambda b: (0, 0, 0, 0)),
            pl.BlockSpec((nc + 1, G), lambda b: (0, 0)),
            pl.BlockSpec((HW, PQ), lambda b: (0, 0)),
        ],
        out_specs=pl.BlockSpec((None, nc, PQ), lambda b: (b, 0, 0)),
        scratch_shapes=[
            pltpu.VMEM((H + kh - 1, W + kw - 1, cpg, G), jnp.float32),  # padded input
            pltpu.VMEM((HW, G), jnp.float32),                           # packed activations
        ],
        compiler_params=pltpu.CompilerParams(dimension_semantics=("parallel",)),
    )(xg, prep['w5'], prep['consts'], prep['ukt'])

    return out_flat.reshape(B, nc, P_out, Q_out)


# ------------------------------ pure-JAX reference ----------------------------
def reference_forward(params, x, factor, eps=1e-5):
    w5 = params['conv1_w']
    groups = x.shape[1] // w5.shape[1]
    y = jax.lax.conv_general_dilated(
        x, w5, window_strides=(1, 1), padding=((2, 2), (2, 2)),
        dimension_numbers=('NCHW', 'OIHW', 'NCHW'), feature_group_count=groups)
    s = params['bn_gamma'] / jnp.sqrt(params['bn_var'] + eps)
    b = params['bn_beta'] - params['bn_mean'] * s
    y = jnp.maximum(y * s[None, :, None, None] + b[None, :, None, None], 0.0)
    w1 = params['conv2_w'].reshape(params['conv2_w'].shape[0], -1)
    z = jnp.einsum('bchw,nc->bnhw', y, w1)
    Uh = _bilinear_matrix(x.shape[2], factor)
    Uw = _bilinear_matrix(x.shape[3], factor)
    return jnp.einsum('ph,bnhw,qw->bnpq', Uh, z, Uw)


# ----------------------------------- main --------------------------------------
if __name__ == "__main__":
    B, C_IN, H, W = 2, 2048, 4, 4          # small spatial; channel counts fixed by the module
    N_CLASSES = 3
    GROUPS = 256
    CPG = C_IN // GROUPS                   # 8 input channels per group
    FACTOR = 16

    key = jax.random.PRNGKey(0)
    kx, kw5, kg, kb, km, kv, kw1 = jax.random.split(key, 7)
    x = jax.random.normal(kx, (B, C_IN, H, W), jnp.float32)
    params = {
        'conv1_w': 0.05 * jax.random.normal(kw5, (GROUPS, CPG, 5, 5), jnp.float32),
        'bn_gamma': 1.0 + 0.05 * jax.random.normal(kg, (GROUPS,), jnp.float32),
        'bn_beta': 0.05 * jax.random.normal(kb, (GROUPS,), jnp.float32),
        'bn_mean': 0.05 * jax.random.normal(km, (GROUPS,), jnp.float32),
        'bn_var': 1.0 + 0.1 * jnp.abs(jax.random.normal(kv, (GROUPS,), jnp.float32)),
        'conv2_w': 0.05 * jax.random.normal(kw1, (N_CLASSES, GROUPS, 1, 1), jnp.float32),
    }

    prep = prepare_params(params, H, W, FACTOR)
    out = semantic_head_forward(prep, x)
    jax.block_until_ready(out)

    assert out.shape == (B, N_CLASSES, H * FACTOR, W * FACTOR)

    ref = reference_forward(params, x, FACTOR)
    max_err = float(jnp.max(jnp.abs(out - ref)))
    assert jnp.allclose(out, ref, rtol=2e-3, atol=2e-3), max_err

    print("KERNEL_OK")
</pallas_src>

<mosaic_0001>
module attributes {stable_mosaic.version = 11 : i64} {
  func.func @_semantic_head_kernel(%arg0: i32, %arg1: memref<1x4x4x8x256xf32, #tpu.memory_space<vmem>>, %arg2: memref<5x5x8x256xf32, #tpu.memory_space<vmem>>, %arg3: memref<4x256xf32, #tpu.memory_space<vmem>>, %arg4: memref<16x4096xf32, #tpu.memory_space<vmem>>, %arg5: memref<1x3x4096xf32, #tpu.memory_space<vmem>>, %arg6: memref<8x8x8x256xf32, #tpu.memory_space<vmem>>, %arg7: memref<16x256xf32, #tpu.memory_space<vmem>>) attributes {dimension_semantics = [#tpu.dimension_semantics<parallel>], iteration_bounds = array<i64: 2>, scalar_prefetch = 0 : i64, scratch_operands = 2 : i64, tpu.core_type = #tpu.core_type<tc>, window_params = [{transform_indices = @transform_0, window_bounds = array<i64: 1, 4, 4, 8, 256>}, {pipeline_mode = #tpu.pipeline_mode<synchronous>, transform_indices = @transform_1, window_bounds = array<i64: 5, 5, 8, 256>}, {pipeline_mode = #tpu.pipeline_mode<synchronous>, transform_indices = @transform_2, window_bounds = array<i64: 4, 256>}, {pipeline_mode = #tpu.pipeline_mode<synchronous>, transform_indices = @transform_3, window_bounds = array<i64: 16, 4096>}, {transform_indices = @transform_4, window_bounds = array<i64: 1, 3, 4096>}]} {
    %cst = arith.constant 0.000000e+00 : f32
    %0 = vector.broadcast %cst : f32 to vector<8x8x8x256xf32>
    %c0 = arith.constant 0 : index
    %c0_0 = arith.constant 0 : index
    %c0_1 = arith.constant 0 : index
    %c0_2 = arith.constant 0 : index
    %1 = vector.load %arg6[%c0, %c0_0, %c0_1, %c0_2] : memref<8x8x8x256xf32, #tpu.memory_space<vmem>>, vector<8x8x8x256xf32>
    tpu.vector_store %arg6[%c0, %c0_0, %c0_1, %c0_2], %0 {strides = array<i32>} : memref<8x8x8x256xf32, #tpu.memory_space<vmem>>, vector<8x8x8x256xf32>,
    %c0_3 = arith.constant 0 : index
    %c0_4 = arith.constant 0 : index
    %c0_5 = arith.constant 0 : index
    %c0_6 = arith.constant 0 : index
    %c0_7 = arith.constant 0 : index
    %2 = vector.load %arg1[%c0_3, %c0_4, %c0_5, %c0_6, %c0_7] : memref<1x4x4x8x256xf32, #tpu.memory_space<vmem>>, vector<1x4x4x8x256xf32>
    %3 = vector.shape_cast %2 : vector<1x4x4x8x256xf32> to vector<4x4x8x256xf32>
    %c2 = arith.constant 2 : index
    %c2_8 = arith.constant 2 : index
    %c0_9 = arith.constant 0 : index
    %c0_10 = arith.constant 0 : index
    %4 = vector.load %arg6[%c2, %c2_8, %c0_9, %c0_10] : memref<8x8x8x256xf32, #tpu.memory_space<vmem>>, vector<4x4x8x256xf32>
    tpu.vector_store %arg6[%c2, %c2_8, %c0_9, %c0_10], %3 {strides = array<i32>} : memref<8x8x8x256xf32, #tpu.memory_space<vmem>>, vector<4x4x8x256xf32>,
    %cst_11 = arith.constant 0.000000e+00 : f32
    %5 = vector.broadcast %cst_11 : f32 to vector<4x8x256xf32>
    %c0_12 = arith.constant 0 : index
    %c0_13 = arith.constant 0 : index
    %c0_14 = arith.constant 0 : index
    %c0_15 = arith.constant 0 : index
    %6 = vector.load %arg6[%c0_12, %c0_13, %c0_14, %c0_15] : memref<8x8x8x256xf32, #tpu.memory_space<vmem>>, vector<1x4x8x256xf32>
    %7 = vector.shape_cast %6 : vector<1x4x8x256xf32> to vector<4x8x256xf32>
    %c0_16 = arith.constant 0 : index
    %c0_17 = arith.constant 0 : index
    %c0_18 = arith.constant 0 : index
    %c0_19 = arith.constant 0 : index
    %8 = vector.load %arg2[%c0_16, %c0_17, %c0_18, %c0_19] : memref<5x5x8x256xf32, #tpu.memory_space<vmem>>, vector<1x1x8x256xf32>
    %9 = vector.shape_cast %8 : vector<1x1x8x256xf32> to vector<8x256xf32>
    %10 = vector.shape_cast %9 : vector<8x256xf32> to vector<1x8x256xf32>
    %11 = vector.broadcast %10 : vector<1x8x256xf32> to vector<4x8x256xf32>
    %12 = arith.mulf %7, %11 : vector<4x8x256xf32>
    %13 = arith.addf %5, %12 : vector<4x8x256xf32>
    %c0_20 = arith.constant 0 : index
    %c1 = arith.constant 1 : index
    %c0_21 = arith.constant 0 : index
    %c0_22 = arith.constant 0 : index
    %14 = vector.load %arg6[%c0_20, %c1, %c0_21, %c0_22] : memref<8x8x8x256xf32, #tpu.memory_space<vmem>>, vector<1x4x8x256xf32>
    %15 = vector.shape_cast %14 : vector<1x4x8x256xf32> to vector<4x8x256xf32>
    %c0_23 = arith.constant 0 : index
    %c1_24 = arith.constant 1 : index
    %c0_25 = arith.constant 0 : index
    %c0_26 = arith.constant 0 : index
    %16 = vector.load %arg2[%c0_23, %c1_24, %c0_25, %c0_26] : memref<5x5x8x256xf32, #tpu.memory_space<vmem>>, vector<1x1x8x256xf32>
    %17 = vector.shape_cast %16 : vector<1x1x8x256xf32> to vector<8x256xf32>
    %18 = vector.shape_cast %17 : vector<8x256xf32> to vector<1x8x256xf32>
    %19 = vector.broadcast %18 : vector<1x8x256xf32> to vector<4x8x256xf32>
    %20 = arith.mulf %15, %19 : vector<4x8x256xf32>
    %21 = arith.addf %13, %20 : vector<4x8x256xf32>
    %c0_27 = arith.constant 0 : index
    %c2_28 = arith.constant 2 : index
    %c0_29 = arith.constant 0 : index
    %c0_30 = arith.constant 0 : index
    %22 = vector.load %arg6[%c0_27, %c2_28, %c0_29, %c0_30] : memref<8x8x8x256xf32, #tpu.memory_space<vmem>>, vector<1x4x8x256xf32>
    %23 = vector.shape_cast %22 : vector<1x4x8x256xf32> to vector<4x8x256xf32>
    %c0_31 = arith.constant 0 : index
    %c2_32 = arith.constant 2 : index
    %c0_33 = arith.constant 0 : index
    %c0_34 = arith.constant 0 : index
    %24 = vector.load %arg2[%c0_31, %c2_32, %c0_33, %c0_34] : memref<5x5x8x256xf32, #tpu.memory_space<vmem>>, vector<1x1x8x256xf32>
    %25 = vector.shape_cast %24 : vector<1x1x8x256xf32> to vector<8x256xf32>
    %26 = vector.shape_cast %25 : vector<8x256xf32> to vector<1x8x256xf32>
    %27 = vector.broadcast %26 : vector<1x8x256xf32> to vector<4x8x256xf32>
    %28 = arith.mulf %23, %27 : vector<4x8x256xf32>
    %29 = arith.addf %21, %28 : vector<4x8x256xf32>
    %c0_35 = arith.constant 0 : index
    %c3 = arith.constant 3 : index
    %c0_36 = arith.constant 0 : index
    %c0_37 = arith.constant 0 : index
    %30 = vector.load %arg6[%c0_35, %c3, %c0_36, %c0_37] : memref<8x8x8x256xf32, #tpu.memory_space<vmem>>, vector<1x4x8x256xf32>
    %31 = vector.shape_cast %30 : vector<1x4x8x256xf32> to vector<4x8x256xf32>
    %c0_38 = arith.constant 0 : index
    %c3_39 = arith.constant 3 : index
    %c0_40 = arith.constant 0 : index
    %c0_41 = arith.constant 0 : index
    %32 = vector.load %arg2[%c0_38, %c3_39, %c0_40, %c0_41] : memref<5x5x8x256xf32, #tpu.memory_space<vmem>>, vector<1x1x8x256xf32>
    %33 = vector.shape_cast %32 : vector<1x1x8x256xf32> to vector<8x256xf32>
    %34 = vector.shape_cast %33 : vector<8x256xf32> to vector<1x8x256xf32>
    %35 = vector.broadcast %34 : vector<1x8x256xf32> to vector<4x8x256xf32>
    %36 = arith.mulf %31, %35 : vector<4x8x256xf32>
    %37 = arith.addf %29, %36 : vector<4x8x256xf32>
    %c0_42 = arith.constant 0 : index
    %c4 = arith.constant 4 : index
    %c0_43 = arith.constant 0 : index
    %c0_44 = arith.constant 0 : index
    %38 = vector.load %arg6[%c0_42, %c4, %c0_43, %c0_44] : memref<8x8x8x256xf32, #tpu.memory_space<vmem>>, vector<1x4x8x256xf32>
    %39 = vector.shape_cast %38 : vector<1x4x8x256xf32> to vector<4x8x256xf32>
    %c0_45 = arith.constant 0 : index
    %c4_46 = arith.constant 4 : index
    %c0_47 = arith.constant 0 : index
    %c0_48 = arith.constant 0 : index
    %40 = vector.load %arg2[%c0_45, %c4_46, %c0_47, %c0_48] : memref<5x5x8x256xf32, #tpu.memory_space<vmem>>, vector<1x1x8x256xf32>
    %41 = vector.shape_cast %40 : vector<1x1x8x256xf32> to vector<8x256xf32>
    %42 = vector.shape_cast %41 : vector<8x256xf32> to vector<1x8x256xf32>
    %43 = vector.broadcast %42 : vector<1x8x256xf32> to vector<4x8x256xf32>
    %44 = arith.mulf %39, %43 : vector<4x8x256xf32>
    %45 = arith.addf %37, %44 : vector<4x8x256xf32>
    %c1_49 = arith.constant 1 : index
    %c0_50 = arith.constant 0 : index
    %c0_51 = arith.constant 0 : index
    %c0_52 = arith.constant 0 : index
    %46 = vector.load %arg6[%c1_49, %c0_50, %c0_51, %c0_52] : memref<8x8x8x256xf32, #tpu.memory_space<vmem>>, vector<1x4x8x256xf32>
    %47 = vector.shape_cast %46 : vector<1x4x8x256xf32> to vector<4x8x256xf32>
    %c1_53 = arith.constant 1 : index
    %c0_54 = arith.constant 0 : index
    %c0_55 = arith.constant 0 : index
    %c0_56 = arith.constant 0 : index
    %48 = vector.load %arg2[%c1_53, %c0_54, %c0_55, %c0_56] : memref<5x5x8x256xf32, #tpu.memory_space<vmem>>, vector<1x1x8x256xf32>
    %49 = vector.shape_cast %48 : vector<1x1x8x256xf32> to vector<8x256xf32>
    %50 = vector.shape_cast %49 : vector<8x256xf32> to vector<1x8x256xf32>
    %51 = vector.broadcast %50 : vector<1x8x256xf32> to vector<4x8x256xf32>
    %52 = arith.mulf %47, %51 : vector<4x8x256xf32>
    %53 = arith.addf %45, %52 : vector<4x8x256xf32>
    %c1_57 = arith.constant 1 : index
    %c1_58 = arith.constant 1 : index
    %c0_59 = arith.constant 0 : index
    %c0_60 = arith.constant 0 : index
    %54 = vector.load %arg6[%c1_57, %c1_58, %c0_59, %c0_60] : memref<8x8x8x256xf32, #tpu.memory_space<vmem>>, vector<1x4x8x256xf32>
    %55 = vector.shape_cast %54 : vector<1x4x8x256xf32> to vector<4x8x256xf32>
    %c1_61 = arith.constant 1 : index
    %c1_62 = arith.constant 1 : index
    %c0_63 = arith.constant 0 : index
    %c0_64 = arith.constant 0 : index
    %56 = vector.load %arg2[%c1_61, %c1_62, %c0_63, %c0_64] : memref<5x5x8x256xf32, #tpu.memory_space<vmem>>, vector<1x1x8x256xf32>
    %57 = vector.shape_cast %56 : vector<1x1x8x256xf32> to vector<8x256xf32>
    %58 = vector.shape_cast %57 : vector<8x256xf32> to vector<1x8x256xf32>
    %59 = vector.broadcast %58 : vector<1x8x256xf32> to vector<4x8x256xf32>
    %60 = arith.mulf %55, %59 : vector<4x8x256xf32>
    %61 = arith.addf %53, %60 : vector<4x8x256xf32>
    %c1_65 = arith.constant 1 : index
    %c2_66 = arith.constant 2 : index
    %c0_67 = arith.constant 0 : index
    %c0_68 = arith.constant 0 : index
    %62 = vector.load %arg6[%c1_65, %c2_66, %c0_67, %c0_68] : memref<8x8x8x256xf32, #tpu.memory_space<vmem>>, vector<1x4x8x256xf32>
    %63 = vector.shape_cast %62 : vector<1x4x8x256xf32> to vector<4x8x256xf32>
    %c1_69 = arith.constant 1 : index
    %c2_70 = arith.constant 2 : index
    %c0_71 = arith.constant 0 : index
    %c0_72 = arith.constant 0 : index
    %64 = vector.load %arg2[%c1_69, %c2_70, %c0_71, %c0_72] : memref<5x5x8x256xf32, #tpu.memory_space<vmem>>, vector<1x1x8x256xf32>
    %65 = vector.shape_cast %64 : vector<1x1x8x256xf32> to vector<8x256xf32>
    %66 = vector.shape_cast %65 : vector<8x256xf32> to vector<1x8x256xf32>
    %67 = vector.broadcast %66 : vector<1x8x256xf32> to vector<4x8x256xf32>
    %68 = arith.mulf %63, %67 : vector<4x8x256xf32>
    %69 = arith.addf %61, %68 : vector<4x8x256xf32>
    %c1_73 = arith.constant 1 : index
    %c3_74 = arith.constant 3 : index
    %c0_75 = arith.constant 0 : index
    %c0_76 = arith.constant 0 : index
    %70 = vector.load %arg6[%c1_73, %c3_74, %c0_75, %c0_76] : memref<8x8x8x256xf32, #tpu.memory_space<vmem>>, vector<1x4x8x256xf32>
    %71 = vector.shape_cast %70 : vector<1x4x8x256xf32> to vector<4x8x256xf32>
    %c1_77 = arith.constant 1 : index
    %c3_78 = arith.constant 3 : index
    %c0_79 = arith.constant 0 : index
    %c0_80 = arith.constant 0 : index
    %72 = vector.load %arg2[%c1_77, %c3_78, %c0_79, %c0_80] : memref<5x5x8x256xf32, #tpu.memory_space<vmem>>, vector<1x1x8x256xf32>
    %73 = vector.shape_cast %72 : vector<1x1x8x256xf32> to vector<8x256xf32>
    %74 = vector.shape_cast %73 : vector<8x256xf32> to vector<1x8x256xf32>
    %75 = vector.broadcast %74 : vector<1x8x256xf32> to vector<4x8x256xf32>
    %76 = arith.mulf %71, %75 : vector<4x8x256xf32>
    %77 = arith.addf %69, %76 : vector<4x8x256xf32>
    %c1_81 = arith.constant 1 : index
    %c4_82 = arith.constant 4 : index
    %c0_83 = arith.constant 0 : index
    %c0_84 = arith.constant 0 : index
    %78 = vector.load %arg6[%c1_81, %c4_82, %c0_83, %c0_84] : memref<8x8x8x256xf32, #tpu.memory_space<vmem>>, vector<1x4x8x256xf32>
    %79 = vector.shape_cast %78 : vector<1x4x8x256xf32> to vector<4x8x256xf32>
    %c1_85 = arith.constant 1 : index
    %c4_86 = arith.constant 4 : index
    %c0_87 = arith.constant 0 : index
    %c0_88 = arith.constant 0 : index
    %80 = vector.load %arg2[%c1_85, %c4_86, %c0_87, %c0_88] : memref<5x5x8x256xf32, #tpu.memory_space<vmem>>, vector<1x1x8x256xf32>
    %81 = vector.shape_cast %80 : vector<1x1x8x256xf32> to vector<8x256xf32>
    %82 = vector.shape_cast %81 : vector<8x256xf32> to vector<1x8x256xf32>
    %83 = vector.broadcast %82 : vector<1x8x256xf32> to vector<4x8x256xf32>
    %84 = arith.mulf %79, %83 : vector<4x8x256xf32>
    %85 = arith.addf %77, %84 : vector<4x8x256xf32>
    %c2_89 = arith.constant 2 : index
    %c0_90 = arith.constant 0 : index
    %c0_91 = arith.constant 0 : index
    %c0_92 = arith.constant 0 : index
    %86 = vector.load %arg6[%c2_89, %c0_90, %c0_91, %c0_92] : memref<8x8x8x256xf32, #tpu.memory_space<vmem>>, vector<1x4x8x256xf32>
    %87 = vector.shape_cast %86 : vector<1x4x8x256xf32> to vector<4x8x256xf32>
    %c2_93 = arith.constant 2 : index
    %c0_94 = arith.constant 0 : index
    %c0_95 = arith.constant 0 : index
    %c0_96 = arith.constant 0 : index
    %88 = vector.load %arg2[%c2_93, %c0_94, %c0_95, %c0_96] : memref<5x5x8x256xf32, #tpu.memory_space<vmem>>, vector<1x1x8x256xf32>
    %89 = vector.shape_cast %88 : vector<1x1x8x256xf32> to vector<8x256xf32>
    %90 = vector.shape_cast %89 : vector<8x256xf32> to vector<1x8x256xf32>
    %91 = vector.broadcast %90 : vector<1x8x256xf32> to vector<4x8x256xf32>
    %92 = arith.mulf %87, %91 : vector<4x8x256xf32>
    %93 = arith.addf %85, %92 : vector<4x8x256xf32>
    %c2_97 = arith.constant 2 : index
    %c1_98 = arith.constant 1 : index
    %c0_99 = arith.constant 0 : index
    %c0_100 = arith.constant 0 : index
    %94 = vector.load %arg6[%c2_97, %c1_98, %c0_99, %c0_100] : memref<8x8x8x256xf32, #tpu.memory_space<vmem>>, vector<1x4x8x256xf32>
    %95 = vector.shape_cast %94 : vector<1x4x8x256xf32> to vector<4x8x256xf32>
    %c2_101 = arith.constant 2 : index
    %c1_102 = arith.constant 1 : index
    %c0_103 = arith.constant 0 : index
    %c0_104 = arith.constant 0 : index
    %96 = vector.load %arg2[%c2_101, %c1_102, %c0_103, %c0_104] : memref<5x5x8x256xf32, #tpu.memory_space<vmem>>, vector<1x1x8x256xf32>
    %97 = vector.shape_cast %96 : vector<1x1x8x256xf32> to vector<8x256xf32>
    %98 = vector.shape_cast %97 : vector<8x256xf32> to vector<1x8x256xf32>
    %99 = vector.broadcast %98 : vector<1x8x256xf32> to vector<4x8x256xf32>
    %100 = arith.mulf %95, %99 : vector<4x8x256xf32>
    %101 = arith.addf %93, %100 : vector<4x8x256xf32>
    %c2_105 = arith.constant 2 : index
    %c2_106 = arith.constant 2 : index
    %c0_107 = arith.constant 0 : index
    %c0_108 = arith.constant 0 : index
    %102 = vector.load %arg6[%c2_105, %c2_106, %c0_107, %c0_108] : memref<8x8x8x256xf32, #tpu.memory_space<vmem>>, vector<1x4x8x256xf32>
    %103 = vector.shape_cast %102 : vector<1x4x8x256xf32> to vector<4x8x256xf32>
    %c2_109 = arith.constant 2 : index
    %c2_110 = arith.constant 2 : index
    %c0_111 = arith.constant 0 : index
    %c0_112 = arith.constant 0 : index
    %104 = vector.load %arg2[%c2_109, %c2_110, %c0_111, %c0_112] : memref<5x5x8x256xf32, #tpu.memory_space<vmem>>, vector<1x1x8x256xf32>
    %105 = vector.shape_cast %104 : vector<1x1x8x256xf32> to vector<8x256xf32>
    %106 = vector.shape_cast %105 : vector<8x256xf32> to vector<1x8x256xf32>
    %107 = vector.broadcast %106 : vector<1x8x256xf32> to vector<4x8x256xf32>
    %108 = arith.mulf %103, %107 : vector<4x8x256xf32>
    %109 = arith.addf %101, %108 : vector<4x8x256xf32>
    %c2_113 = arith.constant 2 : index
    %c3_114 = arith.constant 3 : index
    %c0_115 = arith.constant 0 : index
    %c0_116 = arith.constant 0 : index
    %110 = vector.load %arg6[%c2_113, %c3_114, %c0_115, %c0_116] : memref<8x8x8x256xf32, #tpu.memory_space<vmem>>, vector<1x4x8x256xf32>
    %111 = vector.shape_cast %110 : vector<1x4x8x256xf32> to vector<4x8x256xf32>
    %c2_117 = arith.constant 2 : index
    %c3_118 = arith.constant 3 : index
    %c0_119 = arith.constant 0 : index
    %c0_120 = arith.constant 0 : index
    %112 = vector.load %arg2[%c2_117, %c3_118, %c0_119, %c0_120] : memref<5x5x8x256xf32, #tpu.memory_space<vmem>>, vector<1x1x8x256xf32>
    %113 = vector.shape_cast %112 : vector<1x1x8x256xf32> to vector<8x256xf32>
    %114 = vector.shape_cast %113 : vector<8x256xf32> to vector<1x8x256xf32>
    %115 = vector.broadcast %114 : vector<1x8x256xf32> to vector<4x8x256xf32>
    %116 = arith.mulf %111, %115 : vector<4x8x256xf32>
    %117 = arith.addf %109, %116 : vector<4x8x256xf32>
    %c2_121 = arith.constant 2 : index
    %c4_122 = arith.constant 4 : index
    %c0_123 = arith.constant 0 : index
    %c0_124 = arith.constant 0 : index
    %118 = vector.load %arg6[%c2_121, %c4_122, %c0_123, %c0_124] : memref<8x8x8x256xf32, #tpu.memory_space<vmem>>, vector<1x4x8x256xf32>
    %119 = vector.shape_cast %118 : vector<1x4x8x256xf32> to vector<4x8x256xf32>
    %c2_125 = arith.constant 2 : index
    %c4_126 = arith.constant 4 : index
    %c0_127 = arith.constant 0 : index
    %c0_128 = arith.constant 0 : index
    %120 = vector.load %arg2[%c2_125, %c4_126, %c0_127, %c0_128] : memref<5x5x8x256xf32, #tpu.memory_space<vmem>>, vector<1x1x8x256xf32>
    %121 = vector.shape_cast %120 : vector<1x1x8x256xf32> to vector<8x256xf32>
    %122 = vector.shape_cast %121 : vector<8x256xf32> to vector<1x8x256xf32>
    %123 = vector.broadcast %122 : vector<1x8x256xf32> to vector<4x8x256xf32>
    %124 = arith.mulf %119, %123 : vector<4x8x256xf32>
    %125 = arith.addf %117, %124 : vector<4x8x256xf32>
    %c3_129 = arith.constant 3 : index
    %c0_130 = arith.constant 0 : index
    %c0_131 = arith.constant 0 : index
    %c0_132 = arith.constant 0 : index
    %126 = vector.load %arg6[%c3_129, %c0_130, %c0_131, %c0_132] : memref<8x8x8x256xf32, #tpu.memory_space<vmem>>, vector<1x4x8x256xf32>
    %127 = vector.shape_cast %126 : vector<1x4x8x256xf32> to vector<4x8x256xf32>
    %c3_133 = arith.constant 3 : index
    %c0_134 = arith.constant 0 : index
    %c0_135 = arith.constant 0 : index
    %c0_136 = arith.constant 0 : index
    %128 = vector.load %arg2[%c3_133, %c0_134, %c0_135, %c0_136] : memref<5x5x8x256xf32, #tpu.memory_space<vmem>>, vector<1x1x8x256xf32>
    %129 = vector.shape_cast %128 : vector<1x1x8x256xf32> to vector<8x256xf32>
    %130 = vector.shape_cast %129 : vector<8x256xf32> to vector<1x8x256xf32>
    %131 = vector.broadcast %130 : vector<1x8x256xf32> to vector<4x8x256xf32>
    %132 = arith.mulf %127, %131 : vector<4x8x256xf32>
    %133 = arith.addf %125, %132 : vector<4x8x256xf32>
    %c3_137 = arith.constant 3 : index
    %c1_138 = arith.constant 1 : index
    %c0_139 = arith.constant 0 : index
    %c0_140 = arith.constant 0 : index
    %134 = vector.load %arg6[%c3_137, %c1_138, %c0_139, %c0_140] : memref<8x8x8x256xf32, #tpu.memory_space<vmem>>, vector<1x4x8x256xf32>
    %135 = vector.shape_cast %134 : vector<1x4x8x256xf32> to vector<4x8x256xf32>
    %c3_141 = arith.constant 3 : index
    %c1_142 = arith.constant 1 : index
    %c0_143 = arith.constant 0 : index
    %c0_144 = arith.constant 0 : index
    %136 = vector.load %arg2[%c3_141, %c1_142, %c0_143, %c0_144] : memref<5x5x8x256xf32, #tpu.memory_space<vmem>>, vector<1x1x8x256xf32>
    %137 = vector.shape_cast %136 : vector<1x1x8x256xf32> to vector<8x256xf32>
    %138 = vector.shape_cast %137 : vector<8x256xf32> to vector<1x8x256xf32>
    %139 = vector.broadcast %138 : vector<1x8x256xf32> to vector<4x8x256xf32>
    %140 = arith.mulf %135, %139 : vector<4x8x256xf32>
    %141 = arith.addf %133, %140 : vector<4x8x256xf32>
    %c3_145 = arith.constant 3 : index
    %c2_146 = arith.constant 2 : index
    %c0_147 = arith.constant 0 : index
    %c0_148 = arith.constant 0 : index
    %142 = vector.load %arg6[%c3_145, %c2_146, %c0_147, %c0_148] : memref<8x8x8x256xf32, #tpu.memory_space<vmem>>, vector<1x4x8x256xf32>
    %143 = vector.shape_cast %142 : vector<1x4x8x256xf32> to vector<4x8x256xf32>
    %c3_149 = arith.constant 3 : index
    %c2_150 = arith.constant 2 : index
    %c0_151 = arith.constant 0 : index
    %c0_152 = arith.constant 0 : index
    %144 = vector.load %arg2[%c3_149, %c2_150, %c0_151, %c0_152] : memref<5x5x8x256xf32, #tpu.memory_space<vmem>>, vector<1x1x8x256xf32>
    %145 = vector.shape_cast %144 : vector<1x1x8x256xf32> to vector<8x256xf32>
    %146 = vector.shape_cast %145 : vector<8x256xf32> to vector<1x8x256xf32>
    %147 = vector.broadcast %146 : vector<1x8x256xf32> to vector<4x8x256xf32>
    %148 = arith.mulf %143, %147 : vector<4x8x256xf32>
    %149 = arith.addf %141, %148 : vector<4x8x256xf32>
    %c3_153 = arith.constant 3 : index
    %c3_154 = arith.constant 3 : index
    %c0_155 = arith.constant 0 : index
    %c0_156 = arith.constant 0 : index
    %150 = vector.load %arg6[%c3_153, %c3_154, %c0_155, %c0_156] : memref<8x8x8x256xf32, #tpu.memory_space<vmem>>, vector<1x4x8x256xf32>
    %151 = vector.shape_cast %150 : vector<1x4x8x256xf32> to vector<4x8x256xf32>
    %c3_157 = arith.constant 3 : index
    %c3_158 = arith.constant 3 : index
    %c0_159 = arith.constant 0 : index
    %c0_160 = arith.constant 0 : index
    %152 = vector.load %arg2[%c3_157, %c3_158, %c0_159, %c0_160] : memref<5x5x8x256xf32, #tpu.memory_space<vmem>>, vector<1x1x8x256xf32>
    %153 = vector.shape_cast %152 : vector<1x1x8x256xf32> to vector<8x256xf32>
    %154 = vector.shape_cast %153 : vector<8x256xf32> to vector<1x8x256xf32>
    %155 = vector.broadcast %154 : vector<1x8x256xf32> to vector<4x8x256xf32>
    %156 = arith.mulf %151, %155 : vector<4x8x256xf32>
    %157 = arith.addf %149, %156 : vector<4x8x256xf32>
    %c3_161 = arith.constant 3 : index
    %c4_162 = arith.constant 4 : index
    %c0_163 = arith.constant 0 : index
    %c0_164 = arith.constant 0 : index
    %158 = vector.load %arg6[%c3_161, %c4_162, %c0_163, %c0_164] : memref<8x8x8x256xf32, #tpu.memory_space<vmem>>, vector<1x4x8x256xf32>
    %159 = vector.shape_cast %158 : vector<1x4x8x256xf32> to vector<4x8x256xf32>
    %c3_165 = arith.constant 3 : index
    %c4_166 = arith.constant 4 : index
    %c0_167 = arith.constant 0 : index
    %c0_168 = arith.constant 0 : index
    %160 = vector.load %arg2[%c3_165, %c4_166, %c0_167, %c0_168] : memref<5x5x8x256xf32, #tpu.memory_space<vmem>>, vector<1x1x8x256xf32>
    %161 = vector.shape_cast %160 : vector<1x1x8x256xf32> to vector<8x256xf32>
    %162 = vector.shape_cast %161 : vector<8x256xf32> to vector<1x8x256xf32>
    %163 = vector.broadcast %162 : vector<1x8x256xf32> to vector<4x8x256xf32>
    %164 = arith.mulf %159, %163 : vector<4x8x256xf32>
    %165 = arith.addf %157, %164 : vector<4x8x256xf32>
    %c4_169 = arith.constant 4 : index
    %c0_170 = arith.constant 0 : index
    %c0_171 = arith.constant 0 : index
    %c0_172 = arith.constant 0 : index
    %166 = vector.load %arg6[%c4_169, %c0_170, %c0_171, %c0_172] : memref<8x8x8x256xf32, #tpu.memory_space<vmem>>, vector<1x4x8x256xf32>
    %167 = vector.shape_cast %166 : vector<1x4x8x256xf32> to vector<4x8x256xf32>
    %c4_173 = arith.constant 4 : index
    %c0_174 = arith.constant 0 : index
    %c0_175 = arith.constant 0 : index
    %c0_176 = arith.constant 0 : index
    %168 = vector.load %arg2[%c4_173, %c0_174, %c0_175, %c0_176] : memref<5x5x8x256xf32, #tpu.memory_space<vmem>>, vector<1x1x8x256xf32>
    %169 = vector.shape_cast %168 : vector<1x1x8x256xf32> to vector<8x256xf32>
    %170 = vector.shape_cast %169 : vector<8x256xf32> to vector<1x8x256xf32>
    %171 = vector.broadcast %170 : vector<1x8x256xf32> to vector<4x8x256xf32>
    %172 = arith.mulf %167, %171 : vector<4x8x256xf32>
    %173 = arith.addf %165, %172 : vector<4x8x256xf32>
    %c4_177 = arith.constant 4 : index
    %c1_178 = arith.constant 1 : index
    %c0_179 = arith.constant 0 : index
    %c0_180 = arith.constant 0 : index
    %174 = vector.load %arg6[%c4_177, %c1_178, %c0_179, %c0_180] : memref<8x8x8x256xf32, #tpu.memory_space<vmem>>, vector<1x4x8x256xf32>
    %175 = vector.shape_cast %174 : vector<1x4x8x256xf32> to vector<4x8x256xf32>
    %c4_181 = arith.constant 4 : index
    %c1_182 = arith.constant 1 : index
    %c0_183 = arith.constant 0 : index
    %c0_184 = arith.constant 0 : index
    %176 = vector.load %arg2[%c4_181, %c1_182, %c0_183, %c0_184] : memref<5x5x8x256xf32, #tpu.memory_space<vmem>>, vector<1x1x8x256xf32>
    %177 = vector.shape_cast %176 : vector<1x1x8x256xf32> to vector<8x256xf32>
    %178 = vector.shape_cast %177 : vector<8x256xf32> to vector<1x8x256xf32>
    %179 = vector.broadcast %178 : vector<1x8x256xf32> to vector<4x8x256xf32>
    %180 = arith.mulf %175, %179 : vector<4x8x256xf32>
    %181 = arith.addf %173, %180 : vector<4x8x256xf32>
    %c4_185 = arith.constant 4 : index
    %c2_186 = arith.constant 2 : index
    %c0_187 = arith.constant 0 : index
    %c0_188 = arith.constant 0 : index
    %182 = vector.load %arg6[%c4_185, %c2_186, %c0_187, %c0_188] : memref<8x8x8x256xf32, #tpu.memory_space<vmem>>, vector<1x4x8x256xf32>
    %183 = vector.shape_cast %182 : vector<1x4x8x256xf32> to vector<4x8x256xf32>
    %c4_189 = arith.constant 4 : index
    %c2_190 = arith.constant 2 : index
    %c0_191 = arith.constant 0 : index
    %c0_192 = arith.constant 0 : index
    %184 = vector.load %arg2[%c4_189, %c2_190, %c0_191, %c0_192] : memref<5x5x8x256xf32, #tpu.memory_space<vmem>>, vector<1x1x8x256xf32>
    %185 = vector.shape_cast %184 : vector<1x1x8x256xf32> to vector<8x256xf32>
    %186 = vector.shape_cast %185 : vector<8x256xf32> to vector<1x8x256xf32>
    %187 = vector.broadcast %186 : vector<1x8x256xf32> to vector<4x8x256xf32>
    %188 = arith.mulf %183, %187 : vector<4x8x256xf32>
    %189 = arith.addf %181, %188 : vector<4x8x256xf32>
    %c4_193 = arith.constant 4 : index
    %c3_194 = arith.constant 3 : index
    %c0_195 = arith.constant 0 : index
    %c0_196 = arith.constant 0 : index
    %190 = vector.load %arg6[%c4_193, %c3_194, %c0_195, %c0_196] : memref<8x8x8x256xf32, #tpu.memory_space<vmem>>, vector<1x4x8x256xf32>
    %191 = vector.shape_cast %190 : vector<1x4x8x256xf32> to vector<4x8x256xf32>
    %c4_197 = arith.constant 4 : index
    %c3_198 = arith.constant 3 : index
    %c0_199 = arith.constant 0 : index
    %c0_200 = arith.constant 0 : index
    %192 = vector.load %arg2[%c4_197, %c3_198, %c0_199, %c0_200] : memref<5x5x8x256xf32, #tpu.memory_space<vmem>>, vector<1x1x8x256xf32>
    %193 = vector.shape_cast %192 : vector<1x1x8x256xf32> to vector<8x256xf32>
    %194 = vector.shape_cast %193 : vector<8x256xf32> to vector<1x8x256xf32>
    %195 = vector.broadcast %194 : vector<1x8x256xf32> to vector<4x8x256xf32>
    %196 = arith.mulf %191, %195 : vector<4x8x256xf32>
    %197 = arith.addf %189, %196 : vector<4x8x256xf32>
    %c4_201 = arith.constant 4 : index
    %c4_202 = arith.constant 4 : index
    %c0_203 = arith.constant 0 : index
    %c0_204 = arith.constant 0 : index
    %198 = vector.load %arg6[%c4_201, %c4_202, %c0_203, %c0_204] : memref<8x8x8x256xf32, #tpu.memory_space<vmem>>, vector<1x4x8x256xf32>
    %199 = vector.shape_cast %198 : vector<1x4x8x256xf32> to vector<4x8x256xf32>
    %c4_205 = arith.constant 4 : index
    %c4_206 = arith.constant 4 : index
    %c0_207 = arith.constant 0 : index
    %c0_208 = arith.constant 0 : index
    %200 = vector.load %arg2[%c4_205, %c4_206, %c0_207, %c0_208] : memref<5x5x8x256xf32, #tpu.memory_space<vmem>>, vector<1x1x8x256xf32>
    %201 = vector.shape_cast %200 : vector<1x1x8x256xf32> to vector<8x256xf32>
    %202 = vector.shape_cast %201 : vector<8x256xf32> to vector<1x8x256xf32>
    %203 = vector.broadcast %202 : vector<1x8x256xf32> to vector<4x8x256xf32>
    %204 = arith.mulf %199, %203 : vector<4x8x256xf32>
    %205 = arith.addf %197, %204 : vector<4x8x256xf32>
    %cst_209 = arith.constant dense<0.000000e+00> : vector<4x256xf32>
    %206 = vector.multi_reduction <add>, %205, %cst_209 [1] : vector<4x8x256xf32> to vector<4x256xf32>
    %c0_210 = arith.constant 0 : index
    %c0_211 = arith.constant 0 : index
    %207 = vector.load %arg3[%c0_210, %c0_211] : memref<4x256xf32, #tpu.memory_space<vmem>>, vector<1x256xf32>
    %208 = vector.shape_cast %207 : vector<1x256xf32> to vector<256xf32>
    %209 = vector.shape_cast %208 : vector<256xf32> to vector<1x256xf32>
    %210 = vector.broadcast %209 : vector<1x256xf32> to vector<4x256xf32>
    %211 = arith.addf %206, %210 : vector<4x256xf32>
    %cst_212 = arith.constant 0.000000e+00 : f32
    %212 = vector.broadcast %cst_212 : f32 to vector<4x256xf32>
    %213 = arith.maximumf %211, %212 : vector<4x256xf32>
    %c0_213 = arith.constant 0 : index
    %c0_214 = arith.constant 0 : index
    %214 = vector.load %arg7[%c0_213, %c0_214] : memref<16x256xf32, #tpu.memory_space<vmem>>, vector<4x256xf32>
    tpu.vector_store %arg7[%c0_213, %c0_214], %213 {strides = array<i32>} : memref<16x256xf32, #tpu.memory_space<vmem>>, vector<4x256xf32>,
    %cst_215 = arith.constant 0.000000e+00 : f32
    %215 = vector.broadcast %cst_215 : f32 to vector<4x8x256xf32>
    %c1_216 = arith.constant 1 : index
    %c0_217 = arith.constant 0 : index
    %c0_218 = arith.constant 0 : index
    %c0_219 = arith.constant 0 : index
    %216 = vector.load %arg6[%c1_216, %c0_217, %c0_218, %c0_219] : memref<8x8x8x256xf32, #tpu.memory_space<vmem>>, vector<1x4x8x256xf32>
    %217 = vector.shape_cast %216 : vector<1x4x8x256xf32> to vector<4x8x256xf32>
    %c0_220 = arith.constant 0 : index
    %c0_221 = arith.constant 0 : index
    %c0_222 = arith.constant 0 : index
    %c0_223 = arith.constant 0 : index
    %218 = vector.load %arg2[%c0_220, %c0_221, %c0_222, %c0_223] : memref<5x5x8x256xf32, #tpu.memory_space<vmem>>, vector<1x1x8x256xf32>
    %219 = vector.shape_cast %218 : vector<1x1x8x256xf32> to vector<8x256xf32>
    %220 = vector.shape_cast %219 : vector<8x256xf32> to vector<1x8x256xf32>
    %221 = vector.broadcast %220 : vector<1x8x256xf32> to vector<4x8x256xf32>
    %222 = arith.mulf %217, %221 : vector<4x8x256xf32>
    %223 = arith.addf %215, %222 : vector<4x8x256xf32>
    %c1_224 = arith.constant 1 : index
    %c1_225 = arith.constant 1 : index
    %c0_226 = arith.constant 0 : index
    %c0_227 = arith.constant 0 : index
    %224 = vector.load %arg6[%c1_224, %c1_225, %c0_226, %c0_227] : memref<8x8x8x256xf32, #tpu.memory_space<vmem>>, vector<1x4x8x256xf32>
    %225 = vector.shape_cast %224 : vector<1x4x8x256xf32> to vector<4x8x256xf32>
    %c0_228 = arith.constant 0 : index
    %c1_229 = arith.constant 1 : index
    %c0_230 = arith.constant 0 : index
    %c0_231 = arith.constant 0 : index
    %226 = vector.load %arg2[%c0_228, %c1_229, %c0_230, %c0_231] : memref<5x5x8x256xf32, #tpu.memory_space<vmem>>, vector<1x1x8x256xf32>
    %227 = vector.shape_cast %226 : vector<1x1x8x256xf32> to vector<8x256xf32>
    %228 = vector.shape_cast %227 : vector<8x256xf32> to vector<1x8x256xf32>
    %229 = vector.broadcast %228 : vector<1x8x256xf32> to vector<4x8x256xf32>
    %230 = arith.mulf %225, %229 : vector<4x8x256xf32>
    %231 = arith.addf %223, %230 : vector<4x8x256xf32>
    %c1_232 = arith.constant 1 : index
    %c2_233 = arith.constant 2 : index
    %c0_234 = arith.constant 0 : index
    %c0_235 = arith.constant 0 : index
    %232 = vector.load %arg6[%c1_232, %c2_233, %c0_234, %c0_235] : memref<8x8x8x256xf32, #tpu.memory_space<vmem>>, vector<1x4x8x256xf32>
    %233 = vector.shape_cast %232 : vector<1x4x8x256xf32> to vector<4x8x256xf32>
    %c0_236 = arith.constant 0 : index
    %c2_237 = arith.constant 2 : index
    %c0_238 = arith.constant 0 : index
    %c0_239 = arith.constant 0 : index
    %234 = vector.load %arg2[%c0_236, %c2_237, %c0_238, %c0_239] : memref<5x5x8x256xf32, #tpu.memory_space<vmem>>, vector<1x1x8x256xf32>
    %235 = vector.shape_cast %234 : vector<1x1x8x256xf32> to vector<8x256xf32>
    %236 = vector.shape_cast %235 : vector<8x256xf32> to vector<1x8x256xf32>
    %237 = vector.broadcast %236 : vector<1x8x256xf32> to vector<4x8x256xf32>
    %238 = arith.mulf %233, %237 : vector<4x8x256xf32>
    %239 = arith.addf %231, %238 : vector<4x8x256xf32>
    %c1_240 = arith.constant 1 : index
    %c3_241 = arith.constant 3 : index
    %c0_242 = arith.constant 0 : index
    %c0_243 = arith.constant 0 : index
    %240 = vector.load %arg6[%c1_240, %c3_241, %c0_242, %c0_243] : memref<8x8x8x256xf32, #tpu.memory_space<vmem>>, vector<1x4x8x256xf32>
    %241 = vector.shape_cast %240 : vector<1x4x8x256xf32> to vector<4x8x256xf32>
    %c0_244 = arith.constant 0 : index
    %c3_245 = arith.constant 3 : index
    %c0_246 = arith.constant 0 : index
    %c0_247 = arith.constant 0 : index
    %242 = vector.load %arg2[%c0_244, %c3_245, %c0_246, %c0_247] : memref<5x5x8x256xf32, #tpu.memory_space<vmem>>, vector<1x1x8x256xf32>
    %243 = vector.shape_cast %242 : vector<1x1x8x256xf32> to vector<8x256xf32>
    %244 = vector.shape_cast %243 : vector<8x256xf32> to vector<1x8x256xf32>
    %245 = vector.broadcast %244 : vector<1x8x256xf32> to vector<4x8x256xf32>
    %246 = arith.mulf %241, %245 : vector<4x8x256xf32>
    %247 = arith.addf %239, %246 : vector<4x8x256xf32>
    %c1_248 = arith.constant 1 : index
    %c4_249 = arith.constant 4 : index
    %c0_250 = arith.constant 0 : index
    %c0_251 = arith.constant 0 : index
    %248 = vector.load %arg6[%c1_248, %c4_249, %c0_250, %c0_251] : memref<8x8x8x256xf32, #tpu.memory_space<vmem>>, vector<1x4x8x256xf32>
    %249 = vector.shape_cast %248 : vector<1x4x8x256xf32> to vector<4x8x256xf32>
    %c0_252 = arith.constant 0 : index
    %c4_253 = arith.constant 4 : index
    %c0_254 = arith.constant 0 : index
    %c0_255 = arith.constant 0 : index
    %250 = vector.load %arg2[%c0_252, %c4_253, %c0_254, %c0_255] : memref<5x5x8x256xf32, #tpu.memory_space<vmem>>, vector<1x1x8x256xf32>
    %251 = vector.shape_cast %250 : vector<1x1x8x256xf32> to vector<8x256xf32>
    %252 = vector.shape_cast %251 : vector<8x256xf32> to vector<1x8x256xf32>
    %253 = vector.broadcast %252 : vector<1x8x256xf32> to vector<4x8x256xf32>
    %254 = arith.mulf %249, %253 : vector<4x8x256xf32>
    %255 = arith.addf %247, %254 : vector<4x8x256xf32>
    %c2_256 = arith.constant 2 : index
    %c0_257 = arith.constant 0 : index
    %c0_258 = arith.constant 0 : index
    %c0_259 = arith.constant 0 : index
    %256 = vector.load %arg6[%c2_256, %c0_257, %c0_258, %c0_259] : memref<8x8x8x256xf32, #tpu.memory_space<vmem>>, vector<1x4x8x256xf32>
    %257 = vector.shape_cast %256 : vector<1x4x8x256xf32> to vector<4x8x256xf32>
    %c1_260 = arith.constant 1 : index
    %c0_261 = arith.constant 0 : index
    %c0_262 = arith.constant 0 : index
    %c0_263 = arith.constant 0 : index
    %258 = vector.load %arg2[%c1_260, %c0_261, %c0_262, %c0_263] : memref<5x5x8x256xf32, #tpu.memory_space<vmem>>, vector<1x1x8x256xf32>
    %259 = vector.shape_cast %258 : vector<1x1x8x256xf32> to vector<8x256xf32>
    %260 = vector.shape_cast %259 : vector<8x256xf32> to vector<1x8x256xf32>
    %261 = vector.broadcast %260 : vector<1x8x256xf32> to vector<4x8x256xf32>
    %262 = arith.mulf %257, %261 : vector<4x8x256xf32>
    %263 = arith.addf %255, %262 : vector<4x8x256xf32>
    %c2_264 = arith.constant 2 : index
    %c1_265 = arith.constant 1 : index
    %c0_266 = arith.constant 0 : index
    %c0_267 = arith.constant 0 : index
    %264 = vector.load %arg6[%c2_264, %c1_265, %c0_266, %c0_267] : memref<8x8x8x256xf32, #tpu.memory_space<vmem>>, vector<1x4x8x256xf32>
    %265 = vector.shape_cast %264 : vector<1x4x8x256xf32> to vector<4x8x256xf32>
    %c1_268 = arith.constant 1 : index
    %c1_269 = arith.constant 1 : index
    %c0_270 = arith.constant 0 : index
    %c0_271 = arith.constant 0 : index
    %266 = vector.load %arg2[%c1_268, %c1_269, %c0_270, %c0_271] : memref<5x5x8x256xf32, #tpu.memory_space<vmem>>, vector<1x1x8x256xf32>
    %267 = vector.shape_cast %266 : vector<1x1x8x256xf32> to vector<8x256xf32>
    %268 = vector.shape_cast %267 : vector<8x256xf32> to vector<1x8x256xf32>
    %269 = vector.broadcast %268 : vector<1x8x256xf32> to vector<4x8x256xf32>
    %270 = arith.mulf %265, %269 : vector<4x8x256xf32>
    %271 = arith.addf %263, %270 : vector<4x8x256xf32>
    %c2_272 = arith.constant 2 : index
    %c2_273 = arith.constant 2 : index
    %c0_274 = arith.constant 0 : index
    %c0_275 = arith.constant 0 : index
    %272 = vector.load %arg6[%c2_272, %c2_273, %c0_274, %c0_275] : memref<8x8x8x256xf32, #tpu.memory_space<vmem>>, vector<1x4x8x256xf32>
    %273 = vector.shape_cast %272 : vector<1x4x8x256xf32> to vector<4x8x256xf32>
    %c1_276 = arith.constant 1 : index
    %c2_277 = arith.constant 2 : index
    %c0_278 = arith.constant 0 : index
    %c0_279 = arith.constant 0 : index
    %274 = vector.load %arg2[%c1_276, %c2_277, %c0_278, %c0_279] : memref<5x5x8x256xf32, #tpu.memory_space<vmem>>, vector<1x1x8x256xf32>
    %275 = vector.shape_cast %274 : vector<1x1x8x256xf32> to vector<8x256xf32>
    %276 = vector.shape_cast %275 : vector<8x256xf32> to vector<1x8x256xf32>
    %277 = vector.broadcast %276 : vector<1x8x256xf32> to vector<4x8x256xf32>
    %278 = arith.mulf %273, %277 : vector<4x8x256xf32>
    %279 = arith.addf %271, %278 : vector<4x8x256xf32>
    %c2_280 = arith.constant 2 : index
    %c3_281 = arith.constant 3 : index
    %c0_282 = arith.constant 0 : index
    %c0_283 = arith.constant 0 : index
    %280 = vector.load %arg6[%c2_280, %c3_281, %c0_282, %c0_283] : memref<8x8x8x256xf32, #tpu.memory_space<vmem>>, vector<1x4x8x256xf32>
    %281 = vector.shape_cast %280 : vector<1x4x8x256xf32> to vector<4x8x256xf32>
    %c1_284 = arith.constant 1 : index
    %c3_285 = arith.constant 3 : index
    %c0_286 = arith.constant 0 : index
    %c0_287 = arith.constant 0 : index
    %282 = vector.load %arg2[%c1_284, %c3_285, %c0_286, %c0_287] : memref<5x5x8x256xf32, #tpu.memory_space<vmem>>, vector<1x1x8x256xf32>
    %283 = vector.shape_cast %282 : vector<1x1x8x256xf32> to vector<8x256xf32>
    %284 = vector.shape_cast %283 : vector<8x256xf32> to vector<1x8x256xf32>
    %285 = vector.broadcast %284 : vector<1x8x256xf32> to vector<4x8x256xf32>
    %286 = arith.mulf %281, %285 : vector<4x8x256xf32>
    %287 = arith.addf %279, %286 : vector<4x8x256xf32>
    %c2_288 = arith.constant 2 : index
    %c4_289 = arith.constant 4 : index
    %c0_290 = arith.constant 0 : index
    %c0_291 = arith.constant 0 : index
    %288 = vector.load %arg6[%c2_288, %c4_289, %c0_290, %c0_291] : memref<8x8x8x256xf32, #tpu.memory_space<vmem>>, vector<1x4x8x256xf32>
    %289 = vector.shape_cast %288 : vector<1x4x8x256xf32> to vector<4x8x256xf32>
    %c1_292 = arith.constant 1 : index
    %c4_293 = arith.constant 4 : index
    %c0_294 = arith.constant 0 : index
    %c0_295 = arith.constant 0 : index
    %290 = vector.load %arg2[%c1_292, %c4_293, %c0_294, %c0_295] : memref<5x5x8x256xf32, #tpu.memory_space<vmem>>, vector<1x1x8x256xf32>
    %291 = vector.shape_cast %290 : vector<1x1x8x256xf32> to vector<8x256xf32>
    %292 = vector.shape_cast %291 : vector<8x256xf32> to vector<1x8x256xf32>
    %293 = vector.broadcast %292 : vector<1x8x256xf32> to vector<4x8x256xf32>
    %294 = arith.mulf %289, %293 : vector<4x8x256xf32>
    %295 = arith.addf %287, %294 : vector<4x8x256xf32>
    %c3_296 = arith.constant 3 : index
    %c0_297 = arith.constant 0 : index
    %c0_298 = arith.constant 0 : index
    %c0_299 = arith.constant 0 : index
    %296 = vector.load %arg6[%c3_296, %c0_297, %c0_298, %c0_299] : memref<8x8x8x256xf32, #tpu.memory_space<vmem>>, vector<1x4x8x256xf32>
    %297 = vector.shape_cast %296 : vector<1x4x8x256xf32> to vector<4x8x256xf32>
    %c2_300 = arith.constant 2 : index
    %c0_301 = arith.constant 0 : index
    %c0_302 = arith.constant 0 : index
    %c0_303 = arith.constant 0 : index
    %298 = vector.load %arg2[%c2_300, %c0_301, %c0_302, %c0_303] : memref<5x5x8x256xf32, #tpu.memory_space<vmem>>, vector<1x1x8x256xf32>
    %299 = vector.shape_cast %298 : vector<1x1x8x256xf32> to vector<8x256xf32>
    %300 = vector.shape_cast %299 : vector<8x256xf32> to vector<1x8x256xf32>
    %301 = vector.broadcast %300 : vector<1x8x256xf32> to vector<4x8x256xf32>
    %302 = arith.mulf %297, %301 : vector<4x8x256xf32>
    %303 = arith.addf %295, %302 : vector<4x8x256xf32>
    %c3_304 = arith.constant 3 : index
    %c1_305 = arith.constant 1 : index
    %c0_306 = arith.constant 0 : index
    %c0_307 = arith.constant 0 : index
    %304 = vector.load %arg6[%c3_304, %c1_305, %c0_306, %c0_307] : memref<8x8x8x256xf32, #tpu.memory_space<vmem>>, vector<1x4x8x256xf32>
    %305 = vector.shape_cast %304 : vector<1x4x8x256xf32> to vector<4x8x256xf32>
    %c2_308 = arith.constant 2 : index
    %c1_309 = arith.constant 1 : index
    %c0_310 = arith.constant 0 : index
    %c0_311 = arith.constant 0 : index
    %306 = vector.load %arg2[%c2_308, %c1_309, %c0_310, %c0_311] : memref<5x5x8x256xf32, #tpu.memory_space<vmem>>, vector<1x1x8x256xf32>
    %307 = vector.shape_cast %306 : vector<1x1x8x256xf32> to vector<8x256xf32>
    %308 = vector.shape_cast %307 : vector<8x256xf32> to vector<1x8x256xf32>
    %309 = vector.broadcast %308 : vector<1x8x256xf32> to vector<4x8x256xf32>
    %310 = arith.mulf %305, %309 : vector<4x8x256xf32>
    %311 = arith.addf %303, %310 : vector<4x8x256xf32>
    %c3_312 = arith.constant 3 : index
    %c2_313 = arith.constant 2 : index
    %c0_314 = arith.constant 0 : index
    %c0_315 = arith.constant 0 : index
    %312 = vector.load %arg6[%c3_312, %c2_313, %c0_314, %c0_315] : memref<8x8x8x256xf32, #tpu.memory_space<vmem>>, vector<1x4x8x256xf32>
    %313 = vector.shape_cast %312 : vector<1x4x8x256xf32> to vector<4x8x256xf32>
    %c2_316 = arith.constant 2 : index
    %c2_317 = arith.constant 2 : index
    %c0_318 = arith.constant 0 : index
    %c0_319 = arith.constant 0 : index
    %314 = vector.load %arg2[%c2_316, %c2_317, %c0_318, %c0_319] : memref<5x5x8x256xf32, #tpu.memory_space<vmem>>, vector<1x1x8x256xf32>
    %315 = vector.shape_cast %314 : vector<1x1x8x256xf32> to vector<8x256xf32>
    %316 = vector.shape_cast %315 : vector<8x256xf32> to vector<1x8x256xf32>
    %317 = vector.broadcast %316 : vector<1x8x256xf32> to vector<4x8x256xf32>
    %318 = arith.mulf %313, %317 : vector<4x8x256xf32>
    %319 = arith.addf %311, %318 : vector<4x8x256xf32>
    %c3_320 = arith.constant 3 : index
    %c3_321 = arith.constant 3 : index
    %c0_322 = arith.constant 0 : index
    %c0_323 = arith.constant 0 : index
    %320 = vector.load %arg6[%c3_320, %c3_321, %c0_322, %c0_323] : memref<8x8x8x256xf32, #tpu.memory_space<vmem>>, vector<1x4x8x256xf32>
    %321 = vector.shape_cast %320 : vector<1x4x8x256xf32> to vector<4x8x256xf32>
    %c2_324 = arith.constant 2 : index
    %c3_325 = arith.constant 3 : index
    %c0_326 = arith.constant 0 : index
    %c0_327 = arith.constant 0 : index
    %322 = vector.load %arg2[%c2_324, %c3_325, %c0_326, %c0_327] : memref<5x5x8x256xf32, #tpu.memory_space<vmem>>, vector<1x1x8x256xf32>
    %323 = vector.shape_cast %322 : vector<1x1x8x256xf32> to vector<8x256xf32>
    %324 = vector.shape_cast %323 : vector<8x256xf32> to vector<1x8x256xf32>
    %325 = vector.broadcast %324 : vector<1x8x256xf32> to vector<4x8x256xf32>
    %326 = arith.mulf %321, %325 : vector<4x8x256xf32>
    %327 = arith.addf %319, %326 : vector<4x8x256xf32>
    %c3_328 = arith.constant 3 : index
    %c4_329 = arith.constant 4 : index
    %c0_330 = arith.constant 0 : index
    %c0_331 = arith.constant 0 : index
    %328 = vector.load %arg6[%c3_328, %c4_329, %c0_330, %c0_331] : memref<8x8x8x256xf32, #tpu.memory_space<vmem>>, vector<1x4x8x256xf32>
    %329 = vector.shape_cast %328 : vector<1x4x8x256xf32> to vector<4x8x256xf32>
    %c2_332 = arith.constant 2 : index
    %c4_333 = arith.constant 4 : index
    %c0_334 = arith.constant 0 : index
    %c0_335 = arith.constant 0 : index
    %330 = vector.load %arg2[%c2_332, %c4_333, %c0_334, %c0_335] : memref<5x5x8x256xf32, #tpu.memory_space<vmem>>, vector<1x1x8x256xf32>
    %331 = vector.shape_cast %330 : vector<1x1x8x256xf32> to vector<8x256xf32>
    %332 = vector.shape_cast %331 : vector<8x256xf32> to vector<1x8x256xf32>
    %333 = vector.broadcast %332 : vector<1x8x256xf32> to vector<4x8x256xf32>
    %334 = arith.mulf %329, %333 : vector<4x8x256xf32>
    %335 = arith.addf %327, %334 : vector<4x8x256xf32>
    %c4_336 = arith.constant 4 : index
    %c0_337 = arith.constant 0 : index
    %c0_338 = arith.constant 0 : index
    %c0_339 = arith.constant 0 : index
    %336 = vector.load %arg6[%c4_336, %c0_337, %c0_338, %c0_339] : memref<8x8x8x256xf32, #tpu.memory_space<vmem>>, vector<1x4x8x256xf32>
    %337 = vector.shape_cast %336 : vector<1x4x8x256xf32> to vector<4x8x256xf32>
    %c3_340 = arith.constant 3 : index
    %c0_341 = arith.constant 0 : index
    %c0_342 = arith.constant 0 : index
    %c0_343 = arith.constant 0 : index
    %338 = vector.load %arg2[%c3_340, %c0_341, %c0_342, %c0_343] : memref<5x5x8x256xf32, #tpu.memory_space<vmem>>, vector<1x1x8x256xf32>
    %339 = vector.shape_cast %338 : vector<1x1x8x256xf32> to vector<8x256xf32>
    %340 = vector.shape_cast %339 : vector<8x256xf32> to vector<1x8x256xf32>
    %341 = vector.broadcast %340 : vector<1x8x256xf32> to vector<4x8x256xf32>
    %342 = arith.mulf %337, %341 : vector<4x8x256xf32>
    %343 = arith.addf %335, %342 : vector<4x8x256xf32>
    %c4_344 = arith.constant 4 : index
    %c1_345 = arith.constant 1 : index
    %c0_346 = arith.constant 0 : index
    %c0_347 = arith.constant 0 : index
    %344 = vector.load %arg6[%c4_344, %c1_345, %c0_346, %c0_347] : memref<8x8x8x256xf32, #tpu.memory_space<vmem>>, vector<1x4x8x256xf32>
    %345 = vector.shape_cast %344 : vector<1x4x8x256xf32> to vector<4x8x256xf32>
    %c3_348 = arith.constant 3 : index
    %c1_349 = arith.constant 1 : index
    %c0_350 = arith.constant 0 : index
    %c0_351 = arith.constant 0 : index
    %346 = vector.load %arg2[%c3_348, %c1_349, %c0_350, %c0_351] : memref<5x5x8x256xf32, #tpu.memory_space<vmem>>, vector<1x1x8x256xf32>
    %347 = vector.shape_cast %346 : vector<1x1x8x256xf32> to vector<8x256xf32>
    %348 = vector.shape_cast %347 : vector<8x256xf32> to vector<1x8x256xf32>
    %349 = vector.broadcast %348 : vector<1x8x256xf32> to vector<4x8x256xf32>
    %350 = arith.mulf %345, %349 : vector<4x8x256xf32>
    %351 = arith.addf %343, %350 : vector<4x8x256xf32>
    %c4_352 = arith.constant 4 : index
    %c2_353 = arith.constant 2 : index
    %c0_354 = arith.constant 0 : index
    %c0_355 = arith.constant 0 : index
    %352 = vector.load %arg6[%c4_352, %c2_353, %c0_354, %c0_355] : memref<8x8x8x256xf32, #tpu.memory_space<vmem>>, vector<1x4x8x256xf32>
    %353 = vector.shape_cast %352 : vector<1x4x8x256xf32> to vector<4x8x256xf32>
    %c3_356 = arith.constant 3 : index
    %c2_357 = arith.constant 2 : index
    %c0_358 = arith.constant 0 : index
    %c0_359 = arith.constant 0 : index
    %354 = vector.load %arg2[%c3_356, %c2_357, %c0_358, %c0_359] : memref<5x5x8x256xf32, #tpu.memory_space<vmem>>, vector<1x1x8x256xf32>
    %355 = vector.shape_cast %354 : vector<1x1x8x256xf32> to vector<8x256xf32>
    %356 = vector.shape_cast %355 : vector<8x256xf32> to vector<1x8x256xf32>
    %357 = vector.broadcast %356 : vector<1x8x256xf32> to vector<4x8x256xf32>
    %358 = arith.mulf %353, %357 : vector<4x8x256xf32>
    %359 = arith.addf %351, %358 : vector<4x8x256xf32>
    %c4_360 = arith.constant 4 : index
    %c3_361 = arith.constant 3 : index
    %c0_362 = arith.constant 0 : index
    %c0_363 = arith.constant 0 : index
    %360 = vector.load %arg6[%c4_360, %c3_361, %c0_362, %c0_363] : memref<8x8x8x256xf32, #tpu.memory_space<vmem>>, vector<1x4x8x256xf32>
    %361 = vector.shape_cast %360 : vector<1x4x8x256xf32> to vector<4x8x256xf32>
    %c3_364 = arith.constant 3 : index
    %c3_365 = arith.constant 3 : index
    %c0_366 = arith.constant 0 : index
    %c0_367 = arith.constant 0 : index
    %362 = vector.load %arg2[%c3_364, %c3_365, %c0_366, %c0_367] : memref<5x5x8x256xf32, #tpu.memory_space<vmem>>, vector<1x1x8x256xf32>
    %363 = vector.shape_cast %362 : vector<1x1x8x256xf32> to vector<8x256xf32>
    %364 = vector.shape_cast %363 : vector<8x256xf32> to vector<1x8x256xf32>
    %365 = vector.broadcast %364 : vector<1x8x256xf32> to vector<4x8x256xf32>
    %366 = arith.mulf %361, %365 : vector<4x8x256xf32>
    %367 = arith.addf %359, %366 : vector<4x8x256xf32>
    %c4_368 = arith.constant 4 : index
    %c4_369 = arith.constant 4 : index
    %c0_370 = arith.constant 0 : index
    %c0_371 = arith.constant 0 : index
    %368 = vector.load %arg6[%c4_368, %c4_369, %c0_370, %c0_371] : memref<8x8x8x256xf32, #tpu.memory_space<vmem>>, vector<1x4x8x256xf32>
    %369 = vector.shape_cast %368 : vector<1x4x8x256xf32> to vector<4x8x256xf32>
    %c3_372 = arith.constant 3 : index
    %c4_373 = arith.constant 4 : index
    %c0_374 = arith.constant 0 : index
    %c0_375 = arith.constant 0 : index
    %370 = vector.load %arg2[%c3_372, %c4_373, %c0_374, %c0_375] : memref<5x5x8x256xf32, #tpu.memory_space<vmem>>, vector<1x1x8x256xf32>
    %371 = vector.shape_cast %370 : vector<1x1x8x256xf32> to vector<8x256xf32>
    %372 = vector.shape_cast %371 : vector<8x256xf32> to vector<1x8x256xf32>
    %373 = vector.broadcast %372 : vector<1x8x256xf32> to vector<4x8x256xf32>
    %374 = arith.mulf %369, %373 : vector<4x8x256xf32>
    %375 = arith.addf %367, %374 : vector<4x8x256xf32>
    %c5 = arith.constant 5 : index
    %c0_376 = arith.constant 0 : index
    %c0_377 = arith.constant 0 : index
    %c0_378 = arith.constant 0 : index
    %376 = vector.load %arg6[%c5, %c0_376, %c0_377, %c0_378] : memref<8x8x8x256xf32, #tpu.memory_space<vmem>>, vector<1x4x8x256xf32>
    %377 = vector.shape_cast %376 : vector<1x4x8x256xf32> to vector<4x8x256xf32>
    %c4_379 = arith.constant 4 : index
    %c0_380 = arith.constant 0 : index
    %c0_381 = arith.constant 0 : index
    %c0_382 = arith.constant 0 : index
    %378 = vector.load %arg2[%c4_379, %c0_380, %c0_381, %c0_382] : memref<5x5x8x256xf32, #tpu.memory_space<vmem>>, vector<1x1x8x256xf32>
    %379 = vector.shape_cast %378 : vector<1x1x8x256xf32> to vector<8x256xf32>
    %380 = vector.shape_cast %379 : vector<8x256xf32> to vector<1x8x256xf32>
    %381 = vector.broadcast %380 : vector<1x8x256xf32> to vector<4x8x256xf32>
    %382 = arith.mulf %377, %381 : vector<4x8x256xf32>
    %383 = arith.addf %375, %382 : vector<4x8x256xf32>
    %c5_383 = arith.constant 5 : index
    %c1_384 = arith.constant 1 : index
    %c0_385 = arith.constant 0 : index
    %c0_386 = arith.constant 0 : index
    %384 = vector.load %arg6[%c5_383, %c1_384, %c0_385, %c0_386] : memref<8x8x8x256xf32, #tpu.memory_space<vmem>>, vector<1x4x8x256xf32>
    %385 = vector.shape_cast %384 : vector<1x4x8x256xf32> to vector<4x8x256xf32>
    %c4_387 = arith.constant 4 : index
    %c1_388 = arith.constant 1 : index
    %c0_389 = arith.constant 0 : index
    %c0_390 = arith.constant 0 : index
    %386 = vector.load %arg2[%c4_387, %c1_388, %c0_389, %c0_390] : memref<5x5x8x256xf32, #tpu.memory_space<vmem>>, vector<1x1x8x256xf32>
    %387 = vector.shape_cast %386 : vector<1x1x8x256xf32> to vector<8x256xf32>
    %388 = vector.shape_cast %387 : vector<8x256xf32> to vector<1x8x256xf32>
    %389 = vector.broadcast %388 : vector<1x8x256xf32> to vector<4x8x256xf32>
    %390 = arith.mulf %385, %389 : vector<4x8x256xf32>
    %391 = arith.addf %383, %390 : vector<4x8x256xf32>
    %c5_391 = arith.constant 5 : index
    %c2_392 = arith.constant 2 : index
    %c0_393 = arith.constant 0 : index
    %c0_394 = arith.constant 0 : index
    %392 = vector.load %arg6[%c5_391, %c2_392, %c0_393, %c0_394] : memref<8x8x8x256xf32, #tpu.memory_space<vmem>>, vector<1x4x8x256xf32>
    %393 = vector.shape_cast %392 : vector<1x4x8x256xf32> to vector<4x8x256xf32>
    %c4_395 = arith.constant 4 : index
    %c2_396 = arith.constant 2 : index
    %c0_397 = arith.constant 0 : index
    %c0_398 = arith.constant 0 : index
    %394 = vector.load %arg2[%c4_395, %c2_396, %c0_397, %c0_398] : memref<5x5x8x256xf32, #tpu.memory_space<vmem>>, vector<1x1x8x256xf32>
    %395 = vector.shape_cast %394 : vector<1x1x8x256xf32> to vector<8x256xf32>
    %396 = vector.shape_cast %395 : vector<8x256xf32> to vector<1x8x256xf32>
    %397 = vector.broadcast %396 : vector<1x8x256xf32> to vector<4x8x256xf32>
    %398 = arith.mulf %393, %397 : vector<4x8x256xf32>
    %399 = arith.addf %391, %398 : vector<4x8x256xf32>
    %c5_399 = arith.constant 5 : index
    %c3_400 = arith.constant 3 : index
    %c0_401 = arith.constant 0 : index
    %c0_402 = arith.constant 0 : index
    %400 = vector.load %arg6[%c5_399, %c3_400, %c0_401, %c0_402] : memref<8x8x8x256xf32, #tpu.memory_space<vmem>>, vector<1x4x8x256xf32>
    %401 = vector.shape_cast %400 : vector<1x4x8x256xf32> to vector<4x8x256xf32>
    %c4_403 = arith.constant 4 : index
    %c3_404 = arith.constant 3 : index
    %c0_405 = arith.constant 0 : index
    %c0_406 = arith.constant 0 : index
    %402 = vector.load %arg2[%c4_403, %c3_404, %c0_405, %c0_406] : memref<5x5x8x256xf32, #tpu.memory_space<vmem>>, vector<1x1x8x256xf32>
    %403 = vector.shape_cast %402 : vector<1x1x8x256xf32> to vector<8x256xf32>
    %404 = vector.shape_cast %403 : vector<8x256xf32> to vector<1x8x256xf32>
    %405 = vector.broadcast %404 : vector<1x8x256xf32> to vector<4x8x256xf32>
    %406 = arith.mulf %401, %405 : vector<4x8x256xf32>
    %407 = arith.addf %399, %406 : vector<4x8x256xf32>
    %c5_407 = arith.constant 5 : index
    %c4_408 = arith.constant 4 : index
    %c0_409 = arith.constant 0 : index
    %c0_410 = arith.constant 0 : index
    %408 = vector.load %arg6[%c5_407, %c4_408, %c0_409, %c0_410] : memref<8x8x8x256xf32, #tpu.memory_space<vmem>>, vector<1x4x8x256xf32>
    %409 = vector.shape_cast %408 : vector<1x4x8x256xf32> to vector<4x8x256xf32>
    %c4_411 = arith.constant 4 : index
    %c4_412 = arith.constant 4 : index
    %c0_413 = arith.constant 0 : index
    %c0_414 = arith.constant 0 : index
    %410 = vector.load %arg2[%c4_411, %c4_412, %c0_413, %c0_414] : memref<5x5x8x256xf32, #tpu.memory_space<vmem>>, vector<1x1x8x256xf32>
    %411 = vector.shape_cast %410 : vector<1x1x8x256xf32> to vector<8x256xf32>
    %412 = vector.shape_cast %411 : vector<8x256xf32> to vector<1x8x256xf32>
    %413 = vector.broadcast %412 : vector<1x8x256xf32> to vector<4x8x256xf32>
    %414 = arith.mulf %409, %413 : vector<4x8x256xf32>
    %415 = arith.addf %407, %414 : vector<4x8x256xf32>
    %cst_415 = arith.constant dense<0.000000e+00> : vector<4x256xf32>
    %416 = vector.multi_reduction <add>, %415, %cst_415 [1] : vector<4x8x256xf32> to vector<4x256xf32>
    %c0_416 = arith.constant 0 : index
    %c0_417 = arith.constant 0 : index
    %417 = vector.load %arg3[%c0_416, %c0_417] : memref<4x256xf32, #tpu.memory_space<vmem>>, vector<1x256xf32>
    %418 = vector.shape_cast %417 : vector<1x256xf32> to vector<256xf32>
    %419 = vector.shape_cast %418 : vector<256xf32> to vector<1x256xf32>
    %420 = vector.broadcast %419 : vector<1x256xf32> to vector<4x256xf32>
    %421 = arith.addf %416, %420 : vector<4x256xf32>
    %cst_418 = arith.constant 0.000000e+00 : f32
    %422 = vector.broadcast %cst_418 : f32 to vector<4x256xf32>
    %423 = arith.maximumf %421, %422 : vector<4x256xf32>
    %c4_419 = arith.constant 4 : index
    %c0_420 = arith.constant 0 : index
    %424 = vector.load %arg7[%c4_419, %c0_420] : memref<16x256xf32, #tpu.memory_space<vmem>>, vector<4x256xf32>
    tpu.vector_store %arg7[%c4_419, %c0_420], %423 {strides = array<i32>} : memref<16x256xf32, #tpu.memory_space<vmem>>, vector<4x256xf32>,
    %cst_421 = arith.constant 0.000000e+00 : f32
    %425 = vector.broadcast %cst_421 : f32 to vector<4x8x256xf32>
    %c2_422 = arith.constant 2 : index
    %c0_423 = arith.constant 0 : index
    %c0_424 = arith.constant 0 : index
    %c0_425 = arith.constant 0 : index
    %426 = vector.load %arg6[%c2_422, %c0_423, %c0_424, %c0_425] : memref<8x8x8x256xf32, #tpu.memory_space<vmem>>, vector<1x4x8x256xf32>
    %427 = vector.shape_cast %426 : vector<1x4x8x256xf32> to vector<4x8x256xf32>
    %c0_426 = arith.constant 0 : index
    %c0_427 = arith.constant 0 : index
    %c0_428 = arith.constant 0 : index
    %c0_429 = arith.constant 0 : index
    %428 = vector.load %arg2[%c0_426, %c0_427, %c0_428, %c0_429] : memref<5x5x8x256xf32, #tpu.memory_space<vmem>>, vector<1x1x8x256xf32>
    %429 = vector.shape_cast %428 : vector<1x1x8x256xf32> to vector<8x256xf32>
    %430 = vector.shape_cast %429 : vector<8x256xf32> to vector<1x8x256xf32>
    %431 = vector.broadcast %430 : vector<1x8x256xf32> to vector<4x8x256xf32>
    %432 = arith.mulf %427, %431 : vector<4x8x256xf32>
    %433 = arith.addf %425, %432 : vector<4x8x256xf32>
    %c2_430 = arith.constant 2 : index
    %c1_431 = arith.constant 1 : index
    %c0_432 = arith.constant 0 : index
    %c0_433 = arith.constant 0 : index
    %434 = vector.load %arg6[%c2_430, %c1_431, %c0_432, %c0_433] : memref<8x8x8x256xf32, #tpu.memory_space<vmem>>, vector<1x4x8x256xf32>
    %435 = vector.shape_cast %434 : vector<1x4x8x256xf32> to vector<4x8x256xf32>
    %c0_434 = arith.constant 0 : index
    %c1_435 = arith.constant 1 : index
    %c0_436 = arith.constant 0 : index
    %c0_437 = arith.constant 0 : index
    %436 = vector.load %arg2[%c0_434, %c1_435, %c0_436, %c0_437] : memref<5x5x8x256xf32, #tpu.memory_space<vmem>>, vector<1x1x8x256xf32>
    %437 = vector.shape_cast %436 : vector<1x1x8x256xf32> to vector<8x256xf32>
    %438 = vector.shape_cast %437 : vector<8x256xf32> to vector<1x8x256xf32>
    %439 = vector.broadcast %438 : vector<1x8x256xf32> to vector<4x8x256xf32>
    %440 = arith.mulf %435, %439 : vector<4x8x256xf32>
    %441 = arith.addf %433, %440 : vector<4x8x256xf32>
    %c2_438 = arith.constant 2 : index
    %c2_439 = arith.constant 2 : index
    %c0_440 = arith.constant 0 : index
    %c0_441 = arith.constant 0 : index
    %442 = vector.load %arg6[%c2_438, %c2_439, %c0_440, %c0_441] : memref<8x8x8x256xf32, #tpu.memory_space<vmem>>, vector<1x4x8x256xf32>
    %443 = vector.shape_cast %442 : vector<1x4x8x256xf32> to vector<4x8x256xf32>
    %c0_442 = arith.constant 0 : index
    %c2_443 = arith.constant 2 : index
    %c0_444 = arith.constant 0 : index
    %c0_445 = arith.constant 0 : index
    %444 = vector.load %arg2[%c0_442, %c2_443, %c0_444, %c0_445] : memref<5x5x8x256xf32, #tpu.memory_space<vmem>>, vector<1x1x8x256xf32>
    %445 = vector.shape_cast %444 : vector<1x1x8x256xf32> to vector<8x256xf32>
    %446 = vector.shape_cast %445 : vector<8x256xf32> to vector<1x8x256xf32>
    %447 = vector.broadcast %446 : vector<1x8x256xf32> to vector<4x8x256xf32>
    %448 = arith.mulf %443, %447 : vector<4x8x256xf32>
    %449 = arith.addf %441, %448 : vector<4x8x256xf32>
    %c2_446 = arith.constant 2 : index
    %c3_447 = arith.constant 3 : index
    %c0_448 = arith.constant 0 : index
    %c0_449 = arith.constant 0 : index
    %450 = vector.load %arg6[%c2_446, %c3_447, %c0_448, %c0_449] : memref<8x8x8x256xf32, #tpu.memory_space<vmem>>, vector<1x4x8x256xf32>
    %451 = vector.shape_cast %450 : vector<1x4x8x256xf32> to vector<4x8x256xf32>
    %c0_450 = arith.constant 0 : index
    %c3_451 = arith.constant 3 : index
    %c0_452 = arith.constant 0 : index
    %c0_453 = arith.constant 0 : index
    %452 = vector.load %arg2[%c0_450, %c3_451, %c0_452, %c0_453] : memref<5x5x8x256xf32, #tpu.memory_space<vmem>>, vector<1x1x8x256xf32>
    %453 = vector.shape_cast %452 : vector<1x1x8x256xf32> to vector<8x256xf32>
    %454 = vector.shape_cast %453 : vector<8x256xf32> to vector<1x8x256xf32>
    %455 = vector.broadcast %454 : vector<1x8x256xf32> to vector<4x8x256xf32>
    %456 = arith.mulf %451, %455 : vector<4x8x256xf32>
    %457 = arith.addf %449, %456 : vector<4x8x256xf32>
    %c2_454 = arith.constant 2 : index
    %c4_455 = arith.constant 4 : index
    %c0_456 = arith.constant 0 : index
    %c0_457 = arith.constant 0 : index
    %458 = vector.load %arg6[%c2_454, %c4_455, %c0_456, %c0_457] : memref<8x8x8x256xf32, #tpu.memory_space<vmem>>, vector<1x4x8x256xf32>
    %459 = vector.shape_cast %458 : vector<1x4x8x256xf32> to vector<4x8x256xf32>
    %c0_458 = arith.constant 0 : index
    %c4_459 = arith.constant 4 : index
    %c0_460 = arith.constant 0 : index
    %c0_461 = arith.constant 0 : index
    %460 = vector.load %arg2[%c0_458, %c4_459, %c0_460, %c0_461] : memref<5x5x8x256xf32, #tpu.memory_space<vmem>>, vector<1x1x8x256xf32>
    %461 = vector.shape_cast %460 : vector<1x1x8x256xf32> to vector<8x256xf32>
    %462 = vector.shape_cast %461 : vector<8x256xf32> to vector<1x8x256xf32>
    %463 = vector.broadcast %462 : vector<1x8x256xf32> to vector<4x8x256xf32>
    %464 = arith.mulf %459, %463 : vector<4x8x256xf32>
    %465 = arith.addf %457, %464 : vector<4x8x256xf32>
    %c3_462 = arith.constant 3 : index
    %c0_463 = arith.constant 0 : index
    %c0_464 = arith.constant 0 : index
    %c0_465 = arith.constant 0 : index
    %466 = vector.load %arg6[%c3_462, %c0_463, %c0_464, %c0_465] : memref<8x8x8x256xf32, #tpu.memory_space<vmem>>, vector<1x4x8x256xf32>
    %467 = vector.shape_cast %466 : vector<1x4x8x256xf32> to vector<4x8x256xf32>
    %c1_466 = arith.constant 1 : index
    %c0_467 = arith.constant 0 : index
    %c0_468 = arith.constant 0 : index
    %c0_469 = arith.constant 0 : index
    %468 = vector.load %arg2[%c1_466, %c0_467, %c0_468, %c0_469] : memref<5x5x8x256xf32, #tpu.memory_space<vmem>>, vector<1x1x8x256xf32>
    %469 = vector.shape_cast %468 : vector<1x1x8x256xf32> to vector<8x256xf32>
    %470 = vector.shape_cast %469 : vector<8x256xf32> to vector<1x8x256xf32>
    %471 = vector.broadcast %470 : vector<1x8x256xf32> to vector<4x8x256xf32>
    %472 = arith.mulf %467, %471 : vector<4x8x256xf32>
    %473 = arith.addf %465, %472 : vector<4x8x256xf32>
    %c3_470 = arith.constant 3 : index
    %c1_471 = arith.constant 1 : index
    %c0_472 = arith.constant 0 : index
    %c0_473 = arith.constant 0 : index
    %474 = vector.load %arg6[%c3_470, %c1_471, %c0_472, %c0_473] : memref<8x8x8x256xf32, #tpu.memory_space<vmem>>, vector<1x4x8x256xf32>
    %475 = vector.shape_cast %474 : vector<1x4x8x256xf32> to vector<4x8x256xf32>
    %c1_474 = arith.constant 1 : index
    %c1_475 = arith.constant 1 : index
    %c0_476 = arith.constant 0 : index
    %c0_477 = arith.constant 0 : index
    %476 = vector.load %arg2[%c1_474, %c1_475, %c0_476, %c0_477] : memref<5x5x8x256xf32, #tpu.memory_space<vmem>>, vector<1x1x8x256xf32>
    %477 = vector.shape_cast %476 : vector<1x1x8x256xf32> to vector<8x256xf32>
    %478 = vector.shape_cast %477 : vector<8x256xf32> to vector<1x8x256xf32>
    %479 = vector.broadcast %478 : vector<1x8x256xf32> to vector<4x8x256xf32>
    %480 = arith.mulf %475, %479 : vector<4x8x256xf32>
    %481 = arith.addf %473, %480 : vector<4x8x256xf32>
    %c3_478 = arith.constant 3 : index
    %c2_479 = arith.constant 2 : index
    %c0_480 = arith.constant 0 : index
    %c0_481 = arith.constant 0 : index
    %482 = vector.load %arg6[%c3_478, %c2_479, %c0_480, %c0_481] : memref<8x8x8x256xf32, #tpu.memory_space<vmem>>, vector<1x4x8x256xf32>
    %483 = vector.shape_cast %482 : vector<1x4x8x256xf32> to vector<4x8x256xf32>
    %c1_482 = arith.constant 1 : index
    %c2_483 = arith.constant 2 : index
    %c0_484 = arith.constant 0 : index
    %c0_485 = arith.constant 0 : index
    %484 = vector.load %arg2[%c1_482, %c2_483, %c0_484, %c0_485] : memref<5x5x8x256xf32, #tpu.memory_space<vmem>>, vector<1x1x8x256xf32>
    %485 = vector.shape_cast %484 : vector<1x1x8x256xf32> to vector<8x256xf32>
    %486 = vector.shape_cast %485 : vector<8x256xf32> to vector<1x8x256xf32>
    %487 = vector.broadcast %486 : vector<1x8x256xf32> to vector<4x8x256xf32>
    %488 = arith.mulf %483, %487 : vector<4x8x256xf32>
    %489 = arith.addf %481, %488 : vector<4x8x256xf32>
    %c3_486 = arith.constant 3 : index
    %c3_487 = arith.constant 3 : index
    %c0_488 = arith.constant 0 : index
    %c0_489 = arith.constant 0 : index
    %490 = vector.load %arg6[%c3_486, %c3_487, %c0_488, %c0_489] : memref<8x8x8x256xf32, #tpu.memory_space<vmem>>, vector<1x4x8x256xf32>
    %491 = vector.shape_cast %490 : vector<1x4x8x256xf32> to vector<4x8x256xf32>
    %c1_490 = arith.constant 1 : index
    %c3_491 = arith.constant 3 : index
    %c0_492 = arith.constant 0 : index
    %c0_493 = arith.constant 0 : index
    %492 = vector.load %arg2[%c1_490, %c3_491, %c0_492, %c0_493] : memref<5x5x8x256xf32, #tpu.memory_space<vmem>>, vector<1x1x8x256xf32>
    %493 = vector.shape_cast %492 : vector<1x1x8x256xf32> to vector<8x256xf32>
    %494 = vector.shape_cast %493 : vector<8x256xf32> to vector<1x8x256xf32>
    %495 = vector.broadcast %494 : vector<1x8x256xf32> to vector<4x8x256xf32>
    %496 = arith.mulf %491, %495 : vector<4x8x256xf32>
    %497 = arith.addf %489, %496 : vector<4x8x256xf32>
    %c3_494 = arith.constant 3 : index
    %c4_495 = arith.constant 4 : index
    %c0_496 = arith.constant 0 : index
    %c0_497 = arith.constant 0 : index
    %498 = vector.load %arg6[%c3_494, %c4_495, %c0_496, %c0_497] : memref<8x8x8x256xf32, #tpu.memory_space<vmem>>, vector<1x4x8x256xf32>
    %499 = vector.shape_cast %498 : vector<1x4x8x256xf32> to vector<4x8x256xf32>
    %c1_498 = arith.constant 1 : index
    %c4_499 = arith.constant 4 : index
    %c0_500 = arith.constant 0 : index
    %c0_501 = arith.constant 0 : index
    %500 = vector.load %arg2[%c1_498, %c4_499, %c0_500, %c0_501] : memref<5x5x8x256xf32, #tpu.memory_space<vmem>>, vector<1x1x8x256xf32>
    %501 = vector.shape_cast %500 : vector<1x1x8x256xf32> to vector<8x256xf32>
    %502 = vector.shape_cast %501 : vector<8x256xf32> to vector<1x8x256xf32>
    %503 = vector.broadcast %502 : vector<1x8x256xf32> to vector<4x8x256xf32>
    %504 = arith.mulf %499, %503 : vector<4x8x256xf32>
    %505 = arith.addf %497, %504 : vector<4x8x256xf32>
    %c4_502 = arith.constant 4 : index
    %c0_503 = arith.constant 0 : index
    %c0_504 = arith.constant 0 : index
    %c0_505 = arith.constant 0 : index
    %506 = vector.load %arg6[%c4_502, %c0_503, %c0_504, %c0_505] : memref<8x8x8x256xf32, #tpu.memory_space<vmem>>, vector<1x4x8x256xf32>
    %507 = vector.shape_cast %506 : vector<1x4x8x256xf32> to vector<4x8x256xf32>
    %c2_506 = arith.constant 2 : index
    %c0_507 = arith.constant 0 : index
    %c0_508 = arith.constant 0 : index
    %c0_509 = arith.constant 0 : index
    %508 = vector.load %arg2[%c2_506, %c0_507, %c0_508, %c0_509] : memref<5x5x8x256xf32, #tpu.memory_space<vmem>>, vector<1x1x8x256xf32>
    %509 = vector.shape_cast %508 : vector<1x1x8x256xf32> to vector<8x256xf32>
    %510 = vector.shape_cast %509 : vector<8x256xf32> to vector<1x8x256xf32>
    %511 = vector.broadcast %510 : vector<1x8x256xf32> to vector<4x8x256xf32>
    %512 = arith.mulf %507, %511 : vector<4x8x256xf32>
    %513 = arith.addf %505, %512 : vector<4x8x256xf32>
    %c4_510 = arith.constant 4 : index
    %c1_511 = arith.constant 1 : index
    %c0_512 = arith.constant 0 : index
    %c0_513 = arith.constant 0 : index
    %514 = vector.load %arg6[%c4_510, %c1_511, %c0_512, %c0_513] : memref<8x8x8x256xf32, #tpu.memory_space<vmem>>, vector<1x4x8x256xf32>
    %515 = vector.shape_cast %514 : vector<1x4x8x256xf32> to vector<4x8x256xf32>
    %c2_514 = arith.constant 2 : index
    %c1_515 = arith.constant 1 : index
    %c0_516 = arith.constant 0 : index
    %c0_517 = arith.constant 0 : index
    %516 = vector.load %arg2[%c2_514, %c1_515, %c0_516, %c0_517] : memref<5x5x8x256xf32, #tpu.memory_space<vmem>>, vector<1x1x8x256xf32>
    %517 = vector.shape_cast %516 : vector<1x1x8x256xf32> to vector<8x256xf32>
    %518 = vector.shape_cast %517 : vector<8x256xf32> to vector<1x8x256xf32>
    %519 = vector.broadcast %518 : vector<1x8x256xf32> to vector<4x8x256xf32>
    %520 = arith.mulf %515, %519 : vector<4x8x256xf32>
    %521 = arith.addf %513, %520 : vector<4x8x256xf32>
    %c4_518 = arith.constant 4 : index
    %c2_519 = arith.constant 2 : index
    %c0_520 = arith.constant 0 : index
    %c0_521 = arith.constant 0 : index
    %522 = vector.load %arg6[%c4_518, %c2_519, %c0_520, %c0_521] : memref<8x8x8x256xf32, #tpu.memory_space<vmem>>, vector<1x4x8x256xf32>
    %523 = vector.shape_cast %522 : vector<1x4x8x256xf32> to vector<4x8x256xf32>
    %c2_522 = arith.constant 2 : index
    %c2_523 = arith.constant 2 : index
    %c0_524 = arith.constant 0 : index
    %c0_525 = arith.constant 0 : index
    %524 = vector.load %arg2[%c2_522, %c2_523, %c0_524, %c0_525] : memref<5x5x8x256xf32, #tpu.memory_space<vmem>>, vector<1x1x8x256xf32>
    %525 = vector.shape_cast %524 : vector<1x1x8x256xf32> to vector<8x256xf32>
    %526 = vector.shape_cast %525 : vector<8x256xf32> to vector<1x8x256xf32>
    %527 = vector.broadcast %526 : vector<1x8x256xf32> to vector<4x8x256xf32>
    %528 = arith.mulf %523, %527 : vector<4x8x256xf32>
    %529 = arith.addf %521, %528 : vector<4x8x256xf32>
    %c4_526 = arith.constant 4 : index
    %c3_527 = arith.constant 3 : index
    %c0_528 = arith.constant 0 : index
    %c0_529 = arith.constant 0 : index
    %530 = vector.load %arg6[%c4_526, %c3_527, %c0_528, %c0_529] : memref<8x8x8x256xf32, #tpu.memory_space<vmem>>, vector<1x4x8x256xf32>
    %531 = vector.shape_cast %530 : vector<1x4x8x256xf32> to vector<4x8x256xf32>
    %c2_530 = arith.constant 2 : index
    %c3_531 = arith.constant 3 : index
    %c0_532 = arith.constant 0 : index
    %c0_533 = arith.constant 0 : index
    %532 = vector.load %arg2[%c2_530, %c3_531, %c0_532, %c0_533] : memref<5x5x8x256xf32, #tpu.memory_space<vmem>>, vector<1x1x8x256xf32>
    %533 = vector.shape_cast %532 : vector<1x1x8x256xf32> to vector<8x256xf32>
    %534 = vector.shape_cast %533 : vector<8x256xf32> to vector<1x8x256xf32>
    %535 = vector.broadcast %534 : vector<1x8x256xf32> to vector<4x8x256xf32>
    %536 = arith.mulf %531, %535 : vector<4x8x256xf32>
    %537 = arith.addf %529, %536 : vector<4x8x256xf32>
    %c4_534 = arith.constant 4 : index
    %c4_535 = arith.constant 4 : index
    %c0_536 = arith.constant 0 : index
    %c0_537 = arith.constant 0 : index
    %538 = vector.load %arg6[%c4_534, %c4_535, %c0_536, %c0_537] : memref<8x8x8x256xf32, #tpu.memory_space<vmem>>, vector<1x4x8x256xf32>
    %539 = vector.shape_cast %538 : vector<1x4x8x256xf32> to vector<4x8x256xf32>
    %c2_538 = arith.constant 2 : index
    %c4_539 = arith.constant 4 : index
    %c0_540 = arith.constant 0 : index
    %c0_541 = arith.constant 0 : index
    %540 = vector.load %arg2[%c2_538, %c4_539, %c0_540, %c0_541] : memref<5x5x8x256xf32, #tpu.memory_space<vmem>>, vector<1x1x8x256xf32>
    %541 = vector.shape_cast %540 : vector<1x1x8x256xf32> to vector<8x256xf32>
    %542 = vector.shape_cast %541 : vector<8x256xf32> to vector<1x8x256xf32>
    %543 = vector.broadcast %542 : vector<1x8x256xf32> to vector<4x8x256xf32>
    %544 = arith.mulf %539, %543 : vector<4x8x256xf32>
    %545 = arith.addf %537, %544 : vector<4x8x256xf32>
    %c5_542 = arith.constant 5 : index
    %c0_543 = arith.constant 0 : index
    %c0_544 = arith.constant 0 : index
    %c0_545 = arith.constant 0 : index
    %546 = vector.load %arg6[%c5_542, %c0_543, %c0_544, %c0_545] : memref<8x8x8x256xf32, #tpu.memory_space<vmem>>, vector<1x4x8x256xf32>
    %547 = vector.shape_cast %546 : vector<1x4x8x256xf32> to vector<4x8x256xf32>
    %c3_546 = arith.constant 3 : index
    %c0_547 = arith.constant 0 : index
    %c0_548 = arith.constant 0 : index
    %c0_549 = arith.constant 0 : index
    %548 = vector.load %arg2[%c3_546, %c0_547, %c0_548, %c0_549] : memref<5x5x8x256xf32, #tpu.memory_space<vmem>>, vector<1x1x8x256xf32>
    %549 = vector.shape_cast %548 : vector<1x1x8x256xf32> to vector<8x256xf32>
    %550 = vector.shape_cast %549 : vector<8x256xf32> to vector<1x8x256xf32>
    %551 = vector.broadcast %550 : vector<1x8x256xf32> to vector<4x8x256xf32>
    %552 = arith.mulf %547, %551 : vector<4x8x256xf32>
    %553 = arith.addf %545, %552 : vector<4x8x256xf32>
    %c5_550 = arith.constant 5 : index
    %c1_551 = arith.constant 1 : index
    %c0_552 = arith.constant 0 : index
    %c0_553 = arith.constant 0 : index
    %554 = vector.load %arg6[%c5_550, %c1_551, %c0_552, %c0_553] : memref<8x8x8x256xf32, #tpu.memory_space<vmem>>, vector<1x4x8x256xf32>
    %555 = vector.shape_cast %554 : vector<1x4x8x256xf32> to vector<4x8x256xf32>
    %c3_554 = arith.constant 3 : index
    %c1_555 = arith.constant 1 : index
    %c0_556 = arith.constant 0 : index
    %c0_557 = arith.constant 0 : index
    %556 = vector.load %arg2[%c3_554, %c1_555, %c0_556, %c0_557] : memref<5x5x8x256xf32, #tpu.memory_space<vmem>>, vector<1x1x8x256xf32>
    %557 = vector.shape_cast %556 : vector<1x1x8x256xf32> to vector<8x256xf32>
    %558 = vector.shape_cast %557 : vector<8x256xf32> to vector<1x8x256xf32>
    %559 = vector.broadcast %558 : vector<1x8x256xf32> to vector<4x8x256xf32>
    %560 = arith.mulf %555, %559 : vector<4x8x256xf32>
    %561 = arith.addf %553, %560 : vector<4x8x256xf32>
    %c5_558 = arith.constant 5 : index
    %c2_559 = arith.constant 2 : index
    %c0_560 = arith.constant 0 : index
    %c0_561 = arith.constant 0 : index
    %562 = vector.load %arg6[%c5_558, %c2_559, %c0_560, %c0_561] : memref<8x8x8x256xf32, #tpu.memory_space<vmem>>, vector<1x4x8x256xf32>
    %563 = vector.shape_cast %562 : vector<1x4x8x256xf32> to vector<4x8x256xf32>
    %c3_562 = arith.constant 3 : index
    %c2_563 = arith.constant 2 : index
    %c0_564 = arith.constant 0 : index
    %c0_565 = arith.constant 0 : index
    %564 = vector.load %arg2[%c3_562, %c2_563, %c0_564, %c0_565] : memref<5x5x8x256xf32, #tpu.memory_space<vmem>>, vector<1x1x8x256xf32>
    %565 = vector.shape_cast %564 : vector<1x1x8x256xf32> to vector<8x256xf32>
    %566 = vector.shape_cast %565 : vector<8x256xf32> to vector<1x8x256xf32>
    %567 = vector.broadcast %566 : vector<1x8x256xf32> to vector<4x8x256xf32>
    %568 = arith.mulf %563, %567 : vector<4x8x256xf32>
    %569 = arith.addf %561, %568 : vector<4x8x256xf32>
    %c5_566 = arith.constant 5 : index
    %c3_567 = arith.constant 3 : index
    %c0_568 = arith.constant 0 : index
    %c0_569 = arith.constant 0 : index
    %570 = vector.load %arg6[%c5_566, %c3_567, %c0_568, %c0_569] : memref<8x8x8x256xf32, #tpu.memory_space<vmem>>, vector<1x4x8x256xf32>
    %571 = vector.shape_cast %570 : vector<1x4x8x256xf32> to vector<4x8x256xf32>
    %c3_570 = arith.constant 3 : index
    %c3_571 = arith.constant 3 : index
    %c0_572 = arith.constant 0 : index
    %c0_573 = arith.constant 0 : index
    %572 = vector.load %arg2[%c3_570, %c3_571, %c0_572, %c0_573] : memref<5x5x8x256xf32, #tpu.memory_space<vmem>>, vector<1x1x8x256xf32>
    %573 = vector.shape_cast %572 : vector<1x1x8x256xf32> to vector<8x256xf32>
    %574 = vector.shape_cast %573 : vector<8x256xf32> to vector<1x8x256xf32>
    %575 = vector.broadcast %574 : vector<1x8x256xf32> to vector<4x8x256xf32>
    %576 = arith.mulf %571, %575 : vector<4x8x256xf32>
    %577 = arith.addf %569, %576 : vector<4x8x256xf32>
    %c5_574 = arith.constant 5 : index
    %c4_575 = arith.constant 4 : index
    %c0_576 = arith.constant 0 : index
    %c0_577 = arith.constant 0 : index
    %578 = vector.load %arg6[%c5_574, %c4_575, %c0_576, %c0_577] : memref<8x8x8x256xf32, #tpu.memory_space<vmem>>, vector<1x4x8x256xf32>
    %579 = vector.shape_cast %578 : vector<1x4x8x256xf32> to vector<4x8x256xf32>
    %c3_578 = arith.constant 3 : index
    %c4_579 = arith.constant 4 : index
    %c0_580 = arith.constant 0 : index
    %c0_581 = arith.constant 0 : index
    %580 = vector.load %arg2[%c3_578, %c4_579, %c0_580, %c0_581] : memref<5x5x8x256xf32, #tpu.memory_space<vmem>>, vector<1x1x8x256xf32>
    %581 = vector.shape_cast %580 : vector<1x1x8x256xf32> to vector<8x256xf32>
    %582 = vector.shape_cast %581 : vector<8x256xf32> to vector<1x8x256xf32>
    %583 = vector.broadcast %582 : vector<1x8x256xf32> to vector<4x8x256xf32>
    %584 = arith.mulf %579, %583 : vector<4x8x256xf32>
    %585 = arith.addf %577, %584 : vector<4x8x256xf32>
    %c6 = arith.constant 6 : index
    %c0_582 = arith.constant 0 : index
    %c0_583 = arith.constant 0 : index
    %c0_584 = arith.constant 0 : index
    %586 = vector.load %arg6[%c6, %c0_582, %c0_583, %c0_584] : memref<8x8x8x256xf32, #tpu.memory_space<vmem>>, vector<1x4x8x256xf32>
    %587 = vector.shape_cast %586 : vector<1x4x8x256xf32> to vector<4x8x256xf32>
    %c4_585 = arith.constant 4 : index
    %c0_586 = arith.constant 0 : index
    %c0_587 = arith.constant 0 : index
    %c0_588 = arith.constant 0 : index
    %588 = vector.load %arg2[%c4_585, %c0_586, %c0_587, %c0_588] : memref<5x5x8x256xf32, #tpu.memory_space<vmem>>, vector<1x1x8x256xf32>
    %589 = vector.shape_cast %588 : vector<1x1x8x256xf32> to vector<8x256xf32>
    %590 = vector.shape_cast %589 : vector<8x256xf32> to vector<1x8x256xf32>
    %591 = vector.broadcast %590 : vector<1x8x256xf32> to vector<4x8x256xf32>
    %592 = arith.mulf %587, %591 : vector<4x8x256xf32>
    %593 = arith.addf %585, %592 : vector<4x8x256xf32>
    %c6_589 = arith.constant 6 : index
    %c1_590 = arith.constant 1 : index
    %c0_591 = arith.constant 0 : index
    %c0_592 = arith.constant 0 : index
    %594 = vector.load %arg6[%c6_589, %c1_590, %c0_591, %c0_592] : memref<8x8x8x256xf32, #tpu.memory_space<vmem>>, vector<1x4x8x256xf32>
    %595 = vector.shape_cast %594 : vector<1x4x8x256xf32> to vector<4x8x256xf32>
    %c4_593 = arith.constant 4 : index
    %c1_594 = arith.constant 1 : index
    %c0_595 = arith.constant 0 : index
    %c0_596 = arith.constant 0 : index
    %596 = vector.load %arg2[%c4_593, %c1_594, %c0_595, %c0_596] : memref<5x5x8x256xf32, #tpu.memory_space<vmem>>, vector<1x1x8x256xf32>
    %597 = vector.shape_cast %596 : vector<1x1x8x256xf32> to vector<8x256xf32>
    %598 = vector.shape_cast %597 : vector<8x256xf32> to vector<1x8x256xf32>
    %599 = vector.broadcast %598 : vector<1x8x256xf32> to vector<4x8x256xf32>
    %600 = arith.mulf %595, %599 : vector<4x8x256xf32>
    %601 = arith.addf %593, %600 : vector<4x8x256xf32>
    %c6_597 = arith.constant 6 : index
    %c2_598 = arith.constant 2 : index
    %c0_599 = arith.constant 0 : index
    %c0_600 = arith.constant 0 : index
    %602 = vector.load %arg6[%c6_597, %c2_598, %c0_599, %c0_600] : memref<8x8x8x256xf32, #tpu.memory_space<vmem>>, vector<1x4x8x256xf32>
    %603 = vector.shape_cast %602 : vector<1x4x8x256xf32> to vector<4x8x256xf32>
    %c4_601 = arith.constant 4 : index
    %c2_602 = arith.constant 2 : index
    %c0_603 = arith.constant 0 : index
    %c0_604 = arith.constant 0 : index
    %604 = vector.load %arg2[%c4_601, %c2_602, %c0_603, %c0_604] : memref<5x5x8x256xf32, #tpu.memory_space<vmem>>, vector<1x1x8x256xf32>
    %605 = vector.shape_cast %604 : vector<1x1x8x256xf32> to vector<8x256xf32>
    %606 = vector.shape_cast %605 : vector<8x256xf32> to vector<1x8x256xf32>
    %607 = vector.broadcast %606 : vector<1x8x256xf32> to vector<4x8x256xf32>
    %608 = arith.mulf %603, %607 : vector<4x8x256xf32>
    %609 = arith.addf %601, %608 : vector<4x8x256xf32>
    %c6_605 = arith.constant 6 : index
    %c3_606 = arith.constant 3 : index
    %c0_607 = arith.constant 0 : index
    %c0_608 = arith.constant 0 : index
    %610 = vector.load %arg6[%c6_605, %c3_606, %c0_607, %c0_608] : memref<8x8x8x256xf32, #tpu.memory_space<vmem>>, vector<1x4x8x256xf32>
    %611 = vector.shape_cast %610 : vector<1x4x8x256xf32> to vector<4x8x256xf32>
    %c4_609 = arith.constant 4 : index
    %c3_610 = arith.constant 3 : index
    %c0_611 = arith.constant 0 : index
    %c0_612 = arith.constant 0 : index
    %612 = vector.load %arg2[%c4_609, %c3_610, %c0_611, %c0_612] : memref<5x5x8x256xf32, #tpu.memory_space<vmem>>, vector<1x1x8x256xf32>
    %613 = vector.shape_cast %612 : vector<1x1x8x256xf32> to vector<8x256xf32>
    %614 = vector.shape_cast %613 : vector<8x256xf32> to vector<1x8x256xf32>
    %615 = vector.broadcast %614 : vector<1x8x256xf32> to vector<4x8x256xf32>
    %616 = arith.mulf %611, %615 : vector<4x8x256xf32>
    %617 = arith.addf %609, %616 : vector<4x8x256xf32>
    %c6_613 = arith.constant 6 : index
    %c4_614 = arith.constant 4 : index
    %c0_615 = arith.constant 0 : index
    %c0_616 = arith.constant 0 : index
    %618 = vector.load %arg6[%c6_613, %c4_614, %c0_615, %c0_616] : memref<8x8x8x256xf32, #tpu.memory_space<vmem>>, vector<1x4x8x256xf32>
    %619 = vector.shape_cast %618 : vector<1x4x8x256xf32> to vector<4x8x256xf32>
    %c4_617 = arith.constant 4 : index
    %c4_618 = arith.constant 4 : index
    %c0_619 = arith.constant 0 : index
    %c0_620 = arith.constant 0 : index
    %620 = vector.load %arg2[%c4_617, %c4_618, %c0_619, %c0_620] : memref<5x5x8x256xf32, #tpu.memory_space<vmem>>, vector<1x1x8x256xf32>
    %621 = vector.shape_cast %620 : vector<1x1x8x256xf32> to vector<8x256xf32>
    %622 = vector.shape_cast %621 : vector<8x256xf32> to vector<1x8x256xf32>
    %623 = vector.broadcast %622 : vector<1x8x256xf32> to vector<4x8x256xf32>
    %624 = arith.mulf %619, %623 : vector<4x8x256xf32>
    %625 = arith.addf %617, %624 : vector<4x8x256xf32>
    %cst_621 = arith.constant dense<0.000000e+00> : vector<4x256xf32>
    %626 = vector.multi_reduction <add>, %625, %cst_621 [1] : vector<4x8x256xf32> to vector<4x256xf32>
    %c0_622 = arith.constant 0 : index
    %c0_623 = arith.constant 0 : index
    %627 = vector.load %arg3[%c0_622, %c0_623] : memref<4x256xf32, #tpu.memory_space<vmem>>, vector<1x256xf32>
    %628 = vector.shape_cast %627 : vector<1x256xf32> to vector<256xf32>
    %629 = vector.shape_cast %628 : vector<256xf32> to vector<1x256xf32>
    %630 = vector.broadcast %629 : vector<1x256xf32> to vector<4x256xf32>
    %631 = arith.addf %626, %630 : vector<4x256xf32>
    %cst_624 = arith.constant 0.000000e+00 : f32
    %632 = vector.broadcast %cst_624 : f32 to vector<4x256xf32>
    %633 = arith.maximumf %631, %632 : vector<4x256xf32>
    %c8 = arith.constant 8 : index
    %c0_625 = arith.constant 0 : index
    %634 = vector.load %arg7[%c8, %c0_625] : memref<16x256xf32, #tpu.memory_space<vmem>>, vector<4x256xf32>
    tpu.vector_store %arg7[%c8, %c0_625], %633 {strides = array<i32>} : memref<16x256xf32, #tpu.memory_space<vmem>>, vector<4x256xf32>,
    %cst_626 = arith.constant 0.000000e+00 : f32
    %635 = vector.broadcast %cst_626 : f32 to vector<4x8x256xf32>
    %c3_627 = arith.constant 3 : index
    %c0_628 = arith.constant 0 : index
    %c0_629 = arith.constant 0 : index
    %c0_630 = arith.constant 0 : index
    %636 = vector.load %arg6[%c3_627, %c0_628, %c0_629, %c0_630] : memref<8x8x8x256xf32, #tpu.memory_space<vmem>>, vector<1x4x8x256xf32>
    %637 = vector.shape_cast %636 : vector<1x4x8x256xf32> to vector<4x8x256xf32>
    %c0_631 = arith.constant 0 : index
    %c0_632 = arith.constant 0 : index
    %c0_633 = arith.constant 0 : index
    %c0_634 = arith.constant 0 : index
    %638 = vector.load %arg2[%c0_631, %c0_632, %c0_633, %c0_634] : memref<5x5x8x256xf32, #tpu.memory_space<vmem>>, vector<1x1x8x256xf32>
    %639 = vector.shape_cast %638 : vector<1x1x8x256xf32> to vector<8x256xf32>
    %640 = vector.shape_cast %639 : vector<8x256xf32> to vector<1x8x256xf32>
    %641 = vector.broadcast %640 : vector<1x8x256xf32> to vector<4x8x256xf32>
    %642 = arith.mulf %637, %641 : vector<4x8x256xf32>
    %643 = arith.addf %635, %642 : vector<4x8x256xf32>
    %c3_635 = arith.constant 3 : index
    %c1_636 = arith.constant 1 : index
    %c0_637 = arith.constant 0 : index
    %c0_638 = arith.constant 0 : index
    %644 = vector.load %arg6[%c3_635, %c1_636, %c0_637, %c0_638] : memref<8x8x8x256xf32, #tpu.memory_space<vmem>>, vector<1x4x8x256xf32>
    %645 = vector.shape_cast %644 : vector<1x4x8x256xf32> to vector<4x8x256xf32>
    %c0_639 = arith.constant 0 : index
    %c1_640 = arith.constant 1 : index
    %c0_641 = arith.constant 0 : index
    %c0_642 = arith.constant 0 : index
    %646 = vector.load %arg2[%c0_639, %c1_640, %c0_641, %c0_642] : memref<5x5x8x256xf32, #tpu.memory_space<vmem>>, vector<1x1x8x256xf32>
    %647 = vector.shape_cast %646 : vector<1x1x8x256xf32> to vector<8x256xf32>
    %648 = vector.shape_cast %647 : vector<8x256xf32> to vector<1x8x256xf32>
    %649 = vector.broadcast %648 : vector<1x8x256xf32> to vector<4x8x256xf32>
    %650 = arith.mulf %645, %649 : vector<4x8x256xf32>
    %651 = arith.addf %643, %650 : vector<4x8x256xf32>
    %c3_643 = arith.constant 3 : index
    %c2_644 = arith.constant 2 : index
    %c0_645 = arith.constant 0 : index
    %c0_646 = arith.constant 0 : index
    %652 = vector.load %arg6[%c3_643, %c2_644, %c0_645, %c0_646] : memref<8x8x8x256xf32, #tpu.memory_space<vmem>>, vector<1x4x8x256xf32>
    %653 = vector.shape_cast %652 : vector<1x4x8x256xf32> to vector<4x8x256xf32>
    %c0_647 = arith.constant 0 : index
    %c2_648 = arith.constant 2 : index
    %c0_649 = arith.constant 0 : index
    %c0_650 = arith.constant 0 : index
    %654 = vector.load %arg2[%c0_647, %c2_648, %c0_649, %c0_650] : memref<5x5x8x256xf32, #tpu.memory_space<vmem>>, vector<1x1x8x256xf32>
    %655 = vector.shape_cast %654 : vector<1x1x8x256xf32> to vector<8x256xf32>
    %656 = vector.shape_cast %655 : vector<8x256xf32> to vector<1x8x256xf32>
    %657 = vector.broadcast %656 : vector<1x8x256xf32> to vector<4x8x256xf32>
    %658 = arith.mulf %653, %657 : vector<4x8x256xf32>
    %659 = arith.addf %651, %658 : vector<4x8x256xf32>
    %c3_651 = arith.constant 3 : index
    %c3_652 = arith.constant 3 : index
    %c0_653 = arith.constant 0 : index
    %c0_654 = arith.constant 0 : index
    %660 = vector.load %arg6[%c3_651, %c3_652, %c0_653, %c0_654] : memref<8x8x8x256xf32, #tpu.memory_space<vmem>>, vector<1x4x8x256xf32>
    %661 = vector.shape_cast %660 : vector<1x4x8x256xf32> to vector<4x8x256xf32>
    %c0_655 = arith.constant 0 : index
    %c3_656 = arith.constant 3 : index
    %c0_657 = arith.constant 0 : index
    %c0_658 = arith.constant 0 : index
    %662 = vector.load %arg2[%c0_655, %c3_656, %c0_657, %c0_658] : memref<5x5x8x256xf32, #tpu.memory_space<vmem>>, vector<1x1x8x256xf32>
    %663 = vector.shape_cast %662 : vector<1x1x8x256xf32> to vector<8x256xf32>
    %664 = vector.shape_cast %663 : vector<8x256xf32> to vector<1x8x256xf32>
    %665 = vector.broadcast %664 : vector<1x8x256xf32> to vector<4x8x256xf32>
    %666 = arith.mulf %661, %665 : vector<4x8x256xf32>
    %667 = arith.addf %659, %666 : vector<4x8x256xf32>
    %c3_659 = arith.constant 3 : index
    %c4_660 = arith.constant 4 : index
    %c0_661 = arith.constant 0 : index
    %c0_662 = arith.constant 0 : index
    %668 = vector.load %arg6[%c3_659, %c4_660, %c0_661, %c0_662] : memref<8x8x8x256xf32, #tpu.memory_space<vmem>>, vector<1x4x8x256xf32>
    %669 = vector.shape_cast %668 : vector<1x4x8x256xf32> to vector<4x8x256xf32>
    %c0_663 = arith.constant 0 : index
    %c4_664 = arith.constant 4 : index
    %c0_665 = arith.constant 0 : index
    %c0_666 = arith.constant 0 : index
    %670 = vector.load %arg2[%c0_663, %c4_664, %c0_665, %c0_666] : memref<5x5x8x256xf32, #tpu.memory_space<vmem>>, vector<1x1x8x256xf32>
    %671 = vector.shape_cast %670 : vector<1x1x8x256xf32> to vector<8x256xf32>
    %672 = vector.shape_cast %671 : vector<8x256xf32> to vector<1x8x256xf32>
    %673 = vector.broadcast %672 : vector<1x8x256xf32> to vector<4x8x256xf32>
    %674 = arith.mulf %669, %673 : vector<4x8x256xf32>
    %675 = arith.addf %667, %674 : vector<4x8x256xf32>
    %c4_667 = arith.constant 4 : index
    %c0_668 = arith.constant 0 : index
    %c0_669 = arith.constant 0 : index
    %c0_670 = arith.constant 0 : index
    %676 = vector.load %arg6[%c4_667, %c0_668, %c0_669, %c0_670] : memref<8x8x8x256xf32, #tpu.memory_space<vmem>>, vector<1x4x8x256xf32>
    %677 = vector.shape_cast %676 : vector<1x4x8x256xf32> to vector<4x8x256xf32>
    %c1_671 = arith.constant 1 : index
    %c0_672 = arith.constant 0 : index
    %c0_673 = arith.constant 0 : index
    %c0_674 = arith.constant 0 : index
    %678 = vector.load %arg2[%c1_671, %c0_672, %c0_673, %c0_674] : memref<5x5x8x256xf32, #tpu.memory_space<vmem>>, vector<1x1x8x256xf32>
    %679 = vector.shape_cast %678 : vector<1x1x8x256xf32> to vector<8x256xf32>
    %680 = vector.shape_cast %679 : vector<8x256xf32> to vector<1x8x256xf32>
    %681 = vector.broadcast %680 : vector<1x8x256xf32> to vector<4x8x256xf32>
    %682 = arith.mulf %677, %681 : vector<4x8x256xf32>
    %683 = arith.addf %675, %682 : vector<4x8x256xf32>
    %c4_675 = arith.constant 4 : index
    %c1_676 = arith.constant 1 : index
    %c0_677 = arith.constant 0 : index
    %c0_678 = arith.constant 0 : index
    %684 = vector.load %arg6[%c4_675, %c1_676, %c0_677, %c0_678] : memref<8x8x8x256xf32, #tpu.memory_space<vmem>>, vector<1x4x8x256xf32>
    %685 = vector.shape_cast %684 : vector<1x4x8x256xf32> to vector<4x8x256xf32>
    %c1_679 = arith.constant 1 : index
    %c1_680 = arith.constant 1 : index
    %c0_681 = arith.constant 0 : index
    %c0_682 = arith.constant 0 : index
    %686 = vector.load %arg2[%c1_679, %c1_680, %c0_681, %c0_682] : memref<5x5x8x256xf32, #tpu.memory_space<vmem>>, vector<1x1x8x256xf32>
    %687 = vector.shape_cast %686 : vector<1x1x8x256xf32> to vector<8x256xf32>
    %688 = vector.shape_cast %687 : vector<8x256xf32> to vector<1x8x256xf32>
    %689 = vector.broadcast %688 : vector<1x8x256xf32> to vector<4x8x256xf32>
    %690 = arith.mulf %685, %689 : vector<4x8x256xf32>
    %691 = arith.addf %683, %690 : vector<4x8x256xf32>
    %c4_683 = arith.constant 4 : index
    %c2_684 = arith.constant 2 : index
    %c0_685 = arith.constant 0 : index
    %c0_686 = arith.constant 0 : index
    %692 = vector.load %arg6[%c4_683, %c2_684, %c0_685, %c0_686] : memref<8x8x8x256xf32, #tpu.memory_space<vmem>>, vector<1x4x8x256xf32>
    %693 = vector.shape_cast %692 : vector<1x4x8x256xf32> to vector<4x8x256xf32>
    %c1_687 = arith.constant 1 : index
    %c2_688 = arith.constant 2 : index
    %c0_689 = arith.constant 0 : index
    %c0_690 = arith.constant 0 : index
    %694 = vector.load %arg2[%c1_687, %c2_688, %c0_689, %c0_690] : memref<5x5x8x256xf32, #tpu.memory_space<vmem>>, vector<1x1x8x256xf32>
    %695 = vector.shape_cast %694 : vector<1x1x8x256xf32> to vector<8x256xf32>
    %696 = vector.shape_cast %695 : vector<8x256xf32> to vector<1x8x256xf32>
    %697 = vector.broadcast %696 : vector<1x8x256xf32> to vector<4x8x256xf32>
    %698 = arith.mulf %693, %697 : vector<4x8x256xf32>
    %699 = arith.addf %691, %698 : vector<4x8x256xf32>
    %c4_691 = arith.constant 4 : index
    %c3_692 = arith.constant 3 : index
    %c0_693 = arith.constant 0 : index
    %c0_694 = arith.constant 0 : index
    %700 = vector.load %arg6[%c4_691, %c3_692, %c0_693, %c0_694] : memref<8x8x8x256xf32, #tpu.memory_space<vmem>>, vector<1x4x8x256xf32>
    %701 = vector.shape_cast %700 : vector<1x4x8x256xf32> to vector<4x8x256xf32>
    %c1_695 = arith.constant 1 : index
    %c3_696 = arith.constant 3 : index
    %c0_697 = arith.constant 0 : index
    %c0_698 = arith.constant 0 : index
    %702 = vector.load %arg2[%c1_695, %c3_696, %c0_697, %c0_698] : memref<5x5x8x256xf32, #tpu.memory_space<vmem>>, vector<1x1x8x256xf32>
    %703 = vector.shape_cast %702 : vector<1x1x8x256xf32> to vector<8x256xf32>
    %704 = vector.shape_cast %703 : vector<8x256xf32> to vector<1x8x256xf32>
    %705 = vector.broadcast %704 : vector<1x8x256xf32> to vector<4x8x256xf32>
    %706 = arith.mulf %701, %705 : vector<4x8x256xf32>
    %707 = arith.addf %699, %706 : vector<4x8x256xf32>
    %c4_699 = arith.constant 4 : index
    %c4_700 = arith.constant 4 : index
    %c0_701 = arith.constant 0 : index
    %c0_702 = arith.constant 0 : index
    %708 = vector.load %arg6[%c4_699, %c4_700, %c0_701, %c0_702] : memref<8x8x8x256xf32, #tpu.memory_space<vmem>>, vector<1x4x8x256xf32>
    %709 = vector.shape_cast %708 : vector<1x4x8x256xf32> to vector<4x8x256xf32>
    %c1_703 = arith.constant 1 : index
    %c4_704 = arith.constant 4 : index
    %c0_705 = arith.constant 0 : index
    %c0_706 = arith.constant 0 : index
    %710 = vector.load %arg2[%c1_703, %c4_704, %c0_705, %c0_706] : memref<5x5x8x256xf32, #tpu.memory_space<vmem>>, vector<1x1x8x256xf32>
    %711 = vector.shape_cast %710 : vector<1x1x8x256xf32> to vector<8x256xf32>
    %712 = vector.shape_cast %711 : vector<8x256xf32> to vector<1x8x256xf32>
    %713 = vector.broadcast %712 : vector<1x8x256xf32> to vector<4x8x256xf32>
    %714 = arith.mulf %709, %713 : vector<4x8x256xf32>
    %715 = arith.addf %707, %714 : vector<4x8x256xf32>
    %c5_707 = arith.constant 5 : index
    %c0_708 = arith.constant 0 : index
    %c0_709 = arith.constant 0 : index
    %c0_710 = arith.constant 0 : index
    %716 = vector.load %arg6[%c5_707, %c0_708, %c0_709, %c0_710] : memref<8x8x8x256xf32, #tpu.memory_space<vmem>>, vector<1x4x8x256xf32>
    %717 = vector.shape_cast %716 : vector<1x4x8x256xf32> to vector<4x8x256xf32>
    %c2_711 = arith.constant 2 : index
    %c0_712 = arith.constant 0 : index
    %c0_713 = arith.constant 0 : index
    %c0_714 = arith.constant 0 : index
    %718 = vector.load %arg2[%c2_711, %c0_712, %c0_713, %c0_714] : memref<5x5x8x256xf32, #tpu.memory_space<vmem>>, vector<1x1x8x256xf32>
    %719 = vector.shape_cast %718 : vector<1x1x8x256xf32> to vector<8x256xf32>
    %720 = vector.shape_cast %719 : vector<8x256xf32> to vector<1x8x256xf32>
    %721 = vector.broadcast %720 : vector<1x8x256xf32> to vector<4x8x256xf32>
    %722 = arith.mulf %717, %721 : vector<4x8x256xf32>
    %723 = arith.addf %715, %722 : vector<4x8x256xf32>
    %c5_715 = arith.constant 5 : index
    %c1_716 = arith.constant 1 : index
    %c0_717 = arith.constant 0 : index
    %c0_718 = arith.constant 0 : index
    %724 = vector.load %arg6[%c5_715, %c1_716, %c0_717, %c0_718] : memref<8x8x8x256xf32, #tpu.memory_space<vmem>>, vector<1x4x8x256xf32>
    %725 = vector.shape_cast %724 : vector<1x4x8x256xf32> to vector<4x8x256xf32>
    %c2_719 = arith.constant 2 : index
    %c1_720 = arith.constant 1 : index
    %c0_721 = arith.constant 0 : index
    %c0_722 = arith.constant 0 : index
    %726 = vector.load %arg2[%c2_719, %c1_720, %c0_721, %c0_722] : memref<5x5x8x256xf32, #tpu.memory_space<vmem>>, vector<1x1x8x256xf32>
    %727 = vector.shape_cast %726 : vector<1x1x8x256xf32> to vector<8x256xf32>
    %728 = vector.shape_cast %727 : vector<8x256xf32> to vector<1x8x256xf32>
    %729 = vector.broadcast %728 : vector<1x8x256xf32> to vector<4x8x256xf32>
    %730 = arith.mulf %725, %729 : vector<4x8x256xf32>
    %731 = arith.addf %723, %730 : vector<4x8x256xf32>
    %c5_723 = arith.constant 5 : index
    %c2_724 = arith.constant 2 : index
    %c0_725 = arith.constant 0 : index
    %c0_726 = arith.constant 0 : index
    %732 = vector.load %arg6[%c5_723, %c2_724, %c0_725, %c0_726] : memref<8x8x8x256xf32, #tpu.memory_space<vmem>>, vector<1x4x8x256xf32>
    %733 = vector.shape_cast %732 : vector<1x4x8x256xf32> to vector<4x8x256xf32>
    %c2_727 = arith.constant 2 : index
    %c2_728 = arith.constant 2 : index
    %c0_729 = arith.constant 0 : index
    %c0_730 = arith.constant 0 : index
    %734 = vector.load %arg2[%c2_727, %c2_728, %c0_729, %c0_730] : memref<5x5x8x256xf32, #tpu.memory_space<vmem>>, vector<1x1x8x256xf32>
    %735 = vector.shape_cast %734 : vector<1x1x8x256xf32> to vector<8x256xf32>
    %736 = vector.shape_cast %735 : vector<8x256xf32> to vector<1x8x256xf32>
    %737 = vector.broadcast %736 : vector<1x8x256xf32> to vector<4x8x256xf32>
    %738 = arith.mulf %733, %737 : vector<4x8x256xf32>
    %739 = arith.addf %731, %738 : vector<4x8x256xf32>
    %c5_731 = arith.constant 5 : index
    %c3_732 = arith.constant 3 : index
    %c0_733 = arith.constant 0 : index
    %c0_734 = arith.constant 0 : index
    %740 = vector.load %arg6[%c5_731, %c3_732, %c0_733, %c0_734] : memref<8x8x8x256xf32, #tpu.memory_space<vmem>>, vector<1x4x8x256xf32>
    %741 = vector.shape_cast %740 : vector<1x4x8x256xf32> to vector<4x8x256xf32>
    %c2_735 = arith.constant 2 : index
    %c3_736 = arith.constant 3 : index
    %c0_737 = arith.constant 0 : index
    %c0_738 = arith.constant 0 : index
    %742 = vector.load %arg2[%c2_735, %c3_736, %c0_737, %c0_738] : memref<5x5x8x256xf32, #tpu.memory_space<vmem>>, vector<1x1x8x256xf32>
    %743 = vector.shape_cast %742 : vector<1x1x8x256xf32> to vector<8x256xf32>
    %744 = vector.shape_cast %743 : vector<8x256xf32> to vector<1x8x256xf32>
    %745 = vector.broadcast %744 : vector<1x8x256xf32> to vector<4x8x256xf32>
    %746 = arith.mulf %741, %745 : vector<4x8x256xf32>
    %747 = arith.addf %739, %746 : vector<4x8x256xf32>
    %c5_739 = arith.constant 5 : index
    %c4_740 = arith.constant 4 : index
    %c0_741 = arith.constant 0 : index
    %c0_742 = arith.constant 0 : index
    %748 = vector.load %arg6[%c5_739, %c4_740, %c0_741, %c0_742] : memref<8x8x8x256xf32, #tpu.memory_space<vmem>>, vector<1x4x8x256xf32>
    %749 = vector.shape_cast %748 : vector<1x4x8x256xf32> to vector<4x8x256xf32>
    %c2_743 = arith.constant 2 : index
    %c4_744 = arith.constant 4 : index
    %c0_745 = arith.constant 0 : index
    %c0_746 = arith.constant 0 : index
    %750 = vector.load %arg2[%c2_743, %c4_744, %c0_745, %c0_746] : memref<5x5x8x256xf32, #tpu.memory_space<vmem>>, vector<1x1x8x256xf32>
    %751 = vector.shape_cast %750 : vector<1x1x8x256xf32> to vector<8x256xf32>
    %752 = vector.shape_cast %751 : vector<8x256xf32> to vector<1x8x256xf32>
    %753 = vector.broadcast %752 : vector<1x8x256xf32> to vector<4x8x256xf32>
    %754 = arith.mulf %749, %753 : vector<4x8x256xf32>
    %755 = arith.addf %747, %754 : vector<4x8x256xf32>
    %c6_747 = arith.constant 6 : index
    %c0_748 = arith.constant 0 : index
    %c0_749 = arith.constant 0 : index
    %c0_750 = arith.constant 0 : index
    %756 = vector.load %arg6[%c6_747, %c0_748, %c0_749, %c0_750] : memref<8x8x8x256xf32, #tpu.memory_space<vmem>>, vector<1x4x8x256xf32>
    %757 = vector.shape_cast %756 : vector<1x4x8x256xf32> to vector<4x8x256xf32>
    %c3_751 = arith.constant 3 : index
    %c0_752 = arith.constant 0 : index
    %c0_753 = arith.constant 0 : index
    %c0_754 = arith.constant 0 : index
    %758 = vector.load %arg2[%c3_751, %c0_752, %c0_753, %c0_754] : memref<5x5x8x256xf32, #tpu.memory_space<vmem>>, vector<1x1x8x256xf32>
    %759 = vector.shape_cast %758 : vector<1x1x8x256xf32> to vector<8x256xf32>
    %760 = vector.shape_cast %759 : vector<8x256xf32> to vector<1x8x256xf32>
    %761 = vector.broadcast %760 : vector<1x8x256xf32> to vector<4x8x256xf32>
    %762 = arith.mulf %757, %761 : vector<4x8x256xf32>
    %763 = arith.addf %755, %762 : vector<4x8x256xf32>
    %c6_755 = arith.constant 6 : index
    %c1_756 = arith.constant 1 : index
    %c0_757 = arith.constant 0 : index
    %c0_758 = arith.constant 0 : index
    %764 = vector.load %arg6[%c6_755, %c1_756, %c0_757, %c0_758] : memref<8x8x8x256xf32, #tpu.memory_space<vmem>>, vector<1x4x8x256xf32>
    %765 = vector.shape_cast %764 : vector<1x4x8x256xf32> to vector<4x8x256xf32>
    %c3_759 = arith.constant 3 : index
    %c1_760 = arith.constant 1 : index
    %c0_761 = arith.constant 0 : index
    %c0_762 = arith.constant 0 : index
    %766 = vector.load %arg2[%c3_759, %c1_760, %c0_761, %c0_762] : memref<5x5x8x256xf32, #tpu.memory_space<vmem>>, vector<1x1x8x256xf32>
    %767 = vector.shape_cast %766 : vector<1x1x8x256xf32> to vector<8x256xf32>
    %768 = vector.shape_cast %767 : vector<8x256xf32> to vector<1x8x256xf32>
    %769 = vector.broadcast %768 : vector<1x8x256xf32> to vector<4x8x256xf32>
    %770 = arith.mulf %765, %769 : vector<4x8x256xf32>
    %771 = arith.addf %763, %770 : vector<4x8x256xf32>
    %c6_763 = arith.constant 6 : index
    %c2_764 = arith.constant 2 : index
    %c0_765 = arith.constant 0 : index
    %c0_766 = arith.constant 0 : index
    %772 = vector.load %arg6[%c6_763, %c2_764, %c0_765, %c0_766] : memref<8x8x8x256xf32, #tpu.memory_space<vmem>>, vector<1x4x8x256xf32>
    %773 = vector.shape_cast %772 : vector<1x4x8x256xf32> to vector<4x8x256xf32>
    %c3_767 = arith.constant 3 : index
    %c2_768 = arith.constant 2 : index
    %c0_769 = arith.constant 0 : index
    %c0_770 = arith.constant 0 : index
    %774 = vector.load %arg2[%c3_767, %c2_768, %c0_769, %c0_770] : memref<5x5x8x256xf32, #tpu.memory_space<vmem>>, vector<1x1x8x256xf32>
    %775 = vector.shape_cast %774 : vector<1x1x8x256xf32> to vector<8x256xf32>
    %776 = vector.shape_cast %775 : vector<8x256xf32> to vector<1x8x256xf32>
    %777 = vector.broadcast %776 : vector<1x8x256xf32> to vector<4x8x256xf32>
    %778 = arith.mulf %773, %777 : vector<4x8x256xf32>
    %779 = arith.addf %771, %778 : vector<4x8x256xf32>
    %c6_771 = arith.constant 6 : index
    %c3_772 = arith.constant 3 : index
    %c0_773 = arith.constant 0 : index
    %c0_774 = arith.constant 0 : index
    %780 = vector.load %arg6[%c6_771, %c3_772, %c0_773, %c0_774] : memref<8x8x8x256xf32, #tpu.memory_space<vmem>>, vector<1x4x8x256xf32>
    %781 = vector.shape_cast %780 : vector<1x4x8x256xf32> to vector<4x8x256xf32>
    %c3_775 = arith.constant 3 : index
    %c3_776 = arith.constant 3 : index
    %c0_777 = arith.constant 0 : index
    %c0_778 = arith.constant 0 : index
    %782 = vector.load %arg2[%c3_775, %c3_776, %c0_777, %c0_778] : memref<5x5x8x256xf32, #tpu.memory_space<vmem>>, vector<1x1x8x256xf32>
    %783 = vector.shape_cast %782 : vector<1x1x8x256xf32> to vector<8x256xf32>
    %784 = vector.shape_cast %783 : vector<8x256xf32> to vector<1x8x256xf32>
    %785 = vector.broadcast %784 : vector<1x8x256xf32> to vector<4x8x256xf32>
    %786 = arith.mulf %781, %785 : vector<4x8x256xf32>
    %787 = arith.addf %779, %786 : vector<4x8x256xf32>
    %c6_779 = arith.constant 6 : index
    %c4_780 = arith.constant 4 : index
    %c0_781 = arith.constant 0 : index
    %c0_782 = arith.constant 0 : index
    %788 = vector.load %arg6[%c6_779, %c4_780, %c0_781, %c0_782] : memref<8x8x8x256xf32, #tpu.memory_space<vmem>>, vector<1x4x8x256xf32>
    %789 = vector.shape_cast %788 : vector<1x4x8x256xf32> to vector<4x8x256xf32>
    %c3_783 = arith.constant 3 : index
    %c4_784 = arith.constant 4 : index
    %c0_785 = arith.constant 0 : index
    %c0_786 = arith.constant 0 : index
    %790 = vector.load %arg2[%c3_783, %c4_784, %c0_785, %c0_786] : memref<5x5x8x256xf32, #tpu.memory_space<vmem>>, vector<1x1x8x256xf32>
    %791 = vector.shape_cast %790 : vector<1x1x8x256xf32> to vector<8x256xf32>
    %792 = vector.shape_cast %791 : vector<8x256xf32> to vector<1x8x256xf32>
    %793 = vector.broadcast %792 : vector<1x8x256xf32> to vector<4x8x256xf32>
    %794 = arith.mulf %789, %793 : vector<4x8x256xf32>
    %795 = arith.addf %787, %794 : vector<4x8x256xf32>
    %c7 = arith.constant 7 : index
    %c0_787 = arith.constant 0 : index
    %c0_788 = arith.constant 0 : index
    %c0_789 = arith.constant 0 : index
    %796 = vector.load %arg6[%c7, %c0_787, %c0_788, %c0_789] : memref<8x8x8x256xf32, #tpu.memory_space<vmem>>, vector<1x4x8x256xf32>
    %797 = vector.shape_cast %796 : vector<1x4x8x256xf32> to vector<4x8x256xf32>
    %c4_790 = arith.constant 4 : index
    %c0_791 = arith.constant 0 : index
    %c0_792 = arith.constant 0 : index
    %c0_793 = arith.constant 0 : index
    %798 = vector.load %arg2[%c4_790, %c0_791, %c0_792, %c0_793] : memref<5x5x8x256xf32, #tpu.memory_space<vmem>>, vector<1x1x8x256xf32>
    %799 = vector.shape_cast %798 : vector<1x1x8x256xf32> to vector<8x256xf32>
    %800 = vector.shape_cast %799 : vector<8x256xf32> to vector<1x8x256xf32>
    %801 = vector.broadcast %800 : vector<1x8x256xf32> to vector<4x8x256xf32>
    %802 = arith.mulf %797, %801 : vector<4x8x256xf32>
    %803 = arith.addf %795, %802 : vector<4x8x256xf32>
    %c7_794 = arith.constant 7 : index
    %c1_795 = arith.constant 1 : index
    %c0_796 = arith.constant 0 : index
    %c0_797 = arith.constant 0 : index
    %804 = vector.load %arg6[%c7_794, %c1_795, %c0_796, %c0_797] : memref<8x8x8x256xf32, #tpu.memory_space<vmem>>, vector<1x4x8x256xf32>
    %805 = vector.shape_cast %804 : vector<1x4x8x256xf32> to vector<4x8x256xf32>
    %c4_798 = arith.constant 4 : index
    %c1_799 = arith.constant 1 : index
    %c0_800 = arith.constant 0 : index
    %c0_801 = arith.constant 0 : index
    %806 = vector.load %arg2[%c4_798, %c1_799, %c0_800, %c0_801] : memref<5x5x8x256xf32, #tpu.memory_space<vmem>>, vector<1x1x8x256xf32>
    %807 = vector.shape_cast %806 : vector<1x1x8x256xf32> to vector<8x256xf32>
    %808 = vector.shape_cast %807 : vector<8x256xf32> to vector<1x8x256xf32>
    %809 = vector.broadcast %808 : vector<1x8x256xf32> to vector<4x8x256xf32>
    %810 = arith.mulf %805, %809 : vector<4x8x256xf32>
    %811 = arith.addf %803, %810 : vector<4x8x256xf32>
    %c7_802 = arith.constant 7 : index
    %c2_803 = arith.constant 2 : index
    %c0_804 = arith.constant 0 : index
    %c0_805 = arith.constant 0 : index
    %812 = vector.load %arg6[%c7_802, %c2_803, %c0_804, %c0_805] : memref<8x8x8x256xf32, #tpu.memory_space<vmem>>, vector<1x4x8x256xf32>
    %813 = vector.shape_cast %812 : vector<1x4x8x256xf32> to vector<4x8x256xf32>
    %c4_806 = arith.constant 4 : index
    %c2_807 = arith.constant 2 : index
    %c0_808 = arith.constant 0 : index
    %c0_809 = arith.constant 0 : index
    %814 = vector.load %arg2[%c4_806, %c2_807, %c0_808, %c0_809] : memref<5x5x8x256xf32, #tpu.memory_space<vmem>>, vector<1x1x8x256xf32>
    %815 = vector.shape_cast %814 : vector<1x1x8x256xf32> to vector<8x256xf32>
    %816 = vector.shape_cast %815 : vector<8x256xf32> to vector<1x8x256xf32>
    %817 = vector.broadcast %816 : vector<1x8x256xf32> to vector<4x8x256xf32>
    %818 = arith.mulf %813, %817 : vector<4x8x256xf32>
    %819 = arith.addf %811, %818 : vector<4x8x256xf32>
    %c7_810 = arith.constant 7 : index
    %c3_811 = arith.constant 3 : index
    %c0_812 = arith.constant 0 : index
    %c0_813 = arith.constant 0 : index
    %820 = vector.load %arg6[%c7_810, %c3_811, %c0_812, %c0_813] : memref<8x8x8x256xf32, #tpu.memory_space<vmem>>, vector<1x4x8x256xf32>
    %821 = vector.shape_cast %820 : vector<1x4x8x256xf32> to vector<4x8x256xf32>
    %c4_814 = arith.constant 4 : index
    %c3_815 = arith.constant 3 : index
    %c0_816 = arith.constant 0 : index
    %c0_817 = arith.constant 0 : index
    %822 = vector.load %arg2[%c4_814, %c3_815, %c0_816, %c0_817] : memref<5x5x8x256xf32, #tpu.memory_space<vmem>>, vector<1x1x8x256xf32>
    %823 = vector.shape_cast %822 : vector<1x1x8x256xf32> to vector<8x256xf32>
    %824 = vector.shape_cast %823 : vector<8x256xf32> to vector<1x8x256xf32>
    %825 = vector.broadcast %824 : vector<1x8x256xf32> to vector<4x8x256xf32>
    %826 = arith.mulf %821, %825 : vector<4x8x256xf32>
    %827 = arith.addf %819, %826 : vector<4x8x256xf32>
    %c7_818 = arith.constant 7 : index
    %c4_819 = arith.constant 4 : index
    %c0_820 = arith.constant 0 : index
    %c0_821 = arith.constant 0 : index
    %828 = vector.load %arg6[%c7_818, %c4_819, %c0_820, %c0_821] : memref<8x8x8x256xf32, #tpu.memory_space<vmem>>, vector<1x4x8x256xf32>
    %829 = vector.shape_cast %828 : vector<1x4x8x256xf32> to vector<4x8x256xf32>
    %c4_822 = arith.constant 4 : index
    %c4_823 = arith.constant 4 : index
    %c0_824 = arith.constant 0 : index
    %c0_825 = arith.constant 0 : index
    %830 = vector.load %arg2[%c4_822, %c4_823, %c0_824, %c0_825] : memref<5x5x8x256xf32, #tpu.memory_space<vmem>>, vector<1x1x8x256xf32>
    %831 = vector.shape_cast %830 : vector<1x1x8x256xf32> to vector<8x256xf32>
    %832 = vector.shape_cast %831 : vector<8x256xf32> to vector<1x8x256xf32>
    %833 = vector.broadcast %832 : vector<1x8x256xf32> to vector<4x8x256xf32>
    %834 = arith.mulf %829, %833 : vector<4x8x256xf32>
    %835 = arith.addf %827, %834 : vector<4x8x256xf32>
    %cst_826 = arith.constant dense<0.000000e+00> : vector<4x256xf32>
    %836 = vector.multi_reduction <add>, %835, %cst_826 [1] : vector<4x8x256xf32> to vector<4x256xf32>
    %c0_827 = arith.constant 0 : index
    %c0_828 = arith.constant 0 : index
    %837 = vector.load %arg3[%c0_827, %c0_828] : memref<4x256xf32, #tpu.memory_space<vmem>>, vector<1x256xf32>
    %838 = vector.shape_cast %837 : vector<1x256xf32> to vector<256xf32>
    %839 = vector.shape_cast %838 : vector<256xf32> to vector<1x256xf32>
    %840 = vector.broadcast %839 : vector<1x256xf32> to vector<4x256xf32>
    %841 = arith.addf %836, %840 : vector<4x256xf32>
    %cst_829 = arith.constant 0.000000e+00 : f32
    %842 = vector.broadcast %cst_829 : f32 to vector<4x256xf32>
    %843 = arith.maximumf %841, %842 : vector<4x256xf32>
    %c12 = arith.constant 12 : index
    %c0_830 = arith.constant 0 : index
    %844 = vector.load %arg7[%c12, %c0_830] : memref<16x256xf32, #tpu.memory_space<vmem>>, vector<4x256xf32>
    tpu.vector_store %arg7[%c12, %c0_830], %843 {strides = array<i32>} : memref<16x256xf32, #tpu.memory_space<vmem>>, vector<4x256xf32>,
    %c1_831 = arith.constant 1 : index
    %c0_832 = arith.constant 0 : index
    %845 = vector.load %arg3[%c1_831, %c0_832] : memref<4x256xf32, #tpu.memory_space<vmem>>, vector<3x256xf32>
    %c0_833 = arith.constant 0 : index
    %c0_834 = arith.constant 0 : index
    %846 = vector.load %arg7[%c0_833, %c0_834] : memref<16x256xf32, #tpu.memory_space<vmem>>, vector<16x256xf32>
    %847 = tpu.transpose %846, [1, 0] : vector<16x256xf32> -> vector<256x16xf32>
    %cst_835 = arith.constant dense<0.000000e+00> : vector<3x16xf32>
    %848 = tpu.matmul %845, %847, %cst_835 {dimension_numbers = #tpu.dot_dimension_numbers<[1], [0], [0], [1], [0, 0, 1, 1], [], []>} : vector<3x256xf32>, vector<256x16xf32>, vector<3x16xf32> -> vector<3x16xf32>
    %c0_836 = arith.constant 0 : index
    %c0_837 = arith.constant 0 : index
    %849 = vector.load %arg4[%c0_836, %c0_837] : memref<16x4096xf32, #tpu.memory_space<vmem>>, vector<16x4096xf32>
    %cst_838 = arith.constant dense<0.000000e+00> : vector<3x4096xf32>
    %850 = tpu.matmul %848, %849, %cst_838 {dimension_numbers = #tpu.dot_dimension_numbers<[1], [0], [0], [1], [0, 0, 1, 1], [], []>} : vector<3x16xf32>, vector<16x4096xf32>, vector<3x4096xf32> -> vector<3x4096xf32>
    %c0_839 = arith.constant 0 : index
    %c0_840 = arith.constant 0 : index
    %c0_841 = arith.constant 0 : index
    %851 = vector.load %arg5[%c0_839, %c0_840, %c0_841] : memref<1x3x4096xf32, #tpu.memory_space<vmem>>, vector<1x3x4096xf32>
    %852 = vector.shape_cast %851 : vector<1x3x4096xf32> to vector<3x4096xf32>
    %853 = vector.shape_cast %850 : vector<3x4096xf32> to vector<1x3x4096xf32>
    tpu.vector_store %arg5[%c0_839, %c0_840, %c0_841], %853 {strides = array<i32>} : memref<1x3x4096xf32, #tpu.memory_space<vmem>>, vector<1x3x4096xf32>,
    return
  }
  func.func @transform_0(%arg0: i32) -> (i32, i32, i32, i32, i32) {
    %c0_i32 = arith.constant 0 : i32
    %c0_i32_0 = arith.constant 0 : i32
    %c0_i32_1 = arith.constant 0 : i32
    %c0_i32_2 = arith.constant 0 : i32
    %c0_i32_3 = arith.constant 0 : i32
    return %arg0, %c0_i32, %c0_i32_0, %c0_i32_1, %c0_i32_2 : i32, i32, i32, i32, i32
  }
  func.func @transform_1(%arg0: i32) -> (i32, i32, i32, i32) {
    %c0_i32 = arith.constant 0 : i32
    %c0_i32_0 = arith.constant 0 : i32
    %c0_i32_1 = arith.constant 0 : i32
    %c0_i32_2 = arith.constant 0 : i32
    %c0_i32_3 = arith.constant 0 : i32
    return %c0_i32, %c0_i32_0, %c0_i32_1, %c0_i32_2 : i32, i32, i32, i32
  }
  func.func @transform_2(%arg0: i32) -> (i32, i32) {
    %c0_i32 = arith.constant 0 : i32
    %c0_i32_0 = arith.constant 0 : i32
    %c0_i32_1 = arith.constant 0 : i32
    return %c0_i32, %c0_i32_0 : i32, i32
  }
  func.func @transform_3(%arg0: i32) -> (i32, i32) {
    %c0_i32 = arith.constant 0 : i32
    %c0_i32_0 = arith.constant 0 : i32
    %c0_i32_1 = arith.constant 0 : i32
    return %c0_i32, %c0_i32_0 : i32, i32
  }
  func.func @transform_4(%arg0: i32) -> (i32, i32, i32) {
    %c0_i32 = arith.constant 0 : i32
    %c0_i32_0 = arith.constant 0 : i32
    %c0_i32_1 = arith.constant 0 : i32
    return %arg0, %c0_i32, %c0_i32_0 : i32, i32, i32
  }
}

</mosaic_0001>

<bundles_post_ra>
// kernel: semantic_head_forward.1
= control target key start
LH: loop header
LB: loop body
LE: loop exit
PB: predicated region body
PF: predicated region fallthrough
CT: control target
= control target key end

     0   :  { %s5230_s15 = smov 0   ;;  %s7292_s0 = inlined_call_operand.vmem [shape: f32[2,4,4,8,256], index: 0, kind: input, shape index: {}]   ;;  %s7293_s1 = inlined_call_operand.vmem [shape: f32[5,5,8,256], index: 1, kind: input, shape index: {}]   ;;  %s7294_s2 = inlined_call_operand.vmem [shape: f32[4,256], index: 2, kind: input, shape index: {}]   ;;  %s7295_s3 = inlined_call_operand.vmem [shape: f32[16,4096], index: 3, kind: input, shape index: {}]   ;;  %s7296_s4 = inlined_call_operand.vmem [shape: f32[2,3,4096], index: 4, kind: output, shape index: {}]  }
   0x1 LB: > { %s4883_s16 = sadd.s32 4294967295, %s5202_s15   ;;  %p4887_p0 = scmp.ge.s32.totalorder %s5202_s15, 1  ;;  %s5202_s15 = sphi %s5230_s15, %s14_s15  }
   0x2   : > { %p162_p1 = scmp.lt.s32.totalorder %s5202_s15, 3 }
   0x4   : > { %p163_p2 = pnand %p4887_p0, %p162_p1 }
   0x6   : > { %166 = sbr.rel (%p163_p2) target bundleno = 889 (0x379), region = 36 }
   0xd   : > { %p188_p3 = scmp.lt.s32.totalorder %s4883_s16, 1  ;;  %v5241_v0 = vld [vmem:[%s7293_s1 + $0x8] sm:$0xff]  ;;  %v5246_v1 = vld [vmem:[%s7293_s1 + $0x18] sm:$0xff]  ;;  %v1138_v3 = vlaneseq  ;;  %vm1173_vm0 = vcmask 1041409   ;;  %vm1176_vm1 = vcmask 1042434   ;;  %vm1179_vm2 = vcmask 1043459  }
   0xe   : > { %7454 = vst [vmem:[#allocation4_spill] sm:$0xff] %v5241_v0  ;;  %7455 = vst [vmem:[#allocation5_spill] sm:$0xff] %v5246_v1  ;;  %v5251_v2 = vld [vmem:[%s7293_s1 + $0x28] sm:$0xff]  ;;  %v5254_v4 = vmul.f32 0.0, %v5241_v0  ;;  %v430_v5 = vmul.f32 0.0, %v5246_v1  ;;  %v5261_v7 = vld [vmem:[%s7293_s1 + $0x38] sm:$0xff] }
   0xf   : > { %7456 = vst [vmem:[#allocation6_spill] sm:$0xff] %v5251_v2  ;;  %v458_v6 = vmul.f32 0.0, %v5251_v2  ;;  %7458 = vst [vmem:[#allocation8_spill] sm:$0xff] %v5261_v7  ;;  %v5266_v8 = vld [vmem:[%s7293_s1 + $0x48] sm:$0xff]  ;;  %v5271_v9 = vld [vmem:[%s7293_s1 + $0x58] sm:$0xff]  ;;  %s7662_s16 = smov (!%p188_p3, %s4883_s16), 1 }
  0x10   : > { %7457 = vst [vmem:[#allocation7_spill] sm:$0xff] %v5254_v4  ;;  %7459 = vst [vmem:[#allocation9_spill] sm:$0xff] %v5266_v8  ;;  %v5276_v10 = vmul.f32 0.0, %v5261_v7  ;;  %v5281_v11 = vld [vmem:[%s7293_s1 + $0x68] sm:$0xff]  ;;  %v5286_v12 = vld [vmem:[%s7293_s1 + $0x78] sm:$0xff]  ;;  %v5289_v13 = vadd.f32 %v430_v5, %v5254_v4  ;;  %v5292_v14 = vmul.f32 0.0, %v5266_v8 }
  0x11   : > { %7460 = vst [vmem:[#allocation10_spill] sm:$0xff] %v5271_v9  ;;  %v5295_v15 = vmul.f32 0.0, %v5271_v9  ;;  %v5300_v16 = vld [vmem:[%s7293_s1 + $0x88] sm:$0xff]  ;;  %v5305_v17 = vld [vmem:[%s7293_s1 + $0x98] sm:$0xff]  ;;  %v5312_v19 = vshrl.u32 %v1138_v3, 7  ;;  %s5102_s13 = sshll.u32 %s7662_s16, 8 }
  0x12   : > { %7461 = vst [vmem:[#allocation11_spill] sm:$0xff] %v5276_v10  ;;  %7462 = vst [vmem:[#allocation12_spill] sm:$0xff] %v5289_v13  ;;  %v5310_v18 = vld [vmem:[%s7293_s1 + $0xa8] sm:$0xff]  ;;  %v5316_v20 = vmul.f32 0.0, %v5281_v11  ;;  %v5319_v21 = vmul.f32 0.0, %v5286_v12  ;;  %v5322_v22 = vmul.f32 0.0, %v5300_v16  ;;  %s5337_s22 = scalar_lea.vmem %s7292_s0, %s5102_s13  ;;  %v466_v25 = vadd.f32 %v458_v6, %v5289_v13 }
  0x13   : > { %7463 = vst [vmem:[#allocation13_spill] sm:$0xff] %v5292_v14  ;;  %7464 = vst [vmem:[#allocation14_spill] sm:$0xff] %v5295_v15  ;;  %v5327_v23 = vld [vmem:[%s7293_s1 + $0xb8] sm:$0xff]  ;;  %v5332_v24 = vld [vmem:[%s7293_s1 + $0xc8] sm:$0xff]  ;;  %v5341_v26 = vmul.f32 0.0, %v5305_v17  ;;  %v5344_v27 = vmul.f32 0.0, %v5310_v18 }
  0x14   : > { %7465 = vst [vmem:[#allocation15_spill] sm:$0xff] %v5312_v19  ;;  %7466 = vst [vmem:[#allocation16_spill] sm:$0xff] %v5316_v20  ;;  %v5347_v28 = vmul.f32 0.0, %v5327_v23  ;;  %v5352_v29 = vld [vmem:[%s7293_s1 + $0xd8] sm:$0xff]  ;;  %v5357_v30 = vld [vmem:[%s7293_s1 + $0xe8] sm:$0xff]  ;;  %v5380_v37 = vsub.s32 1, %v5312_v19  ;;  %v494_v39 = vadd.f32 %v5276_v10, %v466_v25 }
  0x15   : > { %7467 = vst [vmem:[#allocation17_spill] sm:$0xff] %v5327_v23  ;;  %7468 = vst [vmem:[#allocation18_spill] sm:$0xff] %v5332_v24  ;;  %v5362_v31 = vld [vmem:[%s7293_s1 + $0xf8] sm:$0xff]  ;;  %v5365_v32 = vld [vmem:[%s5337_s22 + $0x8] sm:$0xff]  ;;  %v5371_v34 = vmul.f32 0.0, %v5352_v29  ;;  %v5374_v35 = vmul.f32 0.0, %v5357_v30 }
  0x16   : > { %7469 = vst [vmem:[#allocation19_spill] sm:$0xff] %v5352_v29  ;;  %7470 = vst [vmem:[#allocation20_spill] sm:$0xff] %v5357_v30  ;;  %v5368_v33 = vld [vmem:[%s5337_s22 + $0x18] sm:$0xff]  ;;  %v5377_v36 = vmul.f32 0.0, %v5362_v31  ;;  %v5383_v38 = vld [vmem:[%s5337_s22 + $0x28] sm:$0xff]  ;;  %v5388_v40 = vmul.f32 %v5310_v18, %v5365_v32  ;;  %v5396_v42 = vmul.f32 %v5327_v23, %v5365_v32  ;;  %v5411_v46 = vmul.f32 %v5332_v24, %v5365_v32  ;;  %s5103_s11 = sshll.u32 %s7662_s16, 7 }
  0x17   : > { %7471 = vst [vmem:[#allocation21_spill] sm:$0xff] %v5362_v31  ;;  %7473 = vst [vmem:[#allocation23_spill] sm:$0xff] %v5380_v37  ;;  %v5392_v41 = vmul.f32 %v5310_v18, %v5368_v33  ;;  %v5399_v43 = vld [vmem:[%s5337_s22 + $0x38] sm:$0xff]  ;;  %v5403_v44 = vmul.f32 %v5327_v23, %v5368_v33  ;;  %v5407_v45 = vmul.f32 %v5327_v23, %v5383_v38  ;;  %v5433_v52 = vld [vmem:[%s5337_s22 + $0x48] sm:$0xff]  ;;  %vm1932_vm3 = vcmask 1045509   ;;  %s7271_s14 = scalar_lea.vmem %s7296_s4, %s5103_s11 }
  0x18   : > { %7472 = vst [vmem:[#allocation22_spill] sm:$0xff] %v5377_v36  ;;  %v5415_v47 = vmul.f32 %v5332_v24, %v5368_v33  ;;  %v5418_v48 = vadd.f32 %v5292_v14, %v494_v39  ;;  %v5422_v49 = vmul.f32 %v5332_v24, %v5383_v38  ;;  %v5426_v50 = vmul.f32 %v5332_v24, %v5399_v43  ;;  %v5436_v53 = vld [vmem:[%s5337_s22 + $0x58] sm:$0xff]  ;;  %v5455_v58 = vld [vmem:[%s5337_s22 + $0x68] sm:$0xff] }
  0x19   : > { %v5430_v51 = vmul.f32 %v5352_v29, %v5368_v33  ;;  %7474 = vst [vmem:[#allocation24_spill] sm:$0xff] %v5436_v53  ;;  %v5440_v54 = vmul.f32 %v5352_v29, %v5383_v38  ;;  %v5444_v55 = vmul.f32 %v5352_v29, %v5399_v43  ;;  %v5448_v56 = vmul.f32 %v5357_v30, %v5383_v38  ;;  %v5472_v62 = vld [vmem:[%s7293_s1 + $0x108] sm:$0xff]  ;;  %v5477_v63 = vld [vmem:[%s7293_s1 + $0x118] sm:$0xff] }
  0x1a   : > { %v5452_v57 = vmul.f32 %v5357_v30, %v5399_v43  ;;  %7475 = vst [vmem:[#allocation25_spill] sm:$0xff] %v5455_v58  ;;  %v5459_v59 = vadd.f32 %v5295_v15, %v5418_v48  ;;  %v5463_v60 = vmul.f32 %v5362_v31, %v5433_v52  ;;  %v5467_v61 = vmul.f32 %v5362_v31, %v5436_v53  ;;  %v5499_v19 = vld [vmem:[%s7293_s1 + $0x128] sm:$0xff]  ;;  %v5504_v15 = vld [vmem:[%s7293_s1 + $0x138] sm:$0xff] }
  0x1b   : > { %7476 = vst [vmem:[#allocation26_spill] sm:$0xff] %v5472_v62  ;;  %7477 = vst [vmem:[#allocation27_spill] sm:$0xff] %v5477_v63  ;;  %v1336_v3 = vmul.f32 %v5271_v9, %v5365_v32  ;;  %v5482_v5 = vmul.f32 0.0, %v5472_v62  ;;  %v5486_v6 = vmul.f32 %v5472_v62, %v5433_v52  ;;  %v5490_v25 = vmul.f32 %v5472_v62, %v5436_v53  ;;  %v5507_v14 = vld [vmem:[%s5337_s22 + $0x78] sm:$0xff]  ;;  %v5528_v2 = vld [vmem:[%s7293_s1 + $0x148] sm:$0xff] }
  0x1c   : > { %v5494_v39 = vmul.f32 %v5472_v62, %v5455_v58  ;;  %7479 = vst [vmem:[#allocation29_spill] sm:$0xff] %v5499_v19  ;;  %7480 = vst [vmem:[#allocation30_spill] sm:$0xff] %v5504_v15  ;;  %v5511_v8 = vadd.f32 %v5316_v20, %v5459_v59  ;;  %v5515_v10 = vmul.f32 %v5477_v63, %v5433_v52  ;;  %v5549_v62 = vld [vmem:[%s7293_s1 + $0x158] sm:$0xff]  ;;  %v5560_v29 = vmul.f32 0.0, %v5499_v19 }
  0x1d   : > { %7478 = vst [vmem:[#allocation28_spill] sm:$0xff] %v5482_v5  ;;  %7481 = vst [vmem:[#allocation31_spill] sm:$0xff] %v5507_v14  ;;  %v5519_v7 = vmul.f32 %v5477_v63, %v5436_v53  ;;  %v5523_v13 = vmul.f32 %v5477_v63, %v5455_v58  ;;  %v5532_v20 = vmul.f32 %v5477_v63, %v5507_v14  ;;  %v5552_v63 = vld [vmem:[%s5337_s22 + $0x88] sm:$0xff]  ;;  %v5555_v31 = vld [vmem:[%s5337_s22 + $0x98] sm:$0xff]  ;;  %vm1935_vm4 = vcmask 1046534  }
  0x1e   : > { %7482 = vst [vmem:[#allocation32_spill] sm:$0xff] %v5528_v2  ;;  %v5536_v4 = vmul.f32 %v5499_v19, %v5436_v53  ;;  %v5540_v1 = vmul.f32 %v5499_v19, %v5455_v58  ;;  %v5544_v0 = vmul.f32 %v5499_v19, %v5507_v14  ;;  %7484 = vst [vmem:[#allocation34_spill] sm:$0xff] %v5549_v62  ;;  %v5573_v53 = vld [vmem:[%s7293_s1 + $0x168] sm:$0xff]  ;;  %vm1938_vm5 = vcmask 1047559  }
  0x1f   : > { %7485 = vst [vmem:[#allocation35_spill] sm:$0xff] %v5552_v63  ;;  %7486 = vst [vmem:[#allocation36_spill] sm:$0xff] %v5555_v31  ;;  %v606_v30 = vadd.f32 %v5319_v21, %v5511_v8  ;;  %v5564_v24 = vmul.f32 %v5504_v15, %v5455_v58  ;;  %v5568_v23 = vmul.f32 %v5504_v15, %v5507_v14  ;;  %v5579_v21 = vmul.f32 0.0, %v5528_v2  ;;  %v5592_v14 = vld [vmem:[%s7293_s1 + $0x178] sm:$0xff] }
  0x20   : > { %7483 = vst [vmem:[#allocation33_spill] sm:$0xff] %v5544_v0  ;;  %7487 = vst [vmem:[#allocation37_spill] sm:$0xff] %v5560_v29  ;;  %v5576_v0 = vmul.f32 0.0, %v5504_v15  ;;  %v5583_v19 = vmul.f32 %v5528_v2, %v5552_v63  ;;  %v5587_v58 = vmul.f32 %v5528_v2, %v5555_v31  ;;  %v5607_v2 = vmul.f32 %v5549_v62, %v5555_v31 }
  0x21   : > { %7488 = vst [vmem:[#allocation38_spill] sm:$0xff] %v5564_v24  ;;  %7489 = vst [vmem:[#allocation39_spill] sm:$0xff] %v5568_v23  ;;  %v5595_v23 = vld [vmem:[%s5337_s22 + $0xa8] sm:$0xff]  ;;  %v634_v15 = vadd.f32 %v5322_v22, %v606_v30  ;;  %vm3608_vm6 = vcmask 130048  }
  0x22   : > { %7490 = vst [vmem:[#allocation40_spill] sm:$0xff] %v5573_v53  ;;  %7491 = vst [vmem:[#allocation41_spill] sm:$0xff] %v5576_v0  ;;  %v5599_v0 = vmul.f32 0.0, %v5549_v62  ;;  %v5619_v30 = vmul.f32 %v5549_v62, %v5595_v23 }
  0x23   : > { %7492 = vst [vmem:[#allocation42_spill] sm:$0xff] %v5579_v21  ;;  %7493 = vst [vmem:[#allocation43_spill] sm:$0xff] %v5583_v19  ;;  %v5603_v21 = vmul.f32 %v5549_v62, %v5552_v63  ;;  %v5615_v19 = vld [vmem:[%s5337_s22 + $0xb8] sm:$0xff]  ;;  %v662_v24 = vadd.f32 %v5341_v26, %v634_v15  ;;  %v5640_v62 = vmul.f32 %v5592_v14, %v5555_v31  ;;  %v5654_v15 = vmul.f32 0.0, %v5592_v14 }
  0x24   : > { %7494 = vst [vmem:[#allocation44_spill] sm:$0xff] %v5587_v58  ;;  %7495 = vst [vmem:[#allocation45_spill] sm:$0xff] %v5592_v14  ;;  %v5612_v58 = vld [vmem:[%s7293_s1 + $0x188] sm:$0xff]  ;;  %v5636_v29 = vmul.f32 %v5573_v53, %v5615_v19 }
  0x25   : > { %7496 = vst [vmem:[#allocation46_spill] sm:$0xff] %v5595_v23  ;;  %7497 = vst [vmem:[#allocation47_spill] sm:$0xff] %v5599_v0  ;;  %v5623_v0 = vmul.f32 %v5573_v53, %v5552_v63  ;;  %v5644_v63 = vmul.f32 %v5592_v14, %v5595_v23 }
  0x26   : > { %7498 = vst [vmem:[#allocation48_spill] sm:$0xff] %v5603_v21  ;;  %7499 = vst [vmem:[#allocation49_spill] sm:$0xff] %v5607_v2  ;;  %v5627_v21 = vmul.f32 %v5573_v53, %v5555_v31  ;;  %v5631_v2 = vmul.f32 %v5573_v53, %v5595_v23  ;;  %v5658_v53 = vmul.f32 %v5612_v58, %v5595_v23 }
  0x27   : > { %7500 = vst [vmem:[#allocation50_spill] sm:$0xff] %v5612_v58  ;;  %7501 = vst [vmem:[#allocation51_spill] sm:$0xff] %v5615_v19  ;;  %v5662_v31 = vmul.f32 %v5612_v58, %v5615_v19  ;;  %v1338_v23 = vmul.f32 %v5271_v9, %v5368_v33  ;;  %v1364_v9 = vmul.f32 %v5281_v11, %v5383_v38 }
  0x28   : > { %7502 = vst [vmem:[#allocation52_spill] sm:$0xff] %v5623_v0  ;;  %7503 = vst [vmem:[#allocation53_spill] sm:$0xff] %v5627_v21  ;;  %v1136_v21 = vld [vmem:[%s7294_s2] ss:$4 sm:$0x3]  ;;  %v5668_v0 = vmul.f32 0.0, %v5612_v58 }
  0x29   : > { %7504 = vst [vmem:[#allocation54_spill] sm:$0xff] %v5631_v2  ;;  %7505 = vst [vmem:[#allocation55_spill] sm:$0xff] %v5636_v29  ;;  %v5651_v2 = vmul.f32 %v5592_v14, %v5615_v19  ;;  %v696_v29 = vadd.f32 %v5392_v41, %v662_v24  ;;  %v5671_v14 = vrot.slane %v1136_v21, %v5380_v37 }
  0x2a   : > { %7506 = vst [vmem:[#allocation56_spill] sm:$0xff] %v5640_v62  ;;  %7507 = vst [vmem:[#allocation57_spill] sm:$0xff] %v5644_v63  ;;  %v690_v63 = vadd.f32 %v5344_v27, %v662_v24  ;;  %v694_v62 = vadd.f32 %v5388_v40, %v662_v24  ;;  %v1360_v19 = vmul.f32 %v5281_v11, %v5365_v32 }
  0x2b   : > { %7508 = vst [vmem:[#allocation58_spill] sm:$0xff] %v5654_v15  ;;  %7509 = vst [vmem:[#allocation59_spill] sm:$0xff] %v5658_v53  ;;  %v1344_v53 = vadd.f32 %v1336_v3, %v5418_v48  ;;  %v724_v41 = vadd.f32 %v5407_v45, %v696_v29  ;;  %v1346_v58 = vadd.f32 %v1338_v23, %v5418_v48 }
  0x2c   : > { %7510 = vst [vmem:[#allocation60_spill] sm:$0xff] %v5662_v31  ;;  %7511 = vst [vmem:[#allocation61_spill] sm:$0xff] %v5668_v0  ;;  %v718_v31 = vadd.f32 %v5347_v28, %v690_v63  ;;  %v720_v40 = vadd.f32 %v5396_v42, %v690_v63  ;;  %v722_v24 = vadd.f32 %v5403_v44, %v694_v62 }
  0x2d   : > { %7512 = vst [vmem:[#allocation62_spill] sm:$0xff] %v5671_v14  ;;  %v1362_v21 = vmul.f32 %v5281_v11, %v5368_v33  ;;  %v1368_v3 = vadd.f32 %v1360_v19, %v5459_v59  ;;  %v751_v44 = vadd.f32 %v5426_v50, %v724_v41  ;;  %v1372_v29 = vadd.f32 %v1364_v9, %v1346_v58 }
  0x2e   : > { %v745_v37 = vadd.f32 %v5411_v46, %v718_v31  ;;  %v747_v14 = vadd.f32 %v5415_v47, %v720_v40  ;;  %v749_v42 = vadd.f32 %v5422_v49, %v722_v24  ;;  %v1384_v23 = vmul.f32 %v5286_v12, %v5365_v32 }
  0x2f   : > { %v1370_v62 = vadd.f32 %v1362_v21, %v1344_v53  ;;  %v1386_v45 = vmul.f32 %v5286_v12, %v5368_v33  ;;  %v779_v46 = vadd.f32 %v5371_v34, %v751_v44  ;;  %v1388_v47 = vmul.f32 %v5286_v12, %v5383_v38 }
  0x30   : > { %v773_v48 = vadd.f32 %v5430_v51, %v745_v37  ;;  %v775_v19 = vadd.f32 %v5440_v54, %v747_v14  ;;  %v777_v31 = vadd.f32 %v5444_v55, %v749_v42  ;;  %v1390_v9 = vmul.f32 %v5286_v12, %v5399_v43 }
  0x31   : > { %v1392_v49 = vadd.f32 %v1384_v23, %v5511_v8  ;;  %v1394_v50 = vadd.f32 %v1386_v45, %v1368_v3  ;;  %v807_v14 = vadd.f32 %v5374_v35, %v779_v46  ;;  %v1396_v51 = vadd.f32 %v1388_v47, %v1370_v62 }
  0x32   : > { %v801_v53 = vadd.f32 %v5448_v56, %v773_v48  ;;  %v803_v58 = vadd.f32 %v5452_v57, %v775_v19  ;;  %v805_v37 = vadd.f32 %v5374_v35, %v777_v31  ;;  %v1398_v54 = vadd.f32 %v1390_v9, %v1372_v29 }
  0x33   : > { %v1410_v55 = vmul.f32 %v5300_v16, %v5368_v33  ;;  %v1412_v59 = vmul.f32 %v5300_v16, %v5383_v38  ;;  %v835_v57 = vadd.f32 %v5467_v61, %v807_v14  ;;  %v1414_v40 = vmul.f32 %v5300_v16, %v5399_v43  ;;  %v7516_v14 = vld [vmem:[#allocation38_spill] sm:$0xff] }
  0x34   : > { %v829_v63 = vadd.f32 %v5377_v36, %v801_v53  ;;  %v831_v8 = vadd.f32 %v5377_v36, %v803_v58  ;;  %v833_v56 = vadd.f32 %v5463_v60, %v805_v37  ;;  %v1424_v21 = vadd.f32 %v1398_v54, %v5322_v22  ;;  %v7517_v54 = vld [vmem:[#allocation39_spill] sm:$0xff] }
  0x35   : > { %v1418_v24 = vadd.f32 %v1410_v55, %v1392_v49  ;;  %v1420_v41 = vadd.f32 %v1412_v59, %v1394_v50  ;;  %v863_v62 = vadd.f32 %v5494_v39, %v835_v57  ;;  %v1422_v29 = vadd.f32 %v1414_v40, %v1396_v51  ;;  %v7513_v49 = vld [vmem:[#allocation33_spill] sm:$0xff] }
  0x36   : > { %v857_v3 = vadd.f32 %v5482_v5, %v829_v63  ;;  %v859_v42 = vadd.f32 %v5486_v6, %v831_v8  ;;  %v861_v44 = vadd.f32 %v5490_v25, %v833_v56  ;;  %v1436_v60 = vmul.f32 %v5305_v17, %v5383_v38  ;;  %v7518_v59 = vld [vmem:[#allocation41_spill] sm:$0xff] }
  0x37   : > { %v1438_v61 = vmul.f32 %v5305_v17, %v5399_v43  ;;  %v1450_v23 = vadd.f32 %v1424_v21, %v5341_v26  ;;  %v891_v6 = vadd.f32 %v5532_v20, %v863_v62  ;;  %v1448_v39 = vadd.f32 %v1422_v29, %v5341_v26  ;;  %v7519_v8 = vld [vmem:[#allocation17_spill] sm:$0xff]  ;;  %v7523_v62 = vld [vmem:[#allocation44_spill] sm:$0xff] }
  0x38   : > { %v885_v45 = vadd.f32 %v5515_v10, %v857_v3  ;;  %v887_v48 = vadd.f32 %v5519_v7, %v859_v42  ;;  %v889_v19 = vadd.f32 %v5523_v13, %v861_v44  ;;  %v1444_v25 = vadd.f32 %v1436_v60, %v1418_v24  ;;  %v7514_v10 = vld [vmem:[#allocation37_spill] sm:$0xff]  ;;  %v7515_v7 = vld [vmem:[#allocation24_spill] sm:$0xff]  ;;  %v7522_v42 = vld [vmem:[#allocation43_spill] sm:$0xff] }
  0x39   : > { %v1446_v31 = vadd.f32 %v1438_v61, %v1420_v41  ;;  %v1466_v46 = vmul.f32 %v5310_v18, %v5433_v52  ;;  %v919_v53 = vadd.f32 %v7514_v10, %v891_v6  ;;  %v1468_v13 = vmul.f32 %v5310_v18, %v7515_v7  ;;  %v7520_v40 = vld [vmem:[#allocation25_spill] sm:$0xff]  ;;  %v7521_v41 = vld [vmem:[#allocation42_spill] sm:$0xff]  ;;  %v7525_v6 = vld [vmem:[#allocation48_spill] sm:$0xff] }
  0x3a   : > { %v913_v47 = vadd.f32 %v5536_v4, %v885_v45  ;;  %v915_v9 = vadd.f32 %v5540_v1, %v887_v48  ;;  %v917_v50 = vadd.f32 %v7513_v49, %v889_v19  ;;  %v1470_v20 = vadd.f32 %v1444_v25, %v5344_v27  ;;  %v7524_v48 = vld [vmem:[#allocation47_spill] sm:$0xff] }
  0x3b   : > { %v1472_v58 = vadd.f32 %v1446_v31, %v5344_v27  ;;  %v1474_v37 = vadd.f32 %v1466_v46, %v1448_v39  ;;  %v947_v1 = vadd.f32 %v7518_v59, %v919_v53  ;;  %v1476_v63 = vadd.f32 %v1468_v13, %v1450_v23  ;;  %v7526_v31 = vld [vmem:[#allocation49_spill] sm:$0xff]  ;;  %v7528_v53 = vld [vmem:[#allocation31_spill] sm:$0xff] }
  0x3c   : > { %v941_v51 = vadd.f32 %v7516_v14, %v913_v47  ;;  %v943_v55 = vadd.f32 %v7517_v54, %v915_v9  ;;  %v945_v4 = vadd.f32 %v7518_v59, %v917_v50  ;;  %v1490_v56 = vmul.f32 %v7519_v8, %v5433_v52  ;;  %v7527_v47 = vld [vmem:[#allocation18_spill] sm:$0xff] }
  0x3d   : > { %v1492_v57 = vmul.f32 %v7519_v8, %v7515_v7  ;;  %v1494_v24 = vmul.f32 %v7519_v8, %v7520_v40  ;;  %v975_v29 = vadd.f32 %v7523_v62, %v947_v1  ;;  %v1496_v60 = vadd.f32 %v1470_v20, %v5347_v28  ;;  %v7529_v20 = vld [vmem:[#allocation52_spill] sm:$0xff]  ;;  %v7535_v62 = vld [vmem:[#allocation19_spill] sm:$0xff] }
  0x3e   : > { %v969_v21 = vadd.f32 %v7521_v41, %v941_v51  ;;  %v971_v3 = vadd.f32 %v7521_v41, %v943_v55  ;;  %v973_v44 = vadd.f32 %v7522_v42, %v945_v4  ;;  %v1498_v61 = vadd.f32 %v1490_v56, %v1472_v58  ;;  %v7531_v51 = vld [vmem:[#allocation54_spill] sm:$0xff]  ;;  %v7532_v55 = vld [vmem:[#allocation55_spill] sm:$0xff] }
  0x3f   : > { %v1500_v23 = vadd.f32 %v1492_v57, %v1474_v37  ;;  %v1502_v45 = vadd.f32 %v1494_v24, %v1476_v63  ;;  %v1003_v46 = vadd.f32 %v5619_v30, %v975_v29  ;;  %v1514_v9 = vmul.f32 %v7527_v47, %v5433_v52  ;;  %v7530_v37 = vld [vmem:[#allocation53_spill] sm:$0xff]  ;;  %v7533_v57 = vld [vmem:[#allocation56_spill] sm:$0xff] }
  0x40   : > { %v997_v19 = vadd.f32 %v7524_v48, %v969_v21  ;;  %v999_v25 = vadd.f32 %v7525_v6, %v971_v3  ;;  %v1001_v39 = vadd.f32 %v7526_v31, %v973_v44  ;;  %v1516_v49 = vmul.f32 %v7527_v47, %v7515_v7  ;;  %v7534_v21 = vld [vmem:[#allocation57_spill] sm:$0xff]  ;;  %v7537_v6 = vld [vmem:[#allocation60_spill] sm:$0xff] }
  0x41   : > { %v1518_v50 = vmul.f32 %v7527_v47, %v7520_v40  ;;  %v1520_v13 = vmul.f32 %v7527_v47, %v7528_v53  ;;  %v1031_v30 = vadd.f32 %v7532_v55, %v1003_v46  ;;  %v1522_v4 = vadd.f32 %v1514_v9, %v1496_v60 }
  0x42   : > { %v1025_v58 = vadd.f32 %v7529_v20, %v997_v19  ;;  %v1027_v14 = vadd.f32 %v7530_v37, %v999_v25  ;;  %v1029_v54 = vadd.f32 %v7531_v51, %v1001_v39  ;;  %v1524_v1 = vadd.f32 %v1516_v49, %v1498_v61  ;;  %v7538_v49 = vld [vmem:[#allocation20_spill] sm:$0xff] }
  0x43   : > { %v1526_v63 = vadd.f32 %v1518_v50, %v1500_v23  ;;  %v1528_v56 = vadd.f32 %v1520_v13, %v1502_v45  ;;  %v1059_v44 = vadd.f32 %v5654_v15, %v1031_v30  ;;  %v1540_v29 = vmul.f32 %v7535_v62, %v7515_v7  ;;  %v7536_v23 = vld [vmem:[#allocation59_spill] sm:$0xff] }
  0x44   : > { %v1053_v24 = vadd.f32 %v7533_v57, %v1025_v58  ;;  %v1055_v3 = vadd.f32 %v7534_v21, %v1027_v14  ;;  %v1057_v42 = vadd.f32 %v5651_v2, %v1029_v54  ;;  %v1542_v19 = vmul.f32 %v7535_v62, %v7520_v40  ;;  %v7539_v57 = vld [vmem:[#allocation35_spill] sm:$0xff] }
  0x45   : > { %v1544_v60 = vmul.f32 %v7535_v62, %v7528_v53  ;;  %v1554_v61 = vadd.f32 %v1528_v56, %v5371_v34  ;;  %v1087_v2 = vadd.f32 %v5668_v0, %v1059_v44  ;;  %v1548_v39 = vadd.f32 %v1540_v29, %v1522_v4 }
  0x46   : > { %v1081_v45 = vadd.f32 %v7536_v23, %v1053_v24  ;;  %v1083_v25 = vadd.f32 %v7537_v6, %v1055_v3  ;;  %v1085_v31 = vadd.f32 %v5668_v0, %v1057_v42  ;;  %v1550_v46 = vadd.f32 %v1542_v19, %v1524_v1  ;;  %v7540_v24 = vld [vmem:[#allocation21_spill] sm:$0xff]  ;;  %v7541_v3 = vld [vmem:[#allocation36_spill] sm:$0xff] }
  0x47   : > { %v1552_v9 = vadd.f32 %v1544_v60, %v1526_v63  ;;  %v1566_v50 = vmul.f32 %v7538_v49, %v7520_v40  ;;  %v1130_v37 = vrot.slane %v1087_v2, 4  ;;  %v1568_v14 = vmul.f32 %v7538_v49, %v7528_v53 }
  0x48   : > { %v1094_v13 = vrot.slane %v1081_v45, 4  ;;  %v1106_v20 = vrot.slane %v1083_v25, 4  ;;  %v1118_v58 = vrot.slane %v1085_v31, 4  ;;  %v1580_v55 = vadd.f32 %v1554_v61, %v5374_v35 }
  0x49   : > { %v1574_v51 = vadd.f32 %v1566_v50, %v1548_v39  ;;  %v1578_v54 = vadd.f32 %v1552_v9, %v5374_v35  ;;  %v1131_v1 = vadd.f32 %v1130_v37, %v1087_v2  ;;  %v1576_v63 = vadd.f32 %v1568_v14, %v1550_v46 }
  0x4a   : > { %v1095_v30 = vadd.f32 %v1094_v13, %v1081_v45  ;;  %v1107_v56 = vadd.f32 %v1106_v20, %v1083_v25  ;;  %v1119_v4 = vadd.f32 %v1118_v58, %v1085_v31  ;;  %v1596_v21 = vmul.f32 %v7540_v24, %v7539_v57  ;;  %v7542_v25 = vld [vmem:[#allocation26_spill] sm:$0xff] }
  0x4b   : > { %v1598_v42 = vmul.f32 %v7540_v24, %v7541_v3  ;;  %v1600_v44 = vadd.f32 %v1574_v51, %v5377_v36  ;;  %v1132_v23 = vrot.slane %v1131_v1, 2  ;;  %v1602_v6 = vadd.f32 %v1576_v63, %v5377_v36  ;;  %v7543_v13 = vld [vmem:[#allocation46_spill] sm:$0xff] }
  0x4c   : > { %v1096_v29 = vrot.slane %v1095_v30, 2  ;;  %v1108_v19 = vrot.slane %v1107_v56, 2  ;;  %v1120_v60 = vrot.slane %v1119_v4, 2  ;;  %v1604_v61 = vadd.f32 %v1596_v21, %v1578_v54 }
  0x4d   : > { %v1606_v45 = vadd.f32 %v1598_v42, %v1580_v55  ;;  %v1620_v31 = vmul.f32 %v7542_v25, %v7539_v57  ;;  %v1133_v9 = vadd.f32 %v1132_v23, %v1131_v1  ;;  %v1622_v50 = vmul.f32 %v7542_v25, %v7541_v3 }
  0x4e   : > { %v1097_v2 = vadd.f32 %v1096_v29, %v1095_v30  ;;  %v1109_v39 = vadd.f32 %v1108_v19, %v1107_v56  ;;  %v1121_v46 = vadd.f32 %v1120_v60, %v1119_v4  ;;  %v1624_v20 = vmul.f32 %v7542_v25, %v7543_v13  ;;  %v7544_v4 = vld [vmem:[#allocation27_spill] sm:$0xff] }
  0x4f   : > { %v1626_v58 = vadd.f32 %v1600_v44, %v5482_v5  ;;  %v1628_v37 = vadd.f32 %v1620_v31, %v1602_v6  ;;  %v1134_v55 = vrot.slane %v1133_v9, 1  ;;  %v1630_v30 = vadd.f32 %v1622_v50, %v1604_v61  ;;  %v7545_v60 = vld [vmem:[#allocation51_spill] sm:$0xff]  ;;  %v7546_v61 = vld [vmem:[#allocation62_spill] sm:$0xff] }
  0x50   : > { %v1098_v14 = vrot.slane %v1097_v2, 1  ;;  %v1110_v51 = vrot.slane %v1109_v39, 1  ;;  %v1122_v54 = vrot.slane %v1121_v46, 1  ;;  %v1632_v56 = vadd.f32 %v1624_v20, %v1606_v45 }
  0x51   : > { %v1644_v1 = vmul.f32 %v7544_v4, %v7539_v57  ;;  %v1646_v63 = vmul.f32 %v7544_v4, %v7541_v3  ;;  %v1135_v19 = vadd.f32 %v1134_v55, %v1133_v9  ;;  %v1648_v44 = vmul.f32 %v7544_v4, %v7543_v13  ;;  %v7547_v9 = vld [vmem:[#allocation29_spill] sm:$0xff] }
  0x52   : > { %v1099_v21 = vadd.f32 %v1098_v14, %v1097_v2  ;;  %v1111_v42 = vadd.f32 %v1110_v51, %v1109_v39  ;;  %v1123_v29 = vadd.f32 %v1122_v54, %v1121_v46  ;;  %v1650_v23 = vmul.f32 %v7544_v4, %v7545_v60 }
  0x53   : > { %v1652_v6 = vadd.f32 %v1644_v1, %v1626_v58  ;;  %v1654_v31 = vadd.f32 %v1646_v63, %v1628_v37  ;;  %v1155_v2 = vadd.f32 %v7546_v61, %v1135_v19  ;;  %v1656_v39 = vadd.f32 %v1648_v44, %v1630_v30  ;;  %v7548_v44 = vld [vmem:[#allocation30_spill] sm:$0xff] }
  0x54   : > { %v1149_v45 = vadd.f32 %v7546_v61, %v1099_v21  ;;  %v1151_v50 = vadd.f32 %v7546_v61, %v1111_v42  ;;  %v1153_v20 = vadd.f32 %v7546_v61, %v1123_v29  ;;  %v1658_v46 = vadd.f32 %v1650_v23, %v1632_v56  ;;  %v5829_v56 = vld [vmem:[%s5337_s22 + $0xc8] sm:$0xff]  ;;  %v5834_v61 = vld [vmem:[%s5337_s22 + $0xd8] sm:$0xff] }
  0x55   : > { %v1670_v14 = vmul.f32 %v7547_v9, %v7541_v3  ;;  %v1672_v51 = vmul.f32 %v7547_v9, %v7543_v13  ;;  %v1163_v55 = vmax.f32 %v1155_v2, 0.0  ;;  %v1674_v1 = vmul.f32 %v7547_v9, %v7545_v60 }
  0x56   : > { %v1157_v58 = vmax.f32 %v1149_v45, 0.0  ;;  %v1159_v37 = vmax.f32 %v1151_v50, 0.0  ;;  %v1161_v54 = vmax.f32 %v1153_v20, 0.0  ;;  %v1684_v30 = vadd.f32 %v1658_v46, %v7514_v10 }
  0x57   : > { %v1678_v63 = vadd.f32 %v1670_v14, %v1652_v6  ;;  %v1680_v21 = vadd.f32 %v1672_v51, %v1654_v31  ;;  %v1185_v19 = vrot.slane %v1163_v55, 5  ;;  %v1696_v23 = vmul.f32 %v7548_v44, %v7543_v13  ;;  %v7549_v31 = vld [vmem:[#allocation32_spill] sm:$0xff]  ;;  %v7550_v51 = vld [vmem:[#allocation34_spill] sm:$0xff] }
  0x58   : > { %v1181_v42 = vrot.slane %v1159_v37, 7  ;;  %v1183_v29 = vrot.slane %v1161_v54, 6  ;;  %v1682_v45 = vadd.f32 %v1674_v1, %v1656_v39  ;;  %v1698_v50 = vmul.f32 %v7548_v44, %v7545_v60  ;;  %v5847_v54 = vld [vmem:[%s5337_s22 + $0xe8] sm:$0xff] }
  0x59   : > { %v1710_v6 = vadd.f32 %v1684_v30, %v7518_v59  ;;  %v1727_v20 = vmul.f32 %v7549_v31, %v5829_v56  ;;  %v1704_v46 = vadd.f32 %v1696_v23, %v1678_v63  ;;  %v1729_v14 = vmul.f32 %v7549_v31, %v5834_v61  ;;  %v5858_v23 = vld [vmem:[%s5337_s22 + $0xf8] sm:$0xff] }
  0x5a   : > { %v1182_v2 = vsel %vm1173_vm0, %v1181_v42, %v1157_v58  ;;  %v1752_v37 = vmul.f32 %v7550_v51, %v5829_v56  ;;  %v1706_v55 = vadd.f32 %v1698_v50, %v1680_v21  ;;  %v1708_v1 = vadd.f32 %v1682_v45, %v7518_v59  ;;  %v7551_v21 = vld [vmem:[#allocation40_spill] sm:$0xff] }
  0x5b   : > { %v1184_v39 = vsel %vm1176_vm1, %v1183_v29, %v1182_v2  ;;  %v1754_v30 = vmul.f32 %v7550_v51, %v5834_v61  ;;  %v1731_v58 = vadd.f32 %v1704_v46, %v7521_v41  ;;  %v1737_v63 = vadd.f32 %v1729_v14, %v1710_v6 }
  0x5c   : > { %v1186_v10 = vsel %vm1179_vm2, %v1185_v19, %v1184_v39  ;;  %v1756_v42 = vmul.f32 %v7550_v51, %v5847_v54  ;;  %v1733_v31 = vadd.f32 %v1706_v55, %v7521_v41  ;;  %v1735_v29 = vadd.f32 %v1727_v20, %v1708_v1  ;;  %v7552_v51 = vld [vmem:[#allocation45_spill] sm:$0xff] }
  0x5d   : > { %1190 = vst [vmem:[#allocation3 + $0x8] sm:$0xf] %v1186_v10  ;;  %v1777_v45 = vmul.f32 %v7551_v21, %v5829_v56  ;;  %v1779_v50 = vmul.f32 %v7551_v21, %v5834_v61  ;;  %v1758_v19 = vadd.f32 %v1731_v58, %v7524_v48  ;;  %v1781_v6 = vmul.f32 %v7551_v21, %v5847_v54  ;;  %v1894_v48 = vld [vmem:[%s7294_s2] ss:$4 sm:$0x3] }
  0x5e   : > { %v1764_v2 = vadd.f32 %v1756_v42, %v1737_v63  ;;  %v1783_v46 = vmul.f32 %v7551_v21, %v5858_v23  ;;  %v1760_v14 = vadd.f32 %v1752_v37, %v1733_v31  ;;  %v1762_v10 = vadd.f32 %v1754_v30, %v1735_v29  ;;  %v7553_v63 = vld [vmem:[#allocation50_spill] sm:$0xff] }
  0x5f   : > { %v1804_v20 = vmul.f32 %v7552_v51, %v5834_v61  ;;  %v1806_v39 = vmul.f32 %v7552_v51, %v5847_v54  ;;  %v1785_v55 = vadd.f32 %v1777_v45, %v1758_v19  ;;  %v1808_v58 = vmul.f32 %v7552_v51, %v5858_v23  ;;  %v7555_v51 = vld [vmem:[#allocation4_spill] sm:$0xff] }
  0x60   : > { %v1791_v1 = vadd.f32 %v1783_v46, %v1764_v2  ;;  %v1831_v42 = vmul.f32 %v7553_v63, %v5847_v54  ;;  %v1787_v37 = vadd.f32 %v1779_v50, %v1760_v14  ;;  %v1789_v30 = vadd.f32 %v1781_v6, %v1762_v10  ;;  %v7554_v2 = vld [vmem:[#allocation23_spill] sm:$0xff]  ;;  %v7556_v6 = vld [vmem:[#allocation5_spill] sm:$0xff] }
  0x61   : > { %v1833_v31 = vmul.f32 %v7553_v63, %v5858_v23  ;;  %v1812_v29 = vadd.f32 %v1804_v20, %v1785_v55  ;;  %v5885_v46 = vrot.slane %v1894_v48, %v7554_v2  ;;  %v1966_v59 = vmul.f32 %v7555_v51, %v5365_v32 }
  0x62   : > { %v1818_v41 = vadd.f32 %v1791_v1, %v5654_v15  ;;  %v1814_v45 = vadd.f32 %v1806_v39, %v1787_v37  ;;  %v1816_v19 = vadd.f32 %v1808_v58, %v1789_v30  ;;  %v1968_v50 = vmul.f32 %v7555_v51, %v5368_v33  ;;  %v7557_v58 = vld [vmem:[#allocation7_spill] sm:$0xff] }
  0x63   : > { %v1839_v5 = vadd.f32 %v1831_v42, %v1812_v29  ;;  %v1990_v14 = vmul.f32 %v7556_v6, %v5365_v32  ;;  %v1992_v39 = vmul.f32 %v7556_v6, %v5368_v33  ;;  %v1994_v48 = vmul.f32 %v7556_v6, %v5383_v38 }
  0x64   : > { %v1845_v21 = vadd.f32 %v1818_v41, %v5668_v0  ;;  %v1841_v10 = vadd.f32 %v1833_v31, %v1814_v45  ;;  %v1843_v20 = vadd.f32 %v1816_v19, %v5668_v0  ;;  %v7558_v41 = vld [vmem:[#allocation6_spill] sm:$0xff] }
  0x65   : > { %v1852_v55 = vrot.slane %v1839_v5, 4  ;;  %v1998_v63 = vadd.f32 %v1990_v14, %v7557_v58  ;;  %v2014_v42 = vmul.f32 %v7558_v41, %v5365_v32  ;;  %v2000_v29 = vadd.f32 %v1992_v39, %v1966_v59  ;;  %v7559_v58 = vld [vmem:[#allocation12_spill] sm:$0xff] }
  0x66   : > { %v1888_v1 = vrot.slane %v1845_v21, 4  ;;  %v1864_v37 = vrot.slane %v1841_v10, 4  ;;  %v1876_v30 = vrot.slane %v1843_v20, 4  ;;  %v2002_v51 = vadd.f32 %v1994_v48, %v1968_v50  ;;  %v7560_v39 = vld [vmem:[#allocation8_spill] sm:$0xff] }
  0x67   : > { %v1853_v31 = vadd.f32 %v1852_v55, %v1839_v5  ;;  %v2016_v19 = vmul.f32 %v7558_v41, %v5368_v33  ;;  %v2018_v0 = vmul.f32 %v7558_v41, %v5383_v38  ;;  %v2020_v14 = vmul.f32 %v7558_v41, %v5399_v43 }
  0x68   : > { %v1889_v45 = vadd.f32 %v1888_v1, %v1845_v21  ;;  %v1865_v6 = vadd.f32 %v1864_v37, %v1841_v10  ;;  %v1877_v15 = vadd.f32 %v1876_v30, %v1843_v20  ;;  %v2022_v2 = vadd.f32 %v2014_v42, %v7559_v58  ;;  %v7561_v30 = vld [vmem:[#allocation11_spill] sm:$0xff] }
  0x69   : > { %v1854_v32 = vrot.slane %v1853_v31, 2  ;;  %v2024_v44 = vadd.f32 %v2016_v19, %v1998_v63  ;;  %v2026_v59 = vadd.f32 %v2018_v0, %v2000_v29  ;;  %v2028_v21 = vadd.f32 %v2020_v14, %v2002_v51 }
  0x6a   : > { %v1890_v36 = vrot.slane %v1889_v45, 2  ;;  %v1866_v50 = vrot.slane %v1865_v6, 2  ;;  %v1878_v5 = vrot.slane %v1877_v15, 2  ;;  %v2040_v48 = vmul.f32 %v7560_v39, %v5368_v33 }
  0x6b   : > { %v1855_v55 = vadd.f32 %v1854_v32, %v1853_v31  ;;  %v2042_v10 = vmul.f32 %v7560_v39, %v5383_v38  ;;  %v2044_v20 = vmul.f32 %v7560_v39, %v5399_v43  ;;  %v2054_v63 = vadd.f32 %v2028_v21, %v7561_v30 }
  0x6c   : > { %v1891_v1 = vadd.f32 %v1890_v36, %v1889_v45  ;;  %v1867_v41 = vadd.f32 %v1866_v50, %v1865_v6  ;;  %v1879_v42 = vadd.f32 %v1878_v5, %v1877_v15  ;;  %v2048_v37 = vadd.f32 %v2040_v48, %v2022_v2  ;;  %v7562_v36 = vld [vmem:[#allocation9_spill] sm:$0xff] }
  0x6d   : > { %v1856_v0 = vrot.slane %v1855_v55, 1  ;;  %v2050_v51 = vadd.f32 %v2042_v10, %v2024_v44  ;;  %v2052_v19 = vadd.f32 %v2044_v20, %v2026_v59  ;;  %v2066_v31 = vmul.f32 %v7562_v36, %v5383_v38  ;;  %v7563_v15 = vld [vmem:[#allocation13_spill] sm:$0xff]  ;;  %v7564_v38 = vld [vmem:[#allocation10_spill] sm:$0xff] }
  0x6e   : > { %v1892_v29 = vrot.slane %v1891_v1, 1  ;;  %v1868_v14 = vrot.slane %v1867_v41, 1  ;;  %v1880_v33 = vrot.slane %v1879_v42, 1  ;;  %v2068_v45 = vmul.f32 %v7562_v36, %v5399_v43  ;;  %v7565_v10 = vld [vmem:[#allocation14_spill] sm:$0xff]  ;;  %v7566_v36 = vld [vmem:[#allocation16_spill] sm:$0xff] }
  0x6f   : > { %v1857_v58 = vadd.f32 %v1856_v0, %v1855_v55  ;;  %v2078_v2 = vadd.f32 %v2052_v19, %v7563_v15  ;;  %v2080_v32 = vadd.f32 %v2054_v63, %v7563_v15  ;;  %v2074_v44 = vadd.f32 %v2066_v31, %v2048_v37 }
  0x70   : > { %v1893_v6 = vadd.f32 %v1892_v29, %v1891_v1  ;;  %v1869_v50 = vadd.f32 %v1868_v14, %v1867_v41  ;;  %v1881_v5 = vadd.f32 %v1880_v33, %v1879_v42  ;;  %v2076_v59 = vadd.f32 %v2068_v45, %v2050_v51 }
  0x71   : > { %v1907_v21 = vadd.f32 %v5885_v46, %v1857_v58  ;;  %v2096_v48 = vmul.f32 %v7564_v38, %v5433_v52  ;;  %v2098_v43 = vmul.f32 %v7564_v38, %v7515_v7  ;;  %v2100_v20 = vadd.f32 %v2074_v44, %v7565_v10 }
  0x72   : > { %v1913_v39 = vadd.f32 %v5885_v46, %v1893_v6  ;;  %v1909_v55 = vadd.f32 %v5885_v46, %v1869_v50  ;;  %v1911_v1 = vadd.f32 %v5885_v46, %v1881_v5  ;;  %v2102_v41 = vadd.f32 %v2076_v59, %v7565_v10 }
  0x73   : > { %v1915_v42 = vmax.f32 %v1907_v21, 0.0  ;;  %v2104_v30 = vadd.f32 %v2096_v48, %v2078_v2  ;;  %v2106_v63 = vadd.f32 %v2098_v43, %v2080_v32  ;;  %v2120_v51 = vmul.f32 %v5281_v11, %v5433_v52 }
  0x74   : > { %v1921_v37 = vmax.f32 %v1913_v39, 0.0  ;;  %v1917_v0 = vmax.f32 %v1909_v55, 0.0  ;;  %v1919_v29 = vmax.f32 %v1911_v1, 0.0  ;;  %v2122_v19 = vmul.f32 %v5281_v11, %v7515_v7 }
  0x75   : > { %v1940_v14 = vrot.slane %v1915_v42, 4  ;;  %v2124_v46 = vmul.f32 %v5281_v11, %v7520_v40  ;;  %v2126_v31 = vadd.f32 %v2100_v20, %v7566_v36  ;;  %v2128_v6 = vadd.f32 %v2120_v51, %v2102_v41 }
  0x76   : > { %v1945_v33 = vrot.slane %v1921_v37, 1  ;;  %v1941_v45 = vrot.slane %v1917_v0, 3  ;;  %v1943_v58 = vrot.slane %v1919_v29, 2  ;;  %v2130_v15 = vadd.f32 %v2122_v19, %v2104_v30 }
  0x77   : > { %v2132_v2 = vadd.f32 %v2124_v46, %v2106_v63  ;;  %v2144_v32 = vmul.f32 %v5286_v12, %v5433_v52  ;;  %v2146_v50 = vmul.f32 %v5286_v12, %v7515_v7  ;;  %v2148_v5 = vmul.f32 %v5286_v12, %v7520_v40 }
  0x78   : > { %v1942_v44 = vsel %vm1932_vm3, %v1941_v45, %v1940_v14  ;;  %v2150_v11 = vmul.f32 %v5286_v12, %v7528_v53  ;;  %v2170_v59 = vmul.f32 %v5300_v16, %v7515_v7  ;;  %v2172_v21 = vmul.f32 %v5300_v16, %v7520_v40 }
  0x79   : > { %v1944_v39 = vsel %vm1935_vm4, %v1943_v58, %v1942_v44  ;;  %v2152_v38 = vadd.f32 %v2144_v32, %v2126_v31  ;;  %v2154_v48 = vadd.f32 %v2146_v50, %v2128_v6  ;;  %v2156_v43 = vadd.f32 %v2148_v5, %v2130_v15 }
  0x7a   : > { %v1946_v55 = vsel %vm1938_vm5, %v1945_v33, %v1944_v39  ;;  %v2158_v1 = vadd.f32 %v2150_v11, %v2132_v2  ;;  %v2174_v10 = vmul.f32 %v5300_v16, %v7528_v53  ;;  %v2196_v12 = vmul.f32 %v5305_v17, %v7520_v40 }
  0x7b   : > { %1950 = vst [vmem:[#allocation3 + $0x8] sm:$0xf0] %v1946_v55  ;;  %v2178_v20 = vadd.f32 %v2170_v59, %v2152_v38  ;;  %v2180_v41 = vadd.f32 %v2172_v21, %v2154_v48  ;;  %v2198_v42 = vmul.f32 %v5305_v17, %v7528_v53  ;;  %v2226_v37 = vmul.f32 %v5310_v18, %v7539_v57 }
  0x7c   : > { %v2182_v30 = vadd.f32 %v2174_v10, %v2156_v43  ;;  %v2184_v63 = vadd.f32 %v2158_v1, %v5322_v22  ;;  %v2228_v0 = vmul.f32 %v5310_v18, %v7541_v3  ;;  %v2250_v16 = vmul.f32 %v7519_v8, %v7539_v57 }
  0x7d   : > { %v2204_v29 = vadd.f32 %v2196_v12, %v2178_v20  ;;  %v2206_v51 = vadd.f32 %v2198_v42, %v2180_v41  ;;  %v2252_v19 = vmul.f32 %v7519_v8, %v7541_v3  ;;  %v2254_v17 = vmul.f32 %v7519_v8, %v7543_v13  ;;  %v2654_v42 = vld [vmem:[%s7294_s2] ss:$4 sm:$0x3] }
  0x7e   : > { %v2208_v14 = vadd.f32 %v2182_v30, %v5341_v26  ;;  %v2210_v33 = vadd.f32 %v2184_v63, %v5341_v26  ;;  %v2274_v22 = vmul.f32 %v7527_v47, %v7539_v57  ;;  %v2276_v18 = vmul.f32 %v7527_v47, %v7541_v3  ;;  %v7567_v63 = vld [vmem:[#allocation30_spill] sm:$0xff] }
  0x7f   : > { %v2230_v46 = vadd.f32 %v2204_v29, %v5344_v27  ;;  %v2232_v36 = vadd.f32 %v2206_v51, %v5344_v27  ;;  %v2278_v31 = vmul.f32 %v7527_v47, %v7543_v13  ;;  %v2280_v8 = vmul.f32 %v7527_v47, %v7545_v60 }
  0x80   : > { %v2234_v45 = vadd.f32 %v2226_v37, %v2208_v14  ;;  %v2236_v58 = vadd.f32 %v2228_v0, %v2210_v33  ;;  %v2300_v26 = vmul.f32 %v7535_v62, %v7541_v3  ;;  %v2302_v6 = vmul.f32 %v7535_v62, %v7543_v13 }
  0x81   : > { %v2256_v15 = vadd.f32 %v2230_v46, %v5347_v28  ;;  %v2258_v2 = vadd.f32 %v2250_v16, %v2232_v36  ;;  %v2304_v27 = vmul.f32 %v7535_v62, %v7545_v60  ;;  %v2326_v32 = vmul.f32 %v7538_v49, %v7543_v13  ;;  %v7568_v16 = vld [vmem:[#allocation22_spill] sm:$0xff]  ;;  %v7571_v36 = vld [vmem:[#allocation28_spill] sm:$0xff] }
  0x82   : > { %v2260_v50 = vadd.f32 %v2252_v19, %v2234_v45  ;;  %v2262_v5 = vadd.f32 %v2254_v17, %v2236_v58  ;;  %v2328_v47 = vmul.f32 %v7538_v49, %v7545_v60  ;;  %v2356_v44 = vmul.f32 %v7540_v24, %v5829_v56  ;;  %v7569_v17 = vld [vmem:[#allocation40_spill] sm:$0xff] }
  0x83   : > { %v2282_v11 = vadd.f32 %v2274_v22, %v2256_v15  ;;  %v2284_v59 = vadd.f32 %v2276_v18, %v2258_v2  ;;  %v2358_v28 = vmul.f32 %v7540_v24, %v5834_v61  ;;  %v2380_v21 = vmul.f32 %v7542_v25, %v5829_v56 }
  0x84   : > { %v2286_v62 = vadd.f32 %v2278_v31, %v2260_v50  ;;  %v2288_v39 = vadd.f32 %v2280_v8, %v2262_v5  ;;  %v2382_v13 = vmul.f32 %v7542_v25, %v5834_v61  ;;  %v2384_v38 = vmul.f32 %v7542_v25, %v5847_v54 }
  0x85   : > { %v2308_v49 = vadd.f32 %v2300_v26, %v2282_v11  ;;  %v2310_v60 = vadd.f32 %v2302_v6, %v2284_v59  ;;  %v2404_v48 = vmul.f32 %v7544_v4, %v5829_v56  ;;  %v2406_v43 = vmul.f32 %v7544_v4, %v5834_v61 }
  0x86   : > { %v2312_v24 = vadd.f32 %v2304_v27, %v2286_v62  ;;  %v2314_v55 = vadd.f32 %v2288_v39, %v5371_v34  ;;  %v2408_v1 = vmul.f32 %v7544_v4, %v5847_v54  ;;  %v2410_v10 = vmul.f32 %v7544_v4, %v5858_v23  ;;  %v2715_v34 = vld [vmem:[%s7293_s1 + $0x8] sm:$0xff] }
  0x87   : > { %v2334_v12 = vadd.f32 %v2326_v32, %v2308_v49  ;;  %v2336_v20 = vadd.f32 %v2328_v47, %v2310_v60  ;;  %v2430_v25 = vmul.f32 %v7547_v9, %v5834_v61  ;;  %v2432_v41 = vmul.f32 %v7547_v9, %v5847_v54  ;;  %v5039_v47 = vld [vmem:[%s7293_s1 + $0x28] sm:$0xff] }
  0x88   : > { %v2338_v37 = vadd.f32 %v2312_v24, %v5374_v35  ;;  %v2340_v4 = vadd.f32 %v2314_v55, %v5374_v35  ;;  %v2434_v30 = vmul.f32 %v7547_v9, %v5858_v23  ;;  %v2456_v0 = vmul.f32 %v7567_v63, %v5847_v54  ;;  %v5037_v35 = vld [vmem:[%s7293_s1 + $0x18] sm:$0xff]  ;;  %v7572_v49 = vld [vmem:[#allocation37_spill] sm:$0xff] }
  0x89   : > { %v2360_v29 = vadd.f32 %v2334_v12, %v7568_v16  ;;  %v2362_v51 = vadd.f32 %v2336_v20, %v7568_v16  ;;  %v2458_v19 = vmul.f32 %v7567_v63, %v5858_v23  ;;  %v6034_v14 = vmul.f32 0.0, %v7569_v17  ;;  %v7570_v9 = vld [vmem:[#allocation23_spill] sm:$0xff]  ;;  %v7573_v20 = vld [vmem:[#allocation41_spill] sm:$0xff] }
  0x8a   : > { %v2364_v33 = vadd.f32 %v2356_v44, %v2338_v37  ;;  %v2366_v22 = vadd.f32 %v2358_v28, %v2340_v4  ;;  %v6040_v18 = vrot.slane %v2654_v42, %v7570_v9  ;;  %v2717_v46 = vmul.f32 0.0, %v2715_v34  ;;  %v7574_v37 = vld [vmem:[#allocation42_spill] sm:$0xff] }
  0x8b   : > { %v2386_v31 = vadd.f32 %v2360_v29, %v7571_v36  ;;  %v2388_v8 = vadd.f32 %v2380_v21, %v2362_v51  ;;  %v2721_v45 = vmul.f32 %v2715_v34, %v5433_v52  ;;  %v2723_v58 = vmul.f32 %v2715_v34, %v7515_v7 }
  0x8c   : > { %v2390_v26 = vadd.f32 %v2382_v13, %v2364_v33  ;;  %v2392_v6 = vadd.f32 %v2384_v38, %v2366_v22  ;;  %v2743_v15 = vmul.f32 0.0, %v5037_v35  ;;  %v2745_v2 = vmul.f32 %v5037_v35, %v5433_v52 }
  0x8d   : > { %v2412_v27 = vadd.f32 %v2404_v48, %v2386_v31  ;;  %v2414_v32 = vadd.f32 %v2406_v43, %v2388_v8  ;;  %v2747_v50 = vmul.f32 %v5037_v35, %v7515_v7  ;;  %v2749_v5 = vmul.f32 %v5037_v35, %v7520_v40 }
  0x8e   : > { %v2416_v44 = vadd.f32 %v2408_v1, %v2390_v26  ;;  %v2418_v11 = vadd.f32 %v2410_v10, %v2392_v6  ;;  %v2751_v59 = vadd.f32 %v2743_v15, %v2717_v46  ;;  %v2753_v28 = vadd.f32 %v2745_v2, %v2717_v46  ;;  %v5041_v10 = vld [vmem:[%s7293_s1 + $0x38] sm:$0xff]  ;;  %v5043_v46 = vld [vmem:[%s7293_s1 + $0x48] sm:$0xff] }
  0x8f   : > { %v2438_v21 = vadd.f32 %v2430_v25, %v2412_v27  ;;  %v2440_v62 = vadd.f32 %v2432_v41, %v2414_v32  ;;  %v2755_v39 = vadd.f32 %v2747_v50, %v2721_v45  ;;  %v2757_v13 = vadd.f32 %v2749_v5, %v2723_v58  ;;  %v5182_v27 = vld [vmem:[%s5337_s22 + $0x68] sm:$0xff]  ;;  %v7576_v5 = vld [vmem:[#allocation58_spill] sm:$0xff] }
  0x90   : > { %v2442_v38 = vadd.f32 %v2434_v30, %v2416_v44  ;;  %v2444_v60 = vadd.f32 %v2418_v11, %v7572_v49  ;;  %v2769_v48 = vmul.f32 %v5039_v47, %v5433_v52  ;;  %v2771_v43 = vmul.f32 %v5039_v47, %v7515_v7 }
  0x91   : > { %v2464_v24 = vadd.f32 %v2456_v0, %v2438_v21  ;;  %v2466_v55 = vadd.f32 %v2458_v19, %v2440_v62  ;;  %v2773_v12 = vmul.f32 %v5039_v47, %v7520_v40  ;;  %v2775_v1 = vmul.f32 %v5039_v47, %v7528_v53  ;;  %v7575_v19 = vld [vmem:[#allocation47_spill] sm:$0xff] }
  0x92   : > { %v2468_v25 = vadd.f32 %v2442_v38, %v7573_v20  ;;  %v2470_v41 = vadd.f32 %v2444_v60, %v7573_v20  ;;  %v2777_v42 = vadd.f32 %v2769_v48, %v2751_v59  ;;  %v2779_v34 = vadd.f32 %v2771_v43, %v2753_v28 }
  0x93   : > { %v2491_v52 = vadd.f32 %v2464_v24, %v7574_v37  ;;  %v2493_v4 = vadd.f32 %v2466_v55, %v7574_v37  ;;  %v2781_v30 = vadd.f32 %v2773_v12, %v2755_v39  ;;  %v2783_v63 = vadd.f32 %v2775_v1, %v2757_v13  ;;  %v7577_v13 = vld [vmem:[#allocation61_spill] sm:$0xff] }
  0x94   : > { %v2495_v0 = vadd.f32 %v2468_v25, %v7574_v37  ;;  %v2497_v16 = vadd.f32 %v2470_v41, %v7574_v37  ;;  %v2795_v29 = vmul.f32 %v5041_v10, %v7515_v7  ;;  %v2797_v51 = vmul.f32 %v5041_v10, %v7520_v40  ;;  %v5045_v40 = vld [vmem:[%s7293_s1 + $0x58] sm:$0xff]  ;;  %v5047_v55 = vld [vmem:[%s7293_s1 + $0x68] sm:$0xff] }
  0x95   : > { %v2518_v17 = vadd.f32 %v2491_v52, %v7575_v19  ;;  %v2520_v35 = vadd.f32 %v2493_v4, %v7575_v19  ;;  %v2799_v33 = vmul.f32 %v5041_v10, %v7528_v53  ;;  %v2801_v22 = vmul.f32 0.0, %v5041_v10 }
  0x96   : > { %v2522_v36 = vadd.f32 %v2495_v0, %v7575_v19  ;;  %v2524_v31 = vadd.f32 %v2497_v16, %v7575_v19  ;;  %v2803_v8 = vadd.f32 %v2795_v29, %v2777_v42  ;;  %v2805_v7 = vadd.f32 %v2797_v51, %v2779_v34  ;;  %v5184_v0 = vld [vmem:[%s5337_s22 + $0x98] sm:$0xff]  ;;  %v5185_v29 = vld [vmem:[%s5337_s22 + $0xa8] sm:$0xff] }
  0x97   : > { %v2545_v45 = vadd.f32 %v6034_v14, %v2518_v17  ;;  %v2547_v58 = vadd.f32 %v6034_v14, %v2520_v35  ;;  %v2807_v26 = vadd.f32 %v2799_v33, %v2781_v30  ;;  %v2809_v6 = vadd.f32 %v2801_v22, %v2783_v63  ;;  %v5049_v19 = vld [vmem:[%s7293_s1 + $0x78] sm:$0xff] }
  0x98   : > { %v2549_v15 = vadd.f32 %v6034_v14, %v2522_v36  ;;  %v2551_v2 = vadd.f32 %v6034_v14, %v2524_v31  ;;  %v2821_v32 = vmul.f32 %v5182_v27, %v5043_v46  ;;  %v2823_v50 = vmul.f32 %v5043_v46, %v7528_v53 }
  0x99   : > { %v2572_v47 = vadd.f32 %v2545_v45, %v7576_v5  ;;  %v2574_v44 = vadd.f32 %v2547_v58, %v7576_v5  ;;  %v2825_v11 = vmul.f32 0.0, %v5043_v46  ;;  %v2847_v59 = vmul.f32 0.0, %v5045_v40 }
  0x9a   : > { %v2576_v28 = vadd.f32 %v2549_v15, %v7576_v5  ;;  %v2578_v21 = vadd.f32 %v2551_v2, %v7576_v5  ;;  %v2829_v62 = vadd.f32 %v2821_v32, %v2803_v8  ;;  %v2831_v39 = vadd.f32 %v2823_v50, %v2805_v7  ;;  %v5186_v2 = vld [vmem:[%s5337_s22 + $0xb8] sm:$0xff]  ;;  %v5051_v32 = vld [vmem:[%s7293_s1 + $0x88] sm:$0xff] }
  0x9b   : > { %v2599_v38 = vadd.f32 %v2572_v47, %v7577_v13  ;;  %v2601_v14 = vadd.f32 %v2574_v44, %v7577_v13  ;;  %v2833_v49 = vadd.f32 %v2825_v11, %v2807_v26  ;;  %v2835_v60 = vadd.f32 %v2825_v11, %v2809_v6 }
  0x9c   : > { %v2603_v53 = vadd.f32 %v2576_v28, %v7577_v13  ;;  %v2605_v48 = vadd.f32 %v2578_v21, %v7577_v13  ;;  %v2851_v43 = vmul.f32 %v5045_v40, %v7539_v57  ;;  %v2853_v24 = vmul.f32 %v5045_v40, %v7541_v3  ;;  %v5183_v57 = vld [vmem:[%s5337_s22 + $0x88] sm:$0xff] }
  0x9d   : > { %v2612_v12 = vrot.slane %v2599_v38, 4  ;;  %v2624_v1 = vrot.slane %v2601_v14, 4  ;;  %v2855_v10 = vadd.f32 %v2847_v59, %v2829_v62  ;;  %v2857_v20 = vadd.f32 %v2847_v59, %v2831_v39 }
  0x9e   : > { %v2636_v25 = vrot.slane %v2603_v53, 4  ;;  %v2648_v41 = vrot.slane %v2605_v48, 4  ;;  %v2859_v42 = vadd.f32 %v2851_v43, %v2833_v49  ;;  %v2861_v34 = vadd.f32 %v2853_v24, %v2835_v60 }
  0x9f   : > { %v2613_v37 = vadd.f32 %v2612_v12, %v2599_v38  ;;  %v2625_v52 = vadd.f32 %v2624_v1, %v2601_v14  ;;  %v2873_v4 = vmul.f32 0.0, %v5047_v55  ;;  %v2875_v30 = vmul.f32 %v5183_v57, %v5047_v55  ;;  %v5055_v1 = vld [vmem:[%s7293_s1 + $0xa8] sm:$0xff] }
  0xa0   : > { %v2637_v3 = vadd.f32 %v2636_v25, %v2603_v53  ;;  %v2649_v63 = vadd.f32 %v2648_v41, %v2605_v48  ;;  %v2877_v16 = vmul.f32 %v5184_v0, %v5047_v55  ;;  %v2879_v51 = vmul.f32 %v5185_v29, %v5047_v55  ;;  %v5053_v48 = vld [vmem:[%s7293_s1 + $0x98] sm:$0xff] }
  0xa1   : > { %v2614_v17 = vrot.slane %v2613_v37, 2  ;;  %v2626_v35 = vrot.slane %v2625_v52, 2  ;;  %v2881_v33 = vadd.f32 %v2873_v4, %v2855_v10  ;;  %v2883_v22 = vadd.f32 %v2875_v30, %v2857_v20 }
  0xa2   : > { %v2638_v46 = vrot.slane %v2637_v3, 2  ;;  %v2650_v36 = vrot.slane %v2649_v63, 2  ;;  %v2885_v31 = vadd.f32 %v2877_v16, %v2859_v42  ;;  %v2887_v8 = vadd.f32 %v2879_v51, %v2861_v34 }
  0xa3   : > { %v2615_v7 = vadd.f32 %v2614_v17, %v2613_v37  ;;  %v2627_v40 = vadd.f32 %v2626_v35, %v2625_v52  ;;  %v2899_v45 = vmul.f32 %v5183_v57, %v5049_v19  ;;  %v2901_v58 = vmul.f32 %v5184_v0, %v5049_v19 }
  0xa4   : > { %v2639_v26 = vadd.f32 %v2638_v46, %v2637_v3  ;;  %v2651_v6 = vadd.f32 %v2650_v36, %v2649_v63  ;;  %v2903_v15 = vmul.f32 %v5185_v29, %v5049_v19  ;;  %v2905_v27 = vmul.f32 %v5186_v2, %v5049_v19  ;;  %v5057_v19 = vld [vmem:[%s7293_s1 + $0xb8] sm:$0xff] }
  0xa5   : > { %v2616_v50 = vrot.slane %v2615_v7, 1  ;;  %v2628_v5 = vrot.slane %v2627_v40, 1  ;;  %v2907_v47 = vadd.f32 %v2899_v45, %v2881_v33  ;;  %v2909_v44 = vadd.f32 %v2901_v58, %v2883_v22 }
  0xa6   : > { %v2640_v11 = vrot.slane %v2639_v26, 1  ;;  %v2652_v59 = vrot.slane %v2651_v6, 1  ;;  %v2911_v28 = vadd.f32 %v2903_v15, %v2885_v31  ;;  %v2913_v21 = vadd.f32 %v2905_v27, %v2887_v8  ;;  %v5059_v31 = vld [vmem:[%s7293_s1 + $0xc8] sm:$0xff] }
  0xa7   : > { %v2617_v62 = vadd.f32 %v2616_v50, %v2615_v7  ;;  %v2629_v39 = vadd.f32 %v2628_v5, %v2627_v40  ;;  %v2925_v13 = vmul.f32 %v5184_v0, %v5051_v32  ;;  %v2927_v38 = vmul.f32 %v5185_v29, %v5051_v32 }
  0xa8   : > { %v2641_v14 = vadd.f32 %v2640_v11, %v2639_v26  ;;  %v2653_v49 = vadd.f32 %v2652_v59, %v2651_v6  ;;  %v2929_v60 = vmul.f32 %v5186_v2, %v5051_v32  ;;  %v2931_v53 = vmul.f32 0.0, %v5051_v32 }
  0xa9   : > { %v2667_v43 = vadd.f32 %v6040_v18, %v2617_v62  ;;  %v2669_v24 = vadd.f32 %v6040_v18, %v2629_v39  ;;  %v2933_v55 = vadd.f32 %v2925_v13, %v2907_v47  ;;  %v2935_v12 = vadd.f32 %v2927_v38, %v2909_v44 }
  0xaa   : > { %v2671_v10 = vadd.f32 %v6040_v18, %v2641_v14  ;;  %v2673_v20 = vadd.f32 %v6040_v18, %v2653_v49  ;;  %v2937_v25 = vadd.f32 %v2929_v60, %v2911_v28  ;;  %v2939_v41 = vadd.f32 %v2931_v53, %v2913_v21  ;;  %v5063_v28 = vld [vmem:[%s7293_s1 + $0xe8] sm:$0xff] }
  0xab   : > { %v2675_v42 = vmax.f32 %v2667_v43, 0.0  ;;  %v2677_v34 = vmax.f32 %v2669_v24, 0.0  ;;  %v2951_v37 = vmul.f32 %v5185_v29, %v5053_v48  ;;  %v2953_v52 = vmul.f32 %v5186_v2, %v5053_v48  ;;  %v5061_v2 = vld [vmem:[%s7293_s1 + $0xd8] sm:$0xff]  ;;  %v5067_v53 = vld [vmem:[%s7293_s1 + $0x108] sm:$0xff] }
  0xac   : > { %v2679_v4 = vmax.f32 %v2671_v10, 0.0  ;;  %v2681_v57 = vmax.f32 %v2673_v20, 0.0  ;;  %v2955_v30 = vmul.f32 0.0, %v5053_v48  ;;  %v2977_v3 = vmul.f32 0.0, %v5055_v1  ;;  %v5069_v48 = vld [vmem:[%s7293_s1 + $0x118] sm:$0xff] }
  0xad   : > { %v2696_v63 = vrot.slane %v2677_v34, 7  ;;  %v2959_v0 = vadd.f32 %v2951_v37, %v2933_v55  ;;  %v2961_v16 = vadd.f32 %v2953_v52, %v2935_v12  ;;  %v2981_v51 = vmul.f32 %v5055_v1, %v5829_v56  ;;  %v5071_v12 = vld [vmem:[%s7293_s1 + $0x128] sm:$0xff] }
  0xae   : > { %v2698_v18 = vrot.slane %v2679_v4, 6  ;;  %v2700_v17 = vrot.slane %v2681_v57, 5  ;;  %v2963_v35 = vadd.f32 %v2955_v30, %v2937_v25  ;;  %v2965_v33 = vadd.f32 %v2955_v30, %v2939_v41  ;;  %v5079_v4 = vld [vmem:[%s7293_s1 + $0x168] sm:$0xff]  ;;  %v5081_v57 = vld [vmem:[%s7293_s1 + $0x178] sm:$0xff] }
  0xaf   : > { %v2697_v29 = vsel %vm1173_vm0, %v2696_v63, %v2675_v42  ;;  %v2983_v22 = vmul.f32 %v5055_v1, %v5834_v61  ;;  %v2985_v46 = vadd.f32 %v2977_v3, %v2959_v0  ;;  %v2987_v36 = vadd.f32 %v2977_v3, %v2961_v16  ;;  %v5073_v1 = vld [vmem:[%s7293_s1 + $0x138] sm:$0xff]  ;;  %v5075_v42 = vld [vmem:[%s7293_s1 + $0x148] sm:$0xff] }
  0xb0   : > { %v2699_v8 = vsel %vm1176_vm1, %v2698_v18, %v2697_v29  ;;  %v2989_v7 = vadd.f32 %v2981_v51, %v2963_v35  ;;  %v3003_v40 = vmul.f32 0.0, %v5057_v19  ;;  %v3005_v45 = vmul.f32 %v5057_v19, %v5829_v56  ;;  %v5083_v16 = vld [vmem:[%s7293_s1 + $0x188] sm:$0xff]  ;;  %v3409_v51 = vld [vmem:[%s7294_s2] ss:$4 sm:$0x3]  ;;  %v6189_v29 = vld [vmem:[%s7293_s1 + $0x10] sm:$0xff] }
  0xb1   : > { %v2701_v58 = vsel %vm1179_vm2, %v2700_v17, %v2699_v8  ;;  %v2991_v26 = vadd.f32 %v2983_v22, %v2965_v33  ;;  %v3007_v6 = vmul.f32 %v5057_v19, %v5834_v61  ;;  %v3009_v15 = vmul.f32 %v5057_v19, %v5847_v54  ;;  %v6184_v33 = vld [vmem:[%s7293_s1] sm:$0xff]  ;;  %7579 = vst [vmem:[#allocation24_spill] sm:$0xff] %v6189_v29 }
  0xb2   : > { %2705 = vst [vmem:[#allocation3 + $0x18] sm:$0xf] %v2701_v58  ;;  %v3011_v27 = vadd.f32 %v3003_v40, %v2985_v46  ;;  %v3013_v32 = vadd.f32 %v3005_v45, %v2987_v36  ;;  %v3029_v50 = vmul.f32 %v5059_v31, %v5829_v56  ;;  %v3031_v5 = vmul.f32 %v5059_v31, %v5834_v61  ;;  %v5065_v56 = vld [vmem:[%s7293_s1 + $0xf8] sm:$0xff]  ;;  %v6198_v8 = vld [vmem:[%s7293_s1 + $0x20] sm:$0xff] }
  0xb3   : > { %v3015_v47 = vadd.f32 %v3007_v6, %v2989_v7  ;;  %v3017_v44 = vadd.f32 %v3009_v15, %v2991_v26  ;;  %v3033_v11 = vmul.f32 %v5059_v31, %v5847_v54  ;;  %v3035_v59 = vmul.f32 %v5059_v31, %v5858_v23  ;;  %7578 = vst [vmem:[#allocation33_spill] sm:$0xff] %v6184_v33  ;;  %v6203_v7 = vld [vmem:[%s7293_s1 + $0x30] sm:$0xff]  ;;  %v6213_v6 = vld [vmem:[%s7293_s1 + $0x40] sm:$0xff] }
  0xb4   : > { %v3037_v21 = vadd.f32 %v3029_v50, %v3011_v27  ;;  %v3039_v62 = vadd.f32 %v3031_v5, %v3013_v32  ;;  %v3055_v39 = vmul.f32 %v5061_v2, %v5834_v61  ;;  %v3057_v13 = vmul.f32 %v5061_v2, %v5847_v54  ;;  %7580 = vst [vmem:[#allocation38_spill] sm:$0xff] %v6198_v8  ;;  %v6222_v50 = vld [vmem:[%s7293_s1 + $0x50] sm:$0xff] }
  0xb5   : > { %v3041_v38 = vadd.f32 %v3033_v11, %v3015_v47  ;;  %v3043_v14 = vadd.f32 %v3035_v59, %v3017_v44  ;;  %v3059_v49 = vmul.f32 %v5061_v2, %v5858_v23  ;;  %v3061_v60 = vmul.f32 0.0, %v5061_v2  ;;  %7581 = vst [vmem:[#allocation39_spill] sm:$0xff] %v6203_v7  ;;  %7582 = vst [vmem:[#allocation17_spill] sm:$0xff] %v6213_v6  ;;  %v6236_v59 = vld [vmem:[%s7293_s1 + $0x70] sm:$0xff] }
  0xb6   : > { %v3063_v61 = vadd.f32 %v3055_v39, %v3037_v21  ;;  %v3065_v43 = vadd.f32 %v3057_v13, %v3039_v62  ;;  %v3081_v24 = vmul.f32 %v5063_v28, %v5847_v54  ;;  %v3083_v55 = vmul.f32 %v5063_v28, %v5858_v23  ;;  %v5077_v54 = vld [vmem:[%s7293_s1 + $0x158] sm:$0xff]  ;;  %7584 = vst [vmem:[#allocation43_spill] sm:$0xff] %v6222_v50  ;;  %v6247_v13 = vld [vmem:[%s7293_s1 + $0x80] sm:$0xff] }
  0xb7   : > { %v3067_v10 = vadd.f32 %v3059_v49, %v3041_v38  ;;  %v3069_v20 = vadd.f32 %v3061_v60, %v3043_v14  ;;  %v3085_v25 = vmul.f32 0.0, %v5063_v28  ;;  %v3107_v41 = vmul.f32 0.0, %v5065_v56  ;;  %7587 = vst [vmem:[#allocation49_spill] sm:$0xff] %v6236_v59  ;;  %7590 = vst [vmem:[#allocation52_spill] sm:$0xff] %v6247_v13  ;;  %v6252_v56 = vld [vmem:[%s7293_s1 + $0x90] sm:$0xff] }
  0xb8   : > { %v3089_v23 = vadd.f32 %v3081_v24, %v3063_v61  ;;  %v3091_v34 = vadd.f32 %v3083_v55, %v3065_v43  ;;  %v3133_v37 = vmul.f32 0.0, %v5067_v53  ;;  %v3159_v52 = vmul.f32 0.0, %v5069_v48  ;;  %7591 = vst [vmem:[#allocation53_spill] sm:$0xff] %v6252_v56  ;;  %v6263_v53 = vld [vmem:[%s7293_s1 + $0xa0] sm:$0xff] }
  0xb9   : > { %v3093_v30 = vadd.f32 %v3085_v25, %v3067_v10  ;;  %v3095_v3 = vadd.f32 %v3085_v25, %v3069_v20  ;;  %v3185_v63 = vmul.f32 0.0, %v5071_v12  ;;  %v3211_v0 = vmul.f32 0.0, %v5073_v1  ;;  %7594 = vst [vmem:[#allocation56_spill] sm:$0xff] %v6263_v53  ;;  %v6276_v20 = vld [vmem:[%s7293_s1 + $0xb0] sm:$0xff] }
  0xba   : > { %v3115_v19 = vadd.f32 %v3107_v41, %v3089_v23  ;;  %v3117_v18 = vadd.f32 %v3107_v41, %v3091_v34  ;;  %v3238_v17 = vmul.f32 0.0, %v5075_v42  ;;  %v6179_v35 = vmul.f32 0.0, %v5077_v54  ;;  %7597 = vst [vmem:[#allocation59_spill] sm:$0xff] %v6276_v20  ;;  %v6279_v42 = vld [vmem:[%s5337_s22] sm:$0xff]  ;;  %v6282_v54 = vld [vmem:[%s5337_s22 + $0x10] sm:$0xff] }
  0xbb   : > { %v3119_v22 = vadd.f32 %v3107_v41, %v3093_v30  ;;  %v3121_v46 = vadd.f32 %v3107_v41, %v3095_v3  ;;  %v6191_v36 = vmul.f32 0.0, %v5079_v4  ;;  %v6193_v31 = vmul.f32 0.0, %v5081_v57 }
  0xbc   : > { %v3141_v40 = vadd.f32 %v3133_v37, %v3115_v19  ;;  %v3143_v45 = vadd.f32 %v3133_v37, %v3117_v18  ;;  %v6205_v58 = vmul.f32 0.0, %v5083_v16  ;;  %v6208_v26 = vrot.slane %v3409_v51, %v7570_v9  ;;  %v6227_v9 = vld [vmem:[%s7293_s1 + $0x60] sm:$0xff] }
  0xbd   : > { %v3145_v15 = vadd.f32 %v3133_v37, %v3119_v22  ;;  %v3147_v2 = vadd.f32 %v3133_v37, %v3121_v46  ;;  %v6216_v27 = vmul.f32 0.0, %v6184_v33  ;;  %v429_v32 = vmul.f32 0.0, %v6189_v29  ;;  %7585 = vst [vmem:[#allocation44_spill] sm:$0xff] %v6227_v9  ;;  %v6303_v16 = vld [vmem:[%s7293_s1 + $0xc0] sm:$0xff] }
  0xbe   : > { %v3167_v5 = vadd.f32 %v3159_v52, %v3141_v40  ;;  %v3169_v47 = vadd.f32 %v3159_v52, %v3143_v45  ;;  %v457_v44 = vmul.f32 0.0, %v6198_v8  ;;  %v6231_v11 = vmul.f32 0.0, %v6203_v7  ;;  %7600 = vst [vmem:[#allocation35_spill] sm:$0xff] %v6303_v16  ;;  %v6308_v18 = vld [vmem:[%s5337_s22 + $0x20] sm:$0xff] }
  0xbf   : > { %7583 = vst [vmem:[#allocation25_spill] sm:$0xff] %v6216_v27  ;;  %v3171_v28 = vadd.f32 %v3159_v52, %v3145_v15  ;;  %v3173_v21 = vadd.f32 %v3159_v52, %v3147_v2  ;;  %v6239_v62 = vadd.f32 %v429_v32, %v6216_v27  ;;  %v6242_v39 = vmul.f32 0.0, %v6213_v6 }
  0xc0   : > { %7586 = vst [vmem:[#allocation48_spill] sm:$0xff] %v6231_v11  ;;  %v3193_v38 = vadd.f32 %v3185_v63, %v3167_v5  ;;  %v3195_v14 = vadd.f32 %v3185_v63, %v3169_v47  ;;  %v6255_v49 = vmul.f32 0.0, %v6222_v50  ;;  %v6258_v60 = vmul.f32 0.0, %v6227_v9 }
  0xc1   : > { %7588 = vst [vmem:[#allocation18_spill] sm:$0xff] %v6239_v62  ;;  %7589 = vst [vmem:[#allocation31_spill] sm:$0xff] %v6242_v39  ;;  %v3197_v48 = vadd.f32 %v3185_v63, %v3171_v28  ;;  %v3199_v61 = vadd.f32 %v3185_v63, %v3173_v21  ;;  %v465_v43 = vadd.f32 %v457_v44, %v6239_v62  ;;  %v597_v24 = vmul.f32 0.0, %v6236_v59  ;;  %v6336_v21 = vld [vmem:[%s5337_s22 + $0x30] sm:$0xff] }
  0xc2   : > { %7592 = vst [vmem:[#allocation54_spill] sm:$0xff] %v6255_v49  ;;  %7593 = vst [vmem:[#allocation55_spill] sm:$0xff] %v6258_v60  ;;  %v3219_v55 = vadd.f32 %v3211_v0, %v3193_v38  ;;  %v3221_v12 = vadd.f32 %v3211_v0, %v3195_v14  ;;  %v6268_v1 = vmul.f32 0.0, %v6247_v13  ;;  %v6271_v10 = vmul.f32 0.0, %v6252_v56 }
  0xc3   : > { %v3223_v25 = vadd.f32 %v3211_v0, %v3197_v48  ;;  %v3225_v41 = vadd.f32 %v3211_v0, %v3199_v61  ;;  %v493_v23 = vadd.f32 %v6231_v11, %v465_v43  ;;  %v6286_v34 = vmul.f32 0.0, %v6263_v53 }
  0xc4   : > { %7595 = vst [vmem:[#allocation57_spill] sm:$0xff] %v6268_v1  ;;  %7596 = vst [vmem:[#allocation19_spill] sm:$0xff] %v6271_v10  ;;  %v3246_v37 = vadd.f32 %v3238_v17, %v3219_v55  ;;  %v3248_v52 = vadd.f32 %v3238_v17, %v3221_v12  ;;  %v685_v4 = vmul.f32 %v6263_v53, %v6279_v42  ;;  %v6298_v0 = vmul.f32 0.0, %v6276_v20 }
  0xc5   : > { %7598 = vst [vmem:[#allocation60_spill] sm:$0xff] %v6286_v34  ;;  %v6292_v57 = vmul.f32 %v6263_v53, %v6282_v54  ;;  %v3250_v30 = vadd.f32 %v3238_v17, %v3223_v25  ;;  %v3252_v3 = vadd.f32 %v3238_v17, %v3225_v41  ;;  %v6295_v63 = vadd.f32 %v6242_v39, %v493_v23  ;;  %v6358_v23 = vld [vmem:[%s7293_s1 + $0xe0] sm:$0xff] }
  0xc6   : > { %7599 = vst [vmem:[#allocation20_spill] sm:$0xff] %v6298_v0  ;;  %v3273_v51 = vadd.f32 %v6179_v35, %v3246_v37  ;;  %v3275_v19 = vadd.f32 %v6179_v35, %v3248_v52  ;;  %v711_v17 = vmul.f32 %v6276_v20, %v6279_v42  ;;  %v713_v22 = vmul.f32 %v6276_v20, %v6282_v54 }
  0xc7   : > { %v3277_v46 = vadd.f32 %v6179_v35, %v3250_v30  ;;  %v3279_v40 = vadd.f32 %v6179_v35, %v3252_v3  ;;  %v6318_v45 = vadd.f32 %v6255_v49, %v6295_v63  ;;  %v715_v15 = vmul.f32 %v6276_v20, %v6308_v18  ;;  %v6331_v35 = vld [vmem:[%s7293_s1 + $0xd0] sm:$0xff]  ;;  %7602 = vst [vmem:[#allocation36_spill] sm:$0xff] %v6358_v23 }
  0xc8   : > { %v3300_v2 = vadd.f32 %v6191_v36, %v3273_v51  ;;  %v3302_v32 = vadd.f32 %v6191_v36, %v3275_v19  ;;  %v736_v5 = vmul.f32 %v6303_v16, %v6279_v42  ;;  %v738_v47 = vmul.f32 %v6303_v16, %v6282_v54  ;;  %7601 = vst [vmem:[#allocation21_spill] sm:$0xff] %v6331_v35 }
  0xc9   : > { %v3304_v44 = vadd.f32 %v6191_v36, %v3277_v46  ;;  %v3306_v28 = vadd.f32 %v6191_v36, %v3279_v40  ;;  %v6340_v38 = vadd.f32 %v6258_v60, %v6318_v45  ;;  %v740_v14 = vmul.f32 %v6303_v16, %v6308_v18 }
  0xca   : > { %v3327_v48 = vadd.f32 %v6193_v31, %v3300_v2  ;;  %v3329_v61 = vadd.f32 %v6193_v31, %v3302_v32  ;;  %v742_v43 = vmul.f32 %v6303_v16, %v6336_v21  ;;  %v764_v55 = vmul.f32 %v6331_v35, %v6282_v54 }
  0xcb   : > { %v3331_v36 = vadd.f32 %v6193_v31, %v3304_v44  ;;  %v3333_v12 = vadd.f32 %v6193_v31, %v3306_v28  ;;  %v605_v25 = vadd.f32 %v597_v24, %v6340_v38  ;;  %v766_v41 = vmul.f32 %v6331_v35, %v6308_v18  ;;  %v6370_v24 = vld [vmem:[%s7293_s1 + $0xf0] sm:$0xff] }
  0xcc   : > { %v3354_v37 = vadd.f32 %v6205_v58, %v3327_v48  ;;  %v3356_v52 = vadd.f32 %v6205_v58, %v3329_v61  ;;  %v768_v30 = vmul.f32 %v6331_v35, %v6336_v21  ;;  %v6365_v31 = vmul.f32 0.0, %v6331_v35  ;;  %7603 = vst [vmem:[#allocation26_spill] sm:$0xff] %v6370_v24  ;;  %v6383_v61 = vld [vmem:[%s5337_s22 + $0x40] sm:$0xff] }
  0xcd   : > { %v3358_v3 = vadd.f32 %v6205_v58, %v3331_v36  ;;  %v3360_v51 = vadd.f32 %v6205_v58, %v3333_v12  ;;  %v633_v19 = vadd.f32 %v6268_v1, %v605_v25  ;;  %v792_v46 = vmul.f32 %v6358_v23, %v6308_v18  ;;  %v6386_v36 = vld [vmem:[%s5337_s22 + $0x50] sm:$0xff]  ;;  %v6395_v25 = vld [vmem:[%s7293_s1 + $0x100] sm:$0xff] }
  0xce   : > { %v3367_v40 = vrot.slane %v3354_v37, 4  ;;  %v3379_v2 = vrot.slane %v3356_v52, 4  ;;  %v794_v32 = vmul.f32 %v6358_v23, %v6336_v21  ;;  %v6380_v44 = vmul.f32 0.0, %v6358_v23 }
  0xcf   : > { %v3391_v28 = vrot.slane %v3358_v3, 4  ;;  %v3403_v48 = vrot.slane %v3360_v51, 4  ;;  %v661_v58 = vadd.f32 %v6271_v10, %v633_v19  ;;  %v6390_v12 = vmul.f32 0.0, %v6370_v24 }
  0xd0   : > { %7604 = vst [vmem:[#allocation46_spill] sm:$0xff] %v6380_v44  ;;  %v3368_v60 = vadd.f32 %v3367_v40, %v3354_v37  ;;  %v3380_v49 = vadd.f32 %v3379_v2, %v3356_v52  ;;  %v824_v39 = vmul.f32 %v6370_v24, %v6383_v61  ;;  %v826_v6 = vmul.f32 %v6370_v24, %v6386_v36 }
  0xd1   : > { %7605 = vst [vmem:[#allocation27_spill] sm:$0xff] %v6390_v12  ;;  %v3392_v11 = vadd.f32 %v3391_v28, %v3358_v3  ;;  %v3404_v7 = vadd.f32 %v3403_v48, %v3360_v51  ;;  %v689_v19 = vadd.f32 %v6286_v34, %v661_v58  ;;  %v693_v62 = vadd.f32 %v685_v4, %v661_v58 }
  0xd2   : > { %v3369_v8 = vrot.slane %v3368_v60, 2  ;;  %v3381_v27 = vrot.slane %v3380_v49, 2  ;;  %v695_v29 = vadd.f32 %v6292_v57, %v661_v58  ;;  %v6404_v33 = vmul.f32 0.0, %v6395_v25 }
  0xd3   : > { %v3393_v37 = vrot.slane %v3392_v11, 2  ;;  %v3405_v52 = vrot.slane %v3404_v7, 2  ;;  %v717_v40 = vadd.f32 %v6298_v0, %v689_v19  ;;  %v719_v2 = vadd.f32 %v711_v17, %v689_v19 }
  0xd4   : > { %7606 = vst [vmem:[#allocation51_spill] sm:$0xff] %v6404_v33  ;;  %v3370_v23 = vadd.f32 %v3369_v8, %v3368_v60  ;;  %v3382_v35 = vadd.f32 %v3381_v27, %v3380_v49  ;;  %v721_v24 = vadd.f32 %v713_v22, %v693_v62  ;;  %v723_v3 = vadd.f32 %v715_v15, %v695_v29 }
  0xd5   : > { %v3394_v51 = vadd.f32 %v3393_v37, %v3392_v11  ;;  %v3406_v28 = vadd.f32 %v3405_v52, %v3404_v7  ;;  %v744_v48 = vadd.f32 %v736_v5, %v717_v40  ;;  %v746_v4 = vadd.f32 %v738_v47, %v719_v2 }
  0xd6   : > { %v3371_v16 = vrot.slane %v3370_v23, 1  ;;  %v3383_v20 = vrot.slane %v3382_v35, 1  ;;  %v748_v34 = vadd.f32 %v740_v14, %v721_v24  ;;  %v750_v57 = vadd.f32 %v742_v43, %v723_v3 }
  0xd7   : > { %v3395_v58 = vrot.slane %v3394_v51, 1  ;;  %v3407_v53 = vrot.slane %v3406_v28, 1  ;;  %v772_v10 = vadd.f32 %v764_v55, %v744_v48  ;;  %v774_v56 = vadd.f32 %v766_v41, %v746_v4 }
  0xd8   : > { %v3372_v1 = vadd.f32 %v3371_v16, %v3370_v23  ;;  %v3384_v13 = vadd.f32 %v3383_v20, %v3382_v35  ;;  %v776_v0 = vadd.f32 %v768_v30, %v748_v34  ;;  %v778_v8 = vadd.f32 %v6365_v31, %v750_v57  ;;  %v6434_v30 = vld [vmem:[%s7293_s1 + $0x120] sm:$0xff] }
  0xd9   : > { %v3396_v27 = vadd.f32 %v3395_v58, %v3394_v51  ;;  %v3408_v62 = vadd.f32 %v3407_v53, %v3406_v28  ;;  %v800_v29 = vadd.f32 %v792_v46, %v772_v10  ;;  %v802_v7 = vadd.f32 %v794_v32, %v774_v56  ;;  %7608 = vst [vmem:[#allocation29_spill] sm:$0xff] %v6434_v30  ;;  %v6438_v46 = vld [vmem:[%s5337_s22 + $0x70] sm:$0xff]  ;;  %v6462_v58 = vld [vmem:[%s7293_s1 + $0x140] sm:$0xff] }
  0xda   : > { %v3422_v11 = vadd.f32 %v6208_v26, %v3372_v1  ;;  %v3424_v49 = vadd.f32 %v6208_v26, %v3384_v13  ;;  %v804_v60 = vadd.f32 %v6380_v44, %v776_v0  ;;  %v806_v17 = vadd.f32 %v6380_v44, %v778_v8  ;;  %v6417_v13 = vld [vmem:[%s5337_s22 + $0x60] sm:$0xff]  ;;  %v6454_v51 = vld [vmem:[%s7293_s1 + $0x130] sm:$0xff] }
  0xdb   : > { %v3426_v22 = vadd.f32 %v6208_v26, %v3396_v27  ;;  %v3428_v20 = vadd.f32 %v6208_v26, %v3408_v62  ;;  %v828_v34 = vadd.f32 %v6390_v12, %v800_v29  ;;  %v830_v16 = vadd.f32 %v6390_v12, %v802_v7  ;;  %v6426_v26 = vld [vmem:[%s7293_s1 + $0x110] sm:$0xff]  ;;  %7609 = vst [vmem:[#allocation32_spill] sm:$0xff] %v6454_v51 }
  0xdc   : > { %v3430_v53 = vmax.f32 %v3422_v11, 0.0  ;;  %v3432_v10 = vmax.f32 %v3424_v49, 0.0  ;;  %v832_v15 = vadd.f32 %v824_v39, %v804_v60  ;;  %v834_v56 = vadd.f32 %v826_v6, %v806_v17  ;;  %7607 = vst [vmem:[#allocation62_spill] sm:$0xff] %v6426_v26  ;;  %v6476_v17 = vld [vmem:[%s7293_s1 + $0x150] sm:$0xff] }
  0xdd   : > { %v3434_v5 = vmax.f32 %v3426_v22, 0.0  ;;  %v3436_v1 = vmax.f32 %v3428_v20, 0.0  ;;  %v850_v0 = vmul.f32 %v6395_v25, %v6383_v61  ;;  %v852_v47 = vmul.f32 %v6395_v25, %v6386_v36  ;;  %v6479_v22 = vld [vmem:[%s5337_s22 + $0x80] sm:$0xff]  ;;  %v6482_v20 = vld [vmem:[%s5337_s22 + $0x90] sm:$0xff] }
  0xde   : > { %v3452_v35 = vrot.slane %v3430_v53, 4  ;;  %v3453_v14 = vrot.slane %v3432_v10, 3  ;;  %v854_v6 = vmul.f32 %v6395_v25, %v6417_v13  ;;  %v856_v39 = vadd.f32 %v6404_v33, %v828_v34 }
  0xdf   : > { %v3455_v43 = vrot.slane %v3434_v5, 2  ;;  %v3457_v55 = vrot.slane %v3436_v1, 1  ;;  %v858_v41 = vadd.f32 %v850_v0, %v830_v16  ;;  %v860_v23 = vadd.f32 %v852_v47, %v832_v15  ;;  %v6498_v0 = vld [vmem:[%s7293_s1 + $0x160] sm:$0xff] }
  0xe0   : > { %v3454_v24 = vsel %vm1932_vm3, %v3453_v14, %v3452_v35  ;;  %v862_v32 = vadd.f32 %v854_v6, %v834_v56  ;;  %v876_v19 = vmul.f32 %v6426_v26, %v6383_v61  ;;  %v878_v37 = vmul.f32 %v6426_v26, %v6386_v36  ;;  %7613 = vst [vmem:[#allocation4_spill] sm:$0xff] %v6498_v0  ;;  %v6501_v47 = vld [vmem:[%s5337_s22 + $0xa0] sm:$0xff] }
  0xe1   : > { %v3456_v52 = vsel %vm1935_vm4, %v3455_v43, %v3454_v24  ;;  %v880_v40 = vmul.f32 %v6426_v26, %v6417_v13  ;;  %v882_v2 = vmul.f32 %v6426_v26, %v6438_v46  ;;  %v904_v3 = vmul.f32 %v6434_v30, %v6386_v36  ;;  %v3465_v43 = vld [vmem:[#allocation3 + $0x8] sm:$0xff] }
  0xe2   : > { %v3458_v28 = vsel %vm1938_vm5, %v3457_v55, %v3456_v52  ;;  %v884_v48 = vadd.f32 %v876_v19, %v856_v39  ;;  %v886_v4 = vadd.f32 %v878_v37, %v858_v41  ;;  %v906_v57 = vmul.f32 %v6434_v30, %v6417_v13 }
  0xe3   : > { %3462 = vst [vmem:[#allocation3 + $0x18] sm:$0xf0] %v3458_v28  ;;  %v888_v8 = vadd.f32 %v880_v40, %v860_v23  ;;  %v890_v27 = vadd.f32 %v882_v2, %v862_v32  ;;  %v908_v62 = vmul.f32 %v6434_v30, %v6438_v46  ;;  %v6467_v29 = vmul.f32 0.0, %v6434_v30  ;;  %v6517_v32 = vld [vmem:[%s5337_s22 + $0xb0] sm:$0xff] }
  0xe4   : > { %v912_v7 = vadd.f32 %v904_v3, %v884_v48  ;;  %v914_v11 = vadd.f32 %v906_v57, %v886_v4  ;;  %v932_v49 = vmul.f32 %v6454_v51, %v6417_v13  ;;  %v934_v60 = vmul.f32 %v6454_v51, %v6438_v46  ;;  %v6526_v2 = vld [vmem:[%s7293_s1 + $0x170] sm:$0xff] }
  0xe5   : > { %7610 = vst [vmem:[#allocation34_spill] sm:$0xff] %v6467_v29  ;;  %v916_v34 = vadd.f32 %v908_v62, %v888_v8  ;;  %v918_v16 = vadd.f32 %v6467_v29, %v890_v27  ;;  %v6486_v53 = vmul.f32 0.0, %v6454_v51  ;;  %v6489_v10 = vmul.f32 0.0, %v6462_v58 }
  0xe6   : > { %v940_v15 = vadd.f32 %v932_v49, %v912_v7  ;;  %v942_v56 = vadd.f32 %v934_v60, %v914_v11  ;;  %v964_v5 = vmul.f32 %v6462_v58, %v6479_v22  ;;  %v966_v1 = vmul.f32 %v6462_v58, %v6482_v20  ;;  %v6538_v11 = vld [vmem:[%s7293_s1 + $0x180] sm:$0xff] }
  0xe7   : > { %7611 = vst [vmem:[#allocation45_spill] sm:$0xff] %v6486_v53  ;;  %7612 = vst [vmem:[#allocation50_spill] sm:$0xff] %v6489_v10  ;;  %v944_v35 = vadd.f32 %v6486_v53, %v916_v34  ;;  %v946_v14 = vadd.f32 %v6486_v53, %v918_v16  ;;  %v6506_v6 = vmul.f32 0.0, %v6476_v17  ;;  %v990_v39 = vmul.f32 %v6476_v17, %v6479_v22 }
  0xe8   : > { %v968_v55 = vadd.f32 %v6489_v10, %v940_v15  ;;  %v970_v41 = vadd.f32 %v6489_v10, %v942_v56  ;;  %v992_v23 = vmul.f32 %v6476_v17, %v6482_v20  ;;  %v994_v24 = vmul.f32 %v6476_v17, %v6501_v47 }
  0xe9   : > { %7614 = vst [vmem:[#allocation5_spill] sm:$0xff] %v6506_v6  ;;  %v972_v19 = vadd.f32 %v964_v5, %v944_v35  ;;  %v974_v37 = vadd.f32 %v966_v1, %v946_v14  ;;  %v1016_v52 = vmul.f32 %v6498_v0, %v6479_v22  ;;  %v1018_v40 = vmul.f32 %v6498_v0, %v6482_v20 }
  0xea   : > { %v3467_v3 = vld [vmem:[#allocation3 + $0x18] sm:$0xff]  ;;  %v996_v28 = vadd.f32 %v6506_v6, %v968_v55  ;;  %v998_v48 = vadd.f32 %v990_v39, %v970_v41  ;;  %v1020_v4 = vmul.f32 %v6498_v0, %v6501_v47  ;;  %v1022_v57 = vmul.f32 %v6498_v0, %v6517_v32 }
  0xeb   : > { %v5104_v8 = vpack.c.bf16 %v3467_v3, %v3465_v43  ;;  %v1000_v27 = vadd.f32 %v992_v23, %v972_v19  ;;  %v1002_v62 = vadd.f32 %v994_v24, %v974_v37  ;;  %v1044_v7 = vmul.f32 %v6526_v2, %v6482_v20  ;;  %v7615_v23 = vld [vmem:[#allocation15_spill] sm:$0xff] }
  0xec   : > { %v1024_v49 = vadd.f32 %v1016_v52, %v996_v28  ;;  %v1026_v60 = vadd.f32 %v1018_v40, %v998_v48  ;;  %v1046_v34 = vmul.f32 %v6526_v2, %v6501_v47  ;;  %v1048_v16 = vmul.f32 %v6526_v2, %v6517_v32 }
  0xed   : > { %5105 = vmatprep.subr.bf16.mxu0 %v5104_v8  ;;  %v1028_v15 = vadd.f32 %v1020_v4, %v1000_v27  ;;  %v1030_v56 = vadd.f32 %v1022_v57, %v1002_v62  ;;  %v6545_v5 = vmul.f32 0.0, %v6526_v2  ;;  %v1072_v1 = vmul.f32 %v6538_v11, %v6501_v47  ;;  %v5187_v4 = vld [vmem:[%s7294_s2] ss:$4 sm:$0x3] }
  0xee   : > { %v1052_v35 = vadd.f32 %v1044_v7, %v1024_v49  ;;  %v1054_v14 = vadd.f32 %v1046_v34, %v1026_v60  ;;  %v1074_v39 = vmul.f32 %v6538_v11, %v6517_v32  ;;  %v6552_v43 = vmul.f32 0.0, %v6538_v11 }
  0xef   : > { %v1056_v55 = vadd.f32 %v1048_v16, %v1028_v15  ;;  %v1058_v41 = vadd.f32 %v6545_v5, %v1030_v56  ;;  %v6556_v24 = vsub.s32 0, %v7615_v23  ;;  %v1335_v19 = vmul.f32 %v6222_v50, %v6279_v42 }
  0xf0   : > { %v1080_v37 = vadd.f32 %v1072_v1, %v1052_v35  ;;  %v1082_v52 = vadd.f32 %v1074_v39, %v1054_v14  ;;  %v1337_v40 = vmul.f32 %v6222_v50, %v6282_v54  ;;  %v1359_v3 = vmul.f32 %v6227_v9, %v6279_v42  ;;  %v7618_v50 = vld [vmem:[#allocation57_spill] sm:$0xff] }
  0xf1   : > { %7616 = vst [vmem:[#allocation7_spill] sm:$0xff] %v6556_v24  ;;  %v1084_v28 = vadd.f32 %v6552_v43, %v1056_v55  ;;  %v1086_v48 = vadd.f32 %v6552_v43, %v1058_v41  ;;  %v1141_v57 = vrot.slane %v5187_v4, %v6556_v24  ;;  %v1343_v8 = vadd.f32 %v1335_v19, %v6295_v63 }
  0xf2   : > { %v1088_v27 = vrot.slane %v1080_v37, 4  ;;  %v1100_v62 = vrot.slane %v1082_v52, 4  ;;  %v1345_v7 = vadd.f32 %v1337_v40, %v6295_v63  ;;  %v1361_v49 = vmul.f32 %v6227_v9, %v6282_v54 }
  0xf3   : > { %v1112_v60 = vrot.slane %v1084_v28, 4  ;;  %v1124_v34 = vrot.slane %v1086_v48, 4  ;;  %v1363_v16 = vmul.f32 %v6227_v9, %v6308_v18  ;;  %v1367_v15 = vadd.f32 %v1359_v3, %v6318_v45 }
  0xf4   : > { %v1089_v56 = vadd.f32 %v1088_v27, %v1080_v37  ;;  %v1101_v1 = vadd.f32 %v1100_v62, %v1082_v52  ;;  %v1369_v35 = vadd.f32 %v1361_v49, %v1343_v8  ;;  %v1383_v14 = vmul.f32 %v6236_v59, %v6279_v42  ;;  %v7617_v49 = vld [vmem:[#allocation52_spill] sm:$0xff] }
  0xf5   : > { %v1113_v39 = vadd.f32 %v1112_v60, %v1084_v28  ;;  %v1125_v55 = vadd.f32 %v1124_v34, %v1086_v48  ;;  %v1371_v41 = vadd.f32 %v1363_v16, %v1345_v7  ;;  %v1385_v63 = vmul.f32 %v6236_v59, %v6282_v54 }
  0xf6   : > { %v1090_v23 = vrot.slane %v1089_v56, 2  ;;  %v1102_v19 = vrot.slane %v1101_v1, 2  ;;  %v1387_v40 = vmul.f32 %v6236_v59, %v6308_v18  ;;  %v1389_v45 = vmul.f32 %v6236_v59, %v6336_v21 }
  0xf7   : > { %v1114_v37 = vrot.slane %v1113_v39, 2  ;;  %v1126_v52 = vrot.slane %v1125_v55, 2  ;;  %v1391_v3 = vadd.f32 %v1383_v14, %v6340_v38  ;;  %v1393_v4 = vadd.f32 %v1385_v63, %v1367_v15 }
  0xf8   : > { %v1091_v8 = vadd.f32 %v1090_v23, %v1089_v56  ;;  %v1103_v28 = vadd.f32 %v1102_v19, %v1101_v1  ;;  %v1395_v48 = vadd.f32 %v1387_v40, %v1369_v35  ;;  %v1397_v27 = vadd.f32 %v1389_v45, %v1371_v41  ;;  %v7619_v41 = vld [vmem:[#allocation53_spill] sm:$0xff]  ;;  %v7620_v45 = vld [vmem:[#allocation19_spill] sm:$0xff] }
  0xf9   : > { %v1115_v62 = vadd.f32 %v1114_v37, %v1113_v39  ;;  %v1127_v7 = vadd.f32 %v1126_v52, %v1125_v55  ;;  %v1409_v60 = vmul.f32 %v7617_v49, %v6282_v54  ;;  %v1411_v34 = vmul.f32 %v7617_v49, %v6308_v18 }
  0xfa   : > { %v1092_v16 = vrot.slane %v1091_v8, 1  ;;  %v1104_v9 = vrot.slane %v1103_v28, 1  ;;  %v1413_v59 = vmul.f32 %v7617_v49, %v6336_v21  ;;  %v1423_v38 = vadd.f32 %v1397_v27, %v7618_v50 }
  0xfb   : > { %v1116_v15 = vrot.slane %v1115_v62, 1  ;;  %v1128_v56 = vrot.slane %v1127_v7, 1  ;;  %v1417_v1 = vadd.f32 %v1409_v60, %v1391_v3  ;;  %v1419_v35 = vadd.f32 %v1411_v34, %v1393_v4 }
  0xfc   : > { %v1093_v14 = vadd.f32 %v1092_v16, %v1091_v8  ;;  %v1105_v39 = vadd.f32 %v1104_v9, %v1103_v28  ;;  %v1421_v55 = vadd.f32 %v1413_v59, %v1395_v48  ;;  %v1435_v63 = vmul.f32 %v7619_v41, %v6308_v18  ;;  %v7621_v9 = vld [vmem:[#allocation56_spill] sm:$0xff] }
  0xfd   : > { %v1117_v23 = vadd.f32 %v1116_v15, %v1115_v62  ;;  %v1129_v19 = vadd.f32 %v1128_v56, %v1127_v7  ;;  %v1437_v40 = vmul.f32 %v7619_v41, %v6336_v21  ;;  %v1449_v37 = vadd.f32 %v1423_v38, %v7620_v45  ;;  %v7622_v7 = vld [vmem:[#allocation60_spill] sm:$0xff] }
  0xfe   : > { %v1148_v52 = vadd.f32 %v1141_v57, %v1093_v14  ;;  %v1150_v49 = vadd.f32 %v1141_v57, %v1105_v39  ;;  %v1443_v27 = vadd.f32 %v1435_v63, %v1417_v1  ;;  %v1447_v50 = vadd.f32 %v1421_v55, %v7620_v45  ;;  %v7624_v63 = vld [vmem:[#allocation20_spill] sm:$0xff] }
  0xff   : > { %v1152_v3 = vadd.f32 %v1141_v57, %v1117_v23  ;;  %v1154_v4 = vadd.f32 %v1141_v57, %v1129_v19  ;;  %v1445_v8 = vadd.f32 %v1437_v40, %v1419_v35  ;;  %v1465_v59 = vmul.f32 %v7621_v9, %v6383_v61  ;;  %v7623_v57 = vld [vmem:[#allocation59_spill] sm:$0xff] }
 0x100   : > { %v1156_v28 = vmax.f32 %v1148_v52, 0.0  ;;  %v1158_v48 = vmax.f32 %v1150_v49, 0.0  ;;  %v1467_v62 = vmul.f32 %v7621_v9, %v6386_v36  ;;  %v1469_v60 = vadd.f32 %v1443_v27, %v7622_v7 }
 0x101   : > { %v1160_v34 = vmax.f32 %v1152_v3, 0.0  ;;  %v1162_v16 = vmax.f32 %v1154_v4, 0.0  ;;  %v1471_v38 = vadd.f32 %v1445_v8, %v7622_v7  ;;  %v1473_v15 = vadd.f32 %v1465_v59, %v1447_v50  ;;  %v7625_v50 = vld [vmem:[#allocation35_spill] sm:$0xff] }
 0x102   : > { %v1172_v56 = vrot.slane %v1158_v48, 7  ;;  %v1475_v1 = vadd.f32 %v1467_v62, %v1449_v37  ;;  %v1489_v35 = vmul.f32 %v7623_v57, %v6383_v61  ;;  %v1491_v14 = vmul.f32 %v7623_v57, %v6386_v36  ;;  %v7626_v62 = vld [vmem:[#allocation21_spill] sm:$0xff] }
 0x103   : > { %v1175_v39 = vrot.slane %v1160_v34, 6  ;;  %v1178_v49 = vrot.slane %v1162_v16, 5  ;;  %v1493_v55 = vmul.f32 %v7623_v57, %v6417_v13  ;;  %v1495_v23 = vadd.f32 %v1469_v60, %v7624_v63 }
 0x104   : > { %v1174_v19 = vsel %vm1173_vm0, %v1172_v56, %v1156_v28  ;;  %v1497_v40 = vadd.f32 %v1489_v35, %v1471_v38  ;;  %v1499_v52 = vadd.f32 %v1491_v14, %v1473_v15  ;;  %v1513_v37 = vmul.f32 %v7625_v50, %v6383_v61  ;;  %v7627_v35 = vld [vmem:[#allocation36_spill] sm:$0xff] }
 0x105   : > { %v1177_v27 = vsel %vm1176_vm1, %v1175_v39, %v1174_v19  ;;  %v1501_v3 = vadd.f32 %v1493_v55, %v1475_v1  ;;  %v1515_v4 = vmul.f32 %v7625_v50, %v6386_v36  ;;  %v1517_v8 = vmul.f32 %v7625_v50, %v6417_v13 }
 0x106   : > { %v1180_v59 = vsel %vm1179_vm2, %v1178_v49, %v1177_v27  ;;  %v1519_v48 = vmul.f32 %v7625_v50, %v6438_v46  ;;  %v1521_v28 = vadd.f32 %v1513_v37, %v1495_v23  ;;  %v1539_v60 = vmul.f32 %v7626_v62, %v6386_v36  ;;  %v7628_v23 = vld [vmem:[#allocation26_spill] sm:$0xff] }
 0x107   : > { %1189 = vst [vmem:[#allocation3] sm:$0xf] %v1180_v59  ;;  %v1523_v34 = vadd.f32 %v1515_v4, %v1497_v40  ;;  %v1525_v16 = vadd.f32 %v1517_v8, %v1499_v52  ;;  %v1541_v38 = vmul.f32 %v7626_v62, %v6417_v13  ;;  %v1543_v15 = vmul.f32 %v7626_v62, %v6438_v46 }
 0x108   : > { %v1527_v56 = vadd.f32 %v1519_v48, %v1501_v3  ;;  %v1547_v1 = vadd.f32 %v1539_v60, %v1521_v28  ;;  %v1565_v14 = vmul.f32 %v7627_v35, %v6417_v13  ;;  %v1567_v39 = vmul.f32 %v7627_v35, %v6438_v46 }
 0x109   : > { %v1549_v49 = vadd.f32 %v1541_v38, %v1523_v34  ;;  %v1551_v55 = vadd.f32 %v1543_v15, %v1525_v16  ;;  %v1595_v19 = vmul.f32 %v7628_v23, %v6479_v22  ;;  %v1597_v40 = vmul.f32 %v7628_v23, %v6482_v20 }
 0x10a   : > { %v1553_v52 = vadd.f32 %v1527_v56, %v6365_v31  ;;  %v1573_v37 = vadd.f32 %v1565_v14, %v1547_v1  ;;  %v1619_v27 = vmul.f32 %v6395_v25, %v6479_v22  ;;  %v1621_v3 = vmul.f32 %v6395_v25, %v6482_v20 }
 0x10b   : > { %v1575_v4 = vadd.f32 %v1567_v39, %v1549_v49  ;;  %v1577_v8 = vadd.f32 %v1551_v55, %v6380_v44  ;;  %v1623_v59 = vmul.f32 %v6395_v25, %v6501_v47  ;;  %v1643_v48 = vmul.f32 %v6426_v26, %v6479_v22 }
 0x10c   : > { %v1579_v28 = vadd.f32 %v1553_v52, %v6380_v44  ;;  %v1599_v60 = vadd.f32 %v1573_v37, %v6390_v12  ;;  %v1645_v34 = vmul.f32 %v6426_v26, %v6482_v20  ;;  %v1647_v16 = vmul.f32 %v6426_v26, %v6501_v47  ;;  %v6664_v52 = vld [vmem:[%s5337_s22 + $0xc0] sm:$0xff]  ;;  %v6667_v37 = vld [vmem:[%s5337_s22 + $0xd0] sm:$0xff] }
 0x10d   : > { %v1601_v38 = vadd.f32 %v1575_v4, %v6390_v12  ;;  %v1603_v15 = vadd.f32 %v1595_v19, %v1577_v8  ;;  %v1649_v56 = vmul.f32 %v6426_v26, %v6517_v32  ;;  %v1669_v1 = vmul.f32 %v6434_v30, %v6482_v20  ;;  %v6678_v12 = vld [vmem:[%s5337_s22 + $0xe0] sm:$0xff] }
 0x10e   : > { %v1605_v14 = vadd.f32 %v1597_v40, %v1579_v28  ;;  %v1625_v39 = vadd.f32 %v1599_v60, %v6404_v33  ;;  %v1671_v49 = vmul.f32 %v6434_v30, %v6501_v47  ;;  %v1673_v55 = vmul.f32 %v6434_v30, %v6517_v32  ;;  %7629 = vst [vmem:[#allocation6_spill] sm:$0xff] %v6678_v12 }
 0x10f   : > { %v1627_v19 = vadd.f32 %v1619_v27, %v1601_v38  ;;  %v1629_v4 = vadd.f32 %v1621_v3, %v1603_v15  ;;  %v1695_v8 = vmul.f32 %v6454_v51, %v6501_v47  ;;  %v1697_v40 = vmul.f32 %v6454_v51, %v6517_v32 }
 0x110   : > { %v1631_v28 = vadd.f32 %v1623_v59, %v1605_v14  ;;  %v1651_v60 = vadd.f32 %v1643_v48, %v1625_v39  ;;  %v1726_v33 = vmul.f32 %v6462_v58, %v6664_v52  ;;  %v1728_v30 = vmul.f32 %v6462_v58, %v6667_v37  ;;  %v6689_v14 = vld [vmem:[%s5337_s22 + $0xf0] sm:$0xff] }
 0x111   : > { %v1653_v44 = vadd.f32 %v1645_v34, %v1627_v19  ;;  %v1655_v27 = vadd.f32 %v1647_v16, %v1629_v4  ;;  %v1751_v3 = vmul.f32 %v6476_v17, %v6664_v52  ;;  %v1753_v38 = vmul.f32 %v6476_v17, %v6667_v37  ;;  %7630 = vst [vmem:[#allocation12_spill] sm:$0xff] %v6689_v14 }
 0x112   : > { %v1657_v15 = vadd.f32 %v1649_v56, %v1631_v28  ;;  %v1677_v51 = vadd.f32 %v1669_v1, %v1651_v60  ;;  %v1755_v59 = vmul.f32 %v6476_v17, %v6678_v12  ;;  %v1776_v48 = vmul.f32 %v6498_v0, %v6664_v52 }
 0x113   : > { %v1679_v58 = vadd.f32 %v1671_v49, %v1653_v44  ;;  %v1681_v39 = vadd.f32 %v1673_v55, %v1655_v27  ;;  %v1778_v34 = vmul.f32 %v6498_v0, %v6667_v37  ;;  %v1780_v16 = vmul.f32 %v6498_v0, %v6678_v12 }
 0x114   : > { %v1683_v19 = vadd.f32 %v1657_v15, %v6467_v29  ;;  %v1703_v56 = vadd.f32 %v1695_v8, %v1677_v51  ;;  %v1782_v1 = vmul.f32 %v6498_v0, %v6689_v14  ;;  %v1803_v17 = vmul.f32 %v6526_v2, %v6667_v37  ;;  %v5188_v15 = vld [vmem:[%s7294_s2] ss:$4 sm:$0x3]  ;;  %v7633_v0 = vld [vmem:[#allocation25_spill] sm:$0xff] }
 0x115   : > { %v1705_v4 = vadd.f32 %v1697_v40, %v1679_v58  ;;  %v1707_v28 = vadd.f32 %v1681_v39, %v6486_v53  ;;  %v1805_v44 = vmul.f32 %v6526_v2, %v6678_v12  ;;  %v1807_v49 = vmul.f32 %v6526_v2, %v6689_v14  ;;  %v7631_v2 = vld [vmem:[#allocation33_spill] sm:$0xff] }
 0x116   : > { %v1709_v55 = vadd.f32 %v1683_v19, %v6486_v53  ;;  %v1730_v60 = vadd.f32 %v1703_v56, %v6489_v10  ;;  %v1830_v51 = vmul.f32 %v6538_v11, %v6678_v12  ;;  %v1832_v8 = vmul.f32 %v6538_v11, %v6689_v14  ;;  %v7632_v11 = vld [vmem:[#allocation24_spill] sm:$0xff] }
 0x117   : > { %v1732_v40 = vadd.f32 %v1705_v4, %v6489_v10  ;;  %v1734_v27 = vadd.f32 %v1726_v33, %v1707_v28  ;;  %v6716_v58 = vrot.slane %v5188_v15, %v6556_v24  ;;  %v1965_v39 = vmul.f32 %v7631_v2, %v6279_v42 }
 0x118   : > { %v1736_v19 = vadd.f32 %v1728_v30, %v1709_v55  ;;  %v1757_v56 = vadd.f32 %v1730_v60, %v6506_v6  ;;  %v1967_v53 = vmul.f32 %v7631_v2, %v6282_v54  ;;  %v1989_v4 = vmul.f32 %v7632_v11, %v6279_v42  ;;  %v7634_v55 = vld [vmem:[#allocation38_spill] sm:$0xff] }
 0x119   : > { %v1759_v33 = vadd.f32 %v1751_v3, %v1732_v40  ;;  %v1761_v28 = vadd.f32 %v1753_v38, %v1734_v27  ;;  %v1991_v10 = vmul.f32 %v7632_v11, %v6282_v54  ;;  %v1993_v15 = vmul.f32 %v7632_v11, %v6308_v18 }
 0x11a   : > { %v1763_v29 = vadd.f32 %v1755_v59, %v1736_v19  ;;  %v1784_v24 = vadd.f32 %v1776_v48, %v1757_v56  ;;  %v1997_v30 = vadd.f32 %v1989_v4, %v7633_v0  ;;  %v2013_v60 = vmul.f32 %v7634_v55, %v6279_v42  ;;  %v7635_v48 = vld [vmem:[#allocation18_spill] sm:$0xff] }
 0x11b   : > { %v1786_v6 = vadd.f32 %v1778_v34, %v1759_v33  ;;  %v1788_v2 = vadd.f32 %v1780_v16, %v1761_v28  ;;  %v1999_v14 = vadd.f32 %v1991_v10, %v1965_v39  ;;  %v2001_v26 = vadd.f32 %v1993_v15, %v1967_v53  ;;  %v7638_v15 = vld [vmem:[#allocation17_spill] sm:$0xff] }
 0x11c   : > { %v1790_v12 = vadd.f32 %v1782_v1, %v1763_v29  ;;  %v1811_v3 = vadd.f32 %v1803_v17, %v1784_v24  ;;  %v2015_v38 = vmul.f32 %v7634_v55, %v6282_v54  ;;  %v2017_v40 = vmul.f32 %v7634_v55, %v6308_v18  ;;  %v7636_v1 = vld [vmem:[#allocation39_spill] sm:$0xff] }
 0x11d   : > { %v1813_v27 = vadd.f32 %v1805_v44, %v1786_v6  ;;  %v1815_v59 = vadd.f32 %v1807_v49, %v1788_v2  ;;  %v2019_v0 = vmul.f32 %v7634_v55, %v6336_v21  ;;  %v2021_v19 = vadd.f32 %v2013_v60, %v7635_v48 }
 0x11e   : > { %v1817_v42 = vadd.f32 %v1790_v12, %v6545_v5  ;;  %v1838_v34 = vadd.f32 %v1830_v51, %v1811_v3  ;;  %v2023_v10 = vadd.f32 %v2015_v38, %v1997_v30  ;;  %v2025_v53 = vadd.f32 %v2017_v40, %v1999_v14  ;;  %v7637_v14 = vld [vmem:[#allocation48_spill] sm:$0xff]  ;;  %v7639_v3 = vld [vmem:[#allocation31_spill] sm:$0xff] }
 0x11f   : > { %v1840_v29 = vadd.f32 %v1832_v8, %v1813_v27  ;;  %v1842_v24 = vadd.f32 %v1815_v59, %v6552_v43  ;;  %v2027_v16 = vadd.f32 %v2019_v0, %v2001_v26  ;;  %v2039_v17 = vmul.f32 %v7636_v1, %v6282_v54 }
 0x120   : > { %v1844_v6 = vadd.f32 %v1817_v42, %v6552_v43  ;;  %v1846_v44 = vrot.slane %v1838_v34, 4  ;;  %v2041_v49 = vmul.f32 %v7636_v1, %v6308_v18  ;;  %v2043_v39 = vmul.f32 %v7636_v1, %v6336_v21 }
 0x121   : > { %v1858_v12 = vrot.slane %v1840_v29, 4  ;;  %v1870_v51 = vrot.slane %v1842_v24, 4  ;;  %v2047_v56 = vadd.f32 %v2039_v17, %v2021_v19  ;;  %v2053_v8 = vadd.f32 %v2027_v16, %v7637_v14 }
 0x122   : > { %v1847_v11 = vadd.f32 %v1846_v44, %v1838_v34  ;;  %v1882_v4 = vrot.slane %v1844_v6, 4  ;;  %v2049_v26 = vadd.f32 %v2041_v49, %v2023_v10  ;;  %v2051_v33 = vadd.f32 %v2043_v39, %v2025_v53  ;;  %v7640_v34 = vld [vmem:[#allocation43_spill] sm:$0xff] }
 0x123   : > { %v1859_v28 = vadd.f32 %v1858_v12, %v1840_v29  ;;  %v1871_v54 = vadd.f32 %v1870_v51, %v1842_v24  ;;  %v2065_v30 = vmul.f32 %v7638_v15, %v6308_v18  ;;  %v2067_v55 = vmul.f32 %v7638_v15, %v6336_v21  ;;  %v7641_v29 = vld [vmem:[#allocation54_spill] sm:$0xff]  ;;  %v7642_v12 = vld [vmem:[#allocation44_spill] sm:$0xff] }
 0x124   : > { %v1848_v60 = vrot.slane %v1847_v11, 2  ;;  %v1883_v2 = vadd.f32 %v1882_v4, %v1844_v6  ;;  %v2077_v38 = vadd.f32 %v2051_v33, %v7639_v3  ;;  %v2079_v40 = vadd.f32 %v2053_v8, %v7639_v3  ;;  %v7643_v4 = vld [vmem:[#allocation55_spill] sm:$0xff] }
 0x125   : > { %v1860_v27 = vrot.slane %v1859_v28, 2  ;;  %v1872_v59 = vrot.slane %v1871_v54, 2  ;;  %v2073_v0 = vadd.f32 %v2065_v30, %v2047_v56  ;;  %v2075_v48 = vadd.f32 %v2067_v55, %v2049_v26 }
 0x126   : > { %v1849_v19 = vadd.f32 %v1848_v60, %v1847_v11  ;;  %v1884_v42 = vrot.slane %v1883_v2, 2  ;;  %v2095_v10 = vmul.f32 %v7640_v34, %v6383_v61  ;;  %v2097_v18 = vmul.f32 %v7640_v34, %v6386_v36 }
 0x127   : > { %v1861_v53 = vadd.f32 %v1860_v27, %v1859_v28  ;;  %v1873_v21 = vadd.f32 %v1872_v59, %v1871_v54  ;;  %v2099_v24 = vadd.f32 %v2073_v0, %v7641_v29  ;;  %v2101_v16 = vadd.f32 %v2075_v48, %v7641_v29 }
 0x128   : > { %v1850_v1 = vrot.slane %v1849_v19, 1  ;;  %v1885_v17 = vadd.f32 %v1884_v42, %v1883_v2  ;;  %v2103_v6 = vadd.f32 %v2095_v10, %v2077_v38  ;;  %v2105_v44 = vadd.f32 %v2097_v18, %v2079_v40  ;;  %v7644_v2 = vld [vmem:[#allocation49_spill] sm:$0xff] }
 0x129   : > { %v1862_v49 = vrot.slane %v1861_v53, 1  ;;  %v1874_v39 = vrot.slane %v1873_v21, 1  ;;  %v2119_v51 = vmul.f32 %v7642_v12, %v6383_v61  ;;  %v2121_v56 = vmul.f32 %v7642_v12, %v6386_v36 }
 0x12a   : > { %v1851_v14 = vadd.f32 %v1850_v1, %v1849_v19  ;;  %v1886_v8 = vrot.slane %v1885_v17, 1  ;;  %v2123_v11 = vmul.f32 %v7642_v12, %v6417_v13  ;;  %v2125_v26 = vadd.f32 %v2099_v24, %v7643_v4  ;;  %v7646_v12 = vld [vmem:[#allocation57_spill] sm:$0xff] }
 0x12b   : > { %v1863_v33 = vadd.f32 %v1862_v49, %v1861_v53  ;;  %v1875_v28 = vadd.f32 %v1874_v39, %v1873_v21  ;;  %v2127_v54 = vadd.f32 %v2119_v51, %v2101_v16  ;;  %v2129_v15 = vadd.f32 %v2121_v56, %v2103_v6  ;;  %v7645_v16 = vld [vmem:[#allocation52_spill] sm:$0xff] }
 0x12c   : > { %v1887_v30 = vadd.f32 %v1886_v8, %v1885_v17  ;;  %v1906_v55 = vadd.f32 %v6716_v58, %v1851_v14  ;;  %v2131_v60 = vadd.f32 %v2123_v11, %v2105_v44  ;;  %v2143_v3 = vmul.f32 %v7644_v2, %v6383_v61 }
 0x12d   : > { %v1908_v38 = vadd.f32 %v6716_v58, %v1863_v33  ;;  %v1910_v40 = vadd.f32 %v6716_v58, %v1875_v28  ;;  %v2145_v27 = vmul.f32 %v7644_v2, %v6386_v36  ;;  %v2147_v59 = vmul.f32 %v7644_v2, %v6417_v13 }
 0x12e   : > { %v1912_v0 = vadd.f32 %v6716_v58, %v1887_v30  ;;  %v1914_v48 = vmax.f32 %v1906_v55, 0.0  ;;  %v2149_v19 = vmul.f32 %v7644_v2, %v6438_v46  ;;  %v2151_v42 = vadd.f32 %v2143_v3, %v2125_v26 }
 0x12f   : > { %v1916_v34 = vmax.f32 %v1908_v38, 0.0  ;;  %v1918_v10 = vmax.f32 %v1910_v40, 0.0  ;;  %v2153_v18 = vadd.f32 %v2145_v27, %v2127_v54  ;;  %v2155_v53 = vadd.f32 %v2147_v59, %v2129_v15 }
 0x130   : > { %v1920_v21 = vmax.f32 %v1912_v0, 0.0  ;;  %v1930_v29 = vrot.slane %v1914_v48, 4  ;;  %v2157_v24 = vadd.f32 %v2149_v19, %v2131_v60  ;;  %v2169_v1 = vmul.f32 %v7645_v16, %v6386_v36 }
 0x131   : > { %v1931_v17 = vrot.slane %v1916_v34, 3  ;;  %v1934_v6 = vrot.slane %v1918_v10, 2  ;;  %v2171_v58 = vmul.f32 %v7645_v16, %v6417_v13  ;;  %v2173_v44 = vmul.f32 %v7645_v16, %v6438_v46 }
 0x132   : > { %v1937_v49 = vrot.slane %v1920_v21, 1  ;;  %v2177_v39 = vadd.f32 %v2169_v1, %v2151_v42  ;;  %v2183_v51 = vadd.f32 %v2157_v24, %v7646_v12  ;;  %v2195_v56 = vmul.f32 %v7619_v41, %v6417_v13  ;;  %v7647_v12 = vld [vmem:[#allocation6_spill] sm:$0xff] }
 0x133   : > { %v1933_v14 = vsel %vm1932_vm3, %v1931_v17, %v1930_v29  ;;  %v2179_v8 = vadd.f32 %v2171_v58, %v2153_v18  ;;  %v2181_v11 = vadd.f32 %v2173_v44, %v2155_v53  ;;  %v2197_v4 = vmul.f32 %v7619_v41, %v6438_v46 }
 0x134   : > { %v1936_v26 = vsel %vm1935_vm4, %v1934_v6, %v1933_v14  ;;  %v2203_v33 = vadd.f32 %v2195_v56, %v2177_v39  ;;  %v2209_v28 = vadd.f32 %v2183_v51, %v7620_v45  ;;  %v2225_v54 = vmul.f32 %v7621_v9, %v6479_v22  ;;  %v7648_v51 = vld [vmem:[#allocation62_spill] sm:$0xff] }
 0x135   : > { %v1939_v15 = vsel %vm1938_vm5, %v1937_v49, %v1936_v26  ;;  %v2205_v30 = vadd.f32 %v2197_v4, %v2179_v8  ;;  %v2207_v55 = vadd.f32 %v2181_v11, %v7620_v45  ;;  %v2227_v60 = vmul.f32 %v7621_v9, %v6482_v20  ;;  %v7649_v8 = vld [vmem:[#allocation46_spill] sm:$0xff]  ;;  %v7650_v26 = vld [vmem:[#allocation27_spill] sm:$0xff] }
 0x136   : > { %1949 = vst [vmem:[#allocation3] sm:$0xf0] %v1939_v15  ;;  %v2229_v2 = vadd.f32 %v2203_v33, %v7622_v7  ;;  %v2249_v41 = vmul.f32 %v7623_v57, %v6479_v22  ;;  %v2251_v3 = vmul.f32 %v7623_v57, %v6482_v20  ;;  %v2253_v38 = vmul.f32 %v7623_v57, %v6501_v47 }
 0x137   : > { %v2231_v40 = vadd.f32 %v2205_v30, %v7622_v7  ;;  %v2233_v27 = vadd.f32 %v2225_v54, %v2207_v55  ;;  %v2235_v59 = vadd.f32 %v2227_v60, %v2209_v28  ;;  %v2273_v45 = vmul.f32 %v7625_v50, %v6479_v22  ;;  %v7651_v28 = vld [vmem:[#allocation12_spill] sm:$0xff] }
 0x138   : > { %v2255_v9 = vadd.f32 %v2229_v2, %v7624_v63  ;;  %v2275_v0 = vmul.f32 %v7625_v50, %v6482_v20  ;;  %v2277_v48 = vmul.f32 %v7625_v50, %v6501_v47  ;;  %v2279_v19 = vmul.f32 %v7625_v50, %v6517_v32 }
 0x139   : > { %v2257_v42 = vadd.f32 %v2249_v41, %v2231_v40  ;;  %v2259_v57 = vadd.f32 %v2251_v3, %v2233_v27  ;;  %v2261_v34 = vadd.f32 %v2253_v38, %v2235_v59  ;;  %v2299_v7 = vmul.f32 %v7626_v62, %v6482_v20  ;;  %v2714_v3 = vld [vmem:[%s7293_s1] sm:$0xff]  ;;  %v7653_v38 = vld [vmem:[#allocation51_spill] sm:$0xff] }
 0x13a   : > { %v2281_v10 = vadd.f32 %v2273_v45, %v2255_v9  ;;  %v2301_v18 = vmul.f32 %v7626_v62, %v6501_v47  ;;  %v2303_v63 = vmul.f32 %v7626_v62, %v6517_v32  ;;  %v2325_v53 = vmul.f32 %v7627_v35, %v6501_v47  ;;  %v7654_v27 = vld [vmem:[#allocation32_spill] sm:$0xff] }
 0x13b   : > { %v2283_v21 = vadd.f32 %v2275_v0, %v2257_v42  ;;  %v2285_v29 = vadd.f32 %v2277_v48, %v2259_v57  ;;  %v2287_v24 = vadd.f32 %v2279_v19, %v2261_v34  ;;  %v2327_v50 = vmul.f32 %v7627_v35, %v6517_v32  ;;  %v7655_v9 = vld [vmem:[#allocation4_spill] sm:$0xff]  ;;  %v5036_v48 = vld [vmem:[%s7293_s1 + $0x10] sm:$0xff] }
 0x13c   : > { %v2307_v16 = vadd.f32 %v2299_v7, %v2281_v10  ;;  %v2355_v1 = vmul.f32 %v7628_v23, %v6664_v52  ;;  %v2357_v17 = vmul.f32 %v7628_v23, %v6667_v37  ;;  %v2379_v6 = vmul.f32 %v6395_v25, %v6664_v52  ;;  %v5189_v34 = vld [vmem:[%s7294_s2] ss:$4 sm:$0x3]  ;;  %v7656_v7 = vld [vmem:[#allocation7_spill] sm:$0xff] }
 0x13d   : > { %v2309_v62 = vadd.f32 %v2301_v18, %v2283_v21  ;;  %v2311_v58 = vadd.f32 %v2303_v63, %v2285_v29  ;;  %v2313_v44 = vadd.f32 %v2287_v24, %v6365_v31  ;;  %v2381_v49 = vmul.f32 %v6395_v25, %v6667_v37 }
 0x13e   : > { %v2333_v39 = vadd.f32 %v2325_v53, %v2307_v16  ;;  %v2383_v35 = vmul.f32 %v6395_v25, %v7647_v12  ;;  %v2403_v56 = vmul.f32 %v7648_v51, %v6664_v52  ;;  %v2405_v23 = vmul.f32 %v7648_v51, %v6667_v37  ;;  %v7652_v25 = vld [vmem:[#allocation29_spill] sm:$0xff] }
 0x13f   : > { %v2335_v14 = vadd.f32 %v2327_v50, %v2309_v62  ;;  %v2337_v11 = vadd.f32 %v2311_v58, %v7649_v8  ;;  %v2339_v4 = vadd.f32 %v2313_v44, %v7649_v8  ;;  %v2407_v31 = vmul.f32 %v7648_v51, %v7647_v12  ;;  %v5038_v58 = vld [vmem:[%s7293_s1 + $0x20] sm:$0xff] }
 0x140   : > { %v2359_v33 = vadd.f32 %v2333_v39, %v7650_v26  ;;  %v2409_v54 = vmul.f32 %v7648_v51, %v7651_v28  ;;  %v2429_v15 = vmul.f32 %v7652_v25, %v6667_v37  ;;  %v2431_v30 = vmul.f32 %v7652_v25, %v7647_v12  ;;  %v7657_v39 = vld [vmem:[#allocation34_spill] sm:$0xff] }
 0x141   : > { %v2361_v55 = vadd.f32 %v2335_v14, %v7650_v26  ;;  %v2363_v60 = vadd.f32 %v2355_v1, %v2337_v11  ;;  %v2365_v2 = vadd.f32 %v2357_v17, %v2339_v4  ;;  %v2433_v41 = vmul.f32 %v7652_v25, %v7651_v28  ;;  %v5191_v25 = vld [vmem:[%s5337_s22 + $0x50] sm:$0xff] }
 0x142   : > { %v2385_v40 = vadd.f32 %v2359_v33, %v7653_v38  ;;  %v2455_v59 = vmul.f32 %v7654_v27, %v7647_v12  ;;  %v2457_v45 = vmul.f32 %v7654_v27, %v7651_v28  ;;  %v2536_v0 = vmul.f32 0.0, %v7655_v9  ;;  %v7659_v33 = vld [vmem:[#allocation50_spill] sm:$0xff] }
 0x143   : > { %v2387_v19 = vadd.f32 %v2379_v6, %v2361_v55  ;;  %v2389_v42 = vadd.f32 %v2381_v49, %v2363_v60  ;;  %v2391_v57 = vadd.f32 %v2383_v35, %v2365_v2  ;;  %v6872_v10 = vrot.slane %v5189_v34, %v7656_v7  ;;  %v5040_v60 = vld [vmem:[%s7293_s1 + $0x30] sm:$0xff] }
 0x144   : > { %v2411_v18 = vadd.f32 %v2403_v56, %v2385_v40  ;;  %v2716_v63 = vmul.f32 0.0, %v2714_v3  ;;  %v2720_v53 = vmul.f32 %v2714_v3, %v6383_v61  ;;  %v2722_v21 = vmul.f32 %v2714_v3, %v6386_v36  ;;  %v7660_v40 = vld [vmem:[#allocation5_spill] sm:$0xff] }
 0x145   : > { %v2413_v29 = vadd.f32 %v2405_v23, %v2387_v19  ;;  %v2415_v24 = vadd.f32 %v2407_v31, %v2389_v42  ;;  %v2417_v50 = vadd.f32 %v2409_v54, %v2391_v57  ;;  %v2742_v16 = vmul.f32 0.0, %v5036_v48  ;;  %v5190_v31 = vld [vmem:[%s5337_s22 + $0x40] sm:$0xff] }
 0x146   : > { %v2437_v1 = vadd.f32 %v2429_v15, %v2411_v18  ;;  %v2744_v17 = vmul.f32 %v5036_v48, %v6383_v61  ;;  %v2746_v6 = vmul.f32 %v5036_v48, %v6386_v36  ;;  %v2748_v62 = vmul.f32 %v5036_v48, %v6417_v13  ;;  %v7658_v61 = vld [vmem:[#allocation45_spill] sm:$0xff] }
 0x147   : > { %v2439_v44 = vadd.f32 %v2431_v30, %v2413_v29  ;;  %v2441_v49 = vadd.f32 %v2433_v41, %v2415_v24  ;;  %v2443_v35 = vadd.f32 %v2417_v50, %v7657_v39  ;;  %v2750_v51 = vadd.f32 %v2742_v16, %v2716_v63 }
 0x148   : > { %v2463_v56 = vadd.f32 %v2455_v59, %v2437_v1  ;;  %v2752_v23 = vadd.f32 %v2744_v17, %v2716_v63  ;;  %v2754_v14 = vadd.f32 %v2746_v6, %v2720_v53  ;;  %v2756_v8 = vadd.f32 %v2748_v62, %v2722_v21  ;;  %v5042_v21 = vld [vmem:[%s7293_s1 + $0x40] sm:$0xff]  ;;  %v5044_v1 = vld [vmem:[%s7293_s1 + $0x50] sm:$0xff] }
 0x149   : > { %v2465_v11 = vadd.f32 %v2457_v45, %v2439_v44  ;;  %v2467_v4 = vadd.f32 %v2441_v49, %v7658_v61  ;;  %v2469_v36 = vadd.f32 %v2443_v35, %v7658_v61  ;;  %v2768_v26 = vmul.f32 %v5190_v31, %v5038_v58 }
 0x14a   : > { %v2490_v54 = vadd.f32 %v2463_v56, %v7659_v33  ;;  %v2770_v15 = vmul.f32 %v5191_v25, %v5038_v58  ;;  %v2772_v30 = vmul.f32 %v5038_v58, %v6417_v13  ;;  %v2774_v55 = vmul.f32 %v5038_v58, %v6438_v46 }
 0x14b   : > { %v2492_v2 = vadd.f32 %v2465_v11, %v7659_v33  ;;  %v2494_v41 = vadd.f32 %v2467_v4, %v7659_v33  ;;  %v2496_v3 = vadd.f32 %v2469_v36, %v7659_v33  ;;  %v2776_v38 = vadd.f32 %v2768_v26, %v2750_v51 }
 0x14c   : > { %v2517_v27 = vadd.f32 %v2490_v54, %v7660_v40  ;;  %v2778_v59 = vadd.f32 %v2770_v15, %v2752_v23  ;;  %v2780_v45 = vadd.f32 %v2772_v30, %v2754_v14  ;;  %v2782_v9 = vadd.f32 %v2774_v55, %v2756_v8 }
 0x14d   : > { %v2519_v48 = vadd.f32 %v2492_v2, %v7660_v40  ;;  %v2521_v19 = vadd.f32 %v2494_v41, %v7660_v40  ;;  %v2523_v42 = vadd.f32 %v2496_v3, %v7660_v40  ;;  %v2794_v57 = vmul.f32 %v5191_v25, %v5040_v60 }
 0x14e   : > { %v2544_v34 = vadd.f32 %v2536_v0, %v2517_v27  ;;  %v2796_v18 = vmul.f32 %v5040_v60, %v6417_v13  ;;  %v2798_v63 = vmul.f32 %v5040_v60, %v6438_v46  ;;  %v2800_v53 = vmul.f32 0.0, %v5040_v60 }
 0x14f   : > { %v2546_v29 = vadd.f32 %v2536_v0, %v2519_v48  ;;  %v2548_v24 = vadd.f32 %v2536_v0, %v2521_v19  ;;  %v2550_v50 = vadd.f32 %v2536_v0, %v2523_v42  ;;  %v2802_v16 = vadd.f32 %v2794_v57, %v2776_v38  ;;  %v5048_v19 = vld [vmem:[%s7293_s1 + $0x70] sm:$0xff] }
 0x150   : > { %v2571_v17 = vadd.f32 %v2544_v34, %v6545_v5  ;;  %v2804_v6 = vadd.f32 %v2796_v18, %v2778_v59  ;;  %v2806_v62 = vadd.f32 %v2798_v63, %v2780_v45  ;;  %v2808_v58 = vadd.f32 %v2800_v53, %v2782_v9 }
 0x151   : > { %v2573_v44 = vadd.f32 %v2546_v29, %v6545_v5  ;;  %v2575_v49 = vadd.f32 %v2548_v24, %v6545_v5  ;;  %v2577_v39 = vadd.f32 %v2550_v50, %v6545_v5  ;;  %v2820_v35 = vmul.f32 %v5042_v21, %v6417_v13 }
 0x152   : > { %v2598_v0 = vadd.f32 %v2571_v17, %v6552_v43  ;;  %v2822_v51 = vmul.f32 %v5042_v21, %v6438_v46  ;;  %v2824_v56 = vmul.f32 0.0, %v5042_v21  ;;  %v2846_v23 = vmul.f32 0.0, %v5044_v1  ;;  %v5046_v46 = vld [vmem:[%s7293_s1 + $0x60] sm:$0xff] }
 0x153   : > { %v2600_v14 = vadd.f32 %v2573_v44, %v6552_v43  ;;  %v2602_v8 = vadd.f32 %v2575_v49, %v6552_v43  ;;  %v2604_v11 = vadd.f32 %v2577_v39, %v6552_v43  ;;  %v2828_v61 = vadd.f32 %v2820_v35, %v2802_v16  ;;  %v5050_v44 = vld [vmem:[%s7293_s1 + $0x80] sm:$0xff] }
 0x154   : > { %v2606_v4 = vrot.slane %v2598_v0, 4  ;;  %v2830_v36 = vadd.f32 %v2822_v51, %v2804_v6  ;;  %v2832_v31 = vadd.f32 %v2824_v56, %v2806_v62  ;;  %v2834_v26 = vadd.f32 %v2824_v56, %v2808_v58 }
 0x155   : > { %v2618_v5 = vrot.slane %v2600_v14, 4  ;;  %v2630_v33 = vrot.slane %v2602_v8, 4  ;;  %v2642_v13 = vrot.slane %v2604_v11, 4  ;;  %v2850_v54 = vmul.f32 %v5044_v1, %v6479_v22 }
 0x156   : > { %v2607_v25 = vadd.f32 %v2606_v4, %v2598_v0  ;;  %v2852_v15 = vmul.f32 %v5044_v1, %v6482_v20  ;;  %v2854_v30 = vadd.f32 %v2846_v23, %v2828_v61  ;;  %v2856_v55 = vadd.f32 %v2846_v23, %v2830_v36 }
 0x157   : > { %v2619_v43 = vadd.f32 %v2618_v5, %v2600_v14  ;;  %v2631_v60 = vadd.f32 %v2630_v33, %v2602_v8  ;;  %v2643_v2 = vadd.f32 %v2642_v13, %v2604_v11  ;;  %v2858_v41 = vadd.f32 %v2850_v54, %v2832_v31  ;;  %v5192_v8 = vld [vmem:[%s5337_s22 + $0x90] sm:$0xff] }
 0x158   : > { %v2608_v3 = vrot.slane %v2607_v25, 2  ;;  %v2860_v38 = vadd.f32 %v2852_v15, %v2834_v26  ;;  %v2872_v40 = vmul.f32 0.0, %v5046_v46  ;;  %v2874_v27 = vmul.f32 %v5046_v46, %v6479_v22  ;;  %v5052_v5 = vld [vmem:[%s7293_s1 + $0x90] sm:$0xff] }
 0x159   : > { %v2620_v59 = vrot.slane %v2619_v43, 2  ;;  %v2632_v45 = vrot.slane %v2631_v60, 2  ;;  %v2644_v9 = vrot.slane %v2643_v2, 2  ;;  %v2876_v48 = vmul.f32 %v5046_v46, %v6482_v20 }
 0x15a   : > { %v2609_v42 = vadd.f32 %v2608_v3, %v2607_v25  ;;  %v2878_v57 = vmul.f32 %v5046_v46, %v6501_v47  ;;  %v2880_v34 = vadd.f32 %v2872_v40, %v2854_v30  ;;  %v2882_v18 = vadd.f32 %v2874_v27, %v2856_v55  ;;  %v5056_v3 = vld [vmem:[%s7293_s1 + $0xb0] sm:$0xff] }
 0x15b   : > { %v2621_v63 = vadd.f32 %v2620_v59, %v2619_v43  ;;  %v2633_v53 = vadd.f32 %v2632_v45, %v2631_v60  ;;  %v2645_v21 = vadd.f32 %v2644_v9, %v2643_v2  ;;  %v2884_v29 = vadd.f32 %v2876_v48, %v2858_v41 }
 0x15c   : > { %v2610_v24 = vrot.slane %v2609_v42, 1  ;;  %v2886_v50 = vadd.f32 %v2878_v57, %v2860_v38  ;;  %v2898_v16 = vmul.f32 %v5048_v19, %v6479_v22  ;;  %v2900_v1 = vmul.f32 %v5048_v19, %v6482_v20 }
 0x15d   : > { %v2622_v17 = vrot.slane %v2621_v63, 1  ;;  %v2634_v6 = vrot.slane %v2633_v53, 1  ;;  %v2646_v62 = vrot.slane %v2645_v21, 1  ;;  %v2902_v58 = vmul.f32 %v5048_v19, %v6501_v47 }
 0x15e   : > { %v2611_v49 = vadd.f32 %v2610_v24, %v2609_v42  ;;  %v2904_v39 = vmul.f32 %v5048_v19, %v6517_v32  ;;  %v2906_v35 = vadd.f32 %v2898_v16, %v2880_v34  ;;  %v2908_v0 = vadd.f32 %v2900_v1, %v2882_v18 }
 0x15f   : > { %v2623_v51 = vadd.f32 %v2622_v17, %v2621_v63  ;;  %v2635_v56 = vadd.f32 %v2634_v6, %v2633_v53  ;;  %v2647_v22 = vadd.f32 %v2646_v62, %v2645_v21  ;;  %v2910_v23 = vadd.f32 %v2902_v58, %v2884_v29  ;;  %v5058_v63 = vld [vmem:[%s7293_s1 + $0xc0] sm:$0xff]  ;;  %v5060_v6 = vld [vmem:[%s7293_s1 + $0xd0] sm:$0xff] }
 0x160   : > { %v2666_v20 = vadd.f32 %v6872_v10, %v2611_v49  ;;  %v2912_v14 = vadd.f32 %v2904_v39, %v2886_v50  ;;  %v2924_v11 = vmul.f32 %v5192_v8, %v5050_v44  ;;  %v2926_v61 = vmul.f32 %v5050_v44, %v6501_v47  ;;  %v5054_v47 = vld [vmem:[%s7293_s1 + $0xa0] sm:$0xff] }
 0x161   : > { %v2668_v4 = vadd.f32 %v6872_v10, %v2623_v51  ;;  %v2670_v36 = vadd.f32 %v6872_v10, %v2635_v56  ;;  %v2672_v31 = vadd.f32 %v6872_v10, %v2647_v22  ;;  %v2928_v26 = vmul.f32 %v5050_v44, %v6517_v32  ;;  %v5193_v10 = vld [vmem:[%s5337_s22 + $0xa0] sm:$0xff]  ;;  %v5194_v32 = vld [vmem:[%s5337_s22 + $0xb0] sm:$0xff] }
 0x162   : > { %v2674_v33 = vmax.f32 %v2666_v20, 0.0  ;;  %v2930_v13 = vmul.f32 0.0, %v5050_v44  ;;  %v2932_v54 = vadd.f32 %v2924_v11, %v2906_v35  ;;  %v2934_v46 = vadd.f32 %v2926_v61, %v2908_v0  ;;  %v5062_v56 = vld [vmem:[%s7293_s1 + $0xe0] sm:$0xff] }
 0x163   : > { %v2676_v25 = vmax.f32 %v2668_v4, 0.0  ;;  %v2678_v15 = vmax.f32 %v2670_v36, 0.0  ;;  %v2680_v30 = vmax.f32 %v2672_v31, 0.0  ;;  %v2936_v55 = vadd.f32 %v2928_v26, %v2910_v23  ;;  %v5066_v36 = vld [vmem:[%s7293_s1 + $0x100] sm:$0xff] }
 0x164   : > { %v2938_v43 = vadd.f32 %v2930_v13, %v2912_v14  ;;  %v2950_v60 = vmul.f32 %v5193_v10, %v5052_v5  ;;  %v2952_v2 = vmul.f32 %v5194_v32, %v5052_v5  ;;  %v2954_v41 = vmul.f32 0.0, %v5052_v5  ;;  %v5070_v10 = vld [vmem:[%s7293_s1 + $0x120] sm:$0xff]  ;;  %v5072_v32 = vld [vmem:[%s7293_s1 + $0x130] sm:$0xff] }
 0x165   : > { %v2690_v38 = vrot.slane %v2676_v25, 7  ;;  %v2692_v40 = vrot.slane %v2678_v15, 6  ;;  %v2694_v27 = vrot.slane %v2680_v30, 5  ;;  %v2976_v59 = vmul.f32 0.0, %v5054_v47 }
 0x166   : > { %v2958_v45 = vadd.f32 %v2950_v60, %v2932_v54  ;;  %v2960_v9 = vadd.f32 %v2952_v2, %v2934_v46  ;;  %v2962_v48 = vadd.f32 %v2954_v41, %v2936_v55  ;;  %v2964_v19 = vadd.f32 %v2954_v41, %v2938_v43  ;;  %v6998_v2 = vld [vmem:[%s7294_s2] sm:$0xee]  ;;  %v3545_v41 = vld [vmem:[%s7295_s3 + $0x8] sm:$0xff] }
 0x167   : > { %v2691_v42 = vsel %vm1173_vm0, %v2690_v38, %v2674_v33  ;;  %v2980_v57 = vmul.f32 %v5054_v47, %v6664_v52  ;;  %v2982_v34 = vmul.f32 %v5054_v47, %v6667_v37  ;;  %v3002_v18 = vmul.f32 0.0, %v5056_v3  ;;  %v5068_v47 = vld [vmem:[%s7293_s1 + $0x110] sm:$0xff] }
 0x168   : > { %v2693_v53 = vsel %vm1176_vm1, %v2692_v40, %v2691_v42  ;;  %v2984_v21 = vadd.f32 %v2976_v59, %v2958_v45  ;;  %v2986_v29 = vadd.f32 %v2976_v59, %v2960_v9  ;;  %v3004_v24 = vmul.f32 %v5056_v3, %v6664_v52  ;;  %v3577_v40 = vld [vmem:[%s7295_s3 + $0x108] sm:$0xff]  ;;  %v3576_v59 = vld [vmem:[%s7295_s3 + $0x100] sm:$0xff] }
 0x169   : > { %v2695_v50 = vsel %vm1179_vm2, %v2694_v27, %v2693_v53  ;;  %v2988_v16 = vadd.f32 %v2980_v57, %v2962_v48  ;;  %v2990_v1 = vadd.f32 %v2982_v34, %v2964_v19  ;;  %v3006_v17 = vmul.f32 %v5056_v3, %v6667_v37  ;;  %v3544_v27 = vld [vmem:[%s7295_s3] sm:$0xff] }
 0x16a   : > { %2704 = vst [vmem:[#allocation3 + $0x10] sm:$0xf] %v2695_v50  ;;  %v3008_v62 = vmul.f32 %v5056_v3, %v7647_v12  ;;  %v3010_v58 = vadd.f32 %v3002_v18, %v2984_v21  ;;  %v3012_v44 = vadd.f32 %v3004_v24, %v2986_v29  ;;  %v3028_v49 = vmul.f32 %v5058_v63, %v6664_v52  ;;  %v5064_v52 = vld [vmem:[%s7293_s1 + $0xf0] sm:$0xff]  ;;  %v5074_v34 = vld [vmem:[%s7293_s1 + $0x140] sm:$0xff] }
 0x16b   : > { %v3014_v39 = vadd.f32 %v3006_v17, %v2988_v16  ;;  %v3030_v35 = vmul.f32 %v5058_v63, %v6667_v37  ;;  %v3032_v0 = vmul.f32 %v5058_v63, %v7647_v12  ;;  %v3034_v51 = vmul.f32 %v5058_v63, %v7651_v28  ;;  %v5076_v16 = vld [vmem:[%s7293_s1 + $0x150] sm:$0xff] }
 0x16c   : > { %v3016_v22 = vadd.f32 %v3008_v62, %v2990_v1  ;;  %v3036_v23 = vadd.f32 %v3028_v49, %v3010_v58  ;;  %v3054_v20 = vmul.f32 %v5060_v6, %v6667_v37  ;;  %v3056_v14 = vmul.f32 %v5060_v6, %v7647_v12  ;;  %v5078_v49 = vld [vmem:[%s7293_s1 + $0x160] sm:$0xff] }
 0x16d   : > { %v3038_v8 = vadd.f32 %v3030_v35, %v3012_v44  ;;  %v3040_v11 = vadd.f32 %v3032_v0, %v3014_v39  ;;  %v3058_v61 = vmul.f32 %v5060_v6, %v7651_v28  ;;  %v3060_v4 = vmul.f32 0.0, %v5060_v6 }
 0x16e   : > { %v3042_v31 = vadd.f32 %v3034_v51, %v3016_v22  ;;  %v3062_v26 = vadd.f32 %v3054_v20, %v3036_v23  ;;  %v3080_v5 = vmul.f32 %v5062_v56, %v7647_v12  ;;  %v3082_v37 = vmul.f32 %v5062_v56, %v7651_v28  ;;  %v5080_v22 = vld [vmem:[%s7293_s1 + $0x170] sm:$0xff] }
 0x16f   : > { %v3064_v33 = vadd.f32 %v3056_v14, %v3038_v8  ;;  %v3066_v13 = vadd.f32 %v3058_v61, %v3040_v11  ;;  %v3084_v54 = vmul.f32 0.0, %v5062_v56  ;;  %v3106_v46 = vmul.f32 0.0, %v5064_v52  ;;  %v5082_v11 = vld [vmem:[%s7293_s1 + $0x180] sm:$0xff] }
 0x170   : > { %v3068_v25 = vadd.f32 %v3060_v4, %v3042_v31  ;;  %v3088_v15 = vadd.f32 %v3080_v5, %v3062_v26  ;;  %v3132_v30 = vmul.f32 0.0, %v5066_v36  ;;  %v3158_v28 = vmul.f32 0.0, %v5068_v47 }
 0x171   : > { %v3090_v55 = vadd.f32 %v3082_v37, %v3064_v33  ;;  %v3092_v43 = vadd.f32 %v3084_v54, %v3066_v13  ;;  %v3184_v48 = vmul.f32 0.0, %v5070_v10  ;;  %v3210_v57 = vmul.f32 0.0, %v5072_v32 }
 0x172   : > { %v3094_v12 = vadd.f32 %v3084_v54, %v3068_v25  ;;  %v3114_v60 = vadd.f32 %v3106_v46, %v3088_v15  ;;  %v3469_v18 = vcombine.high %v6998_v2, %v6998_v2  ;;  %v5108_v21 = vpack.c.bf16 %v3577_v40, %v3545_v41 }
 0x173   : > { %v3116_v3 = vadd.f32 %v3106_v46, %v3090_v55  ;;  %v3118_v38 = vadd.f32 %v3106_v46, %v3092_v43  ;;  %v5110_v29 = vpack.c.bf16 %v3576_v59, %v3544_v27  ;;  %v3237_v62 = vmul.f32 0.0, %v5074_v34 }
 0x174   : > { %v3120_v45 = vadd.f32 %v3106_v46, %v3094_v12  ;;  %v3140_v9 = vadd.f32 %v3132_v30, %v3114_v60  ;;  %v3471_v1 = vrot.slane %v3469_v18, 1  ;;  %5109 = vmatprep.subr.bf16.mxu1 %v5108_v21  ;;  %v3264_v0 = vmul.f32 0.0, %v5076_v16 }
 0x175   : > { %v3142_v19 = vadd.f32 %v3132_v30, %v3116_v3  ;;  %v3144_v42 = vadd.f32 %v3132_v30, %v3118_v38  ;;  %5111 = vmatpush1.bf16.msra.mxu1 %v5110_v29  ;;  %v3291_v14 = vmul.f32 0.0, %v5078_v49  ;;  %v3318_v36 = vmul.f32 0.0, %v5080_v22 }
 0x176   : > { %v3146_v63 = vadd.f32 %v3132_v30, %v3120_v45  ;;  %v3166_v53 = vadd.f32 %v3158_v28, %v3140_v9  ;;  %3538 = vmatprep.mubr.f32.mxu0 %v3471_v1  ;;  %v3345_v33 = vmul.f32 0.0, %v5082_v11  ;;  %v3464_v11 = vld [vmem:[#allocation3] sm:$0xff] }
 0x177   : > { %v3168_v24 = vadd.f32 %v3158_v28, %v3142_v19  ;;  %v3170_v50 = vadd.f32 %v3158_v28, %v3144_v42 }
 0x178   : > { %v3172_v17 = vadd.f32 %v3158_v28, %v3146_v63  ;;  %v3192_v6 = vadd.f32 %v3184_v48, %v3166_v53  ;;  %v5195_v63 = vld [vmem:[%s7294_s2] ss:$4 sm:$0x3] }
 0x179   : > { %v3194_v58 = vadd.f32 %v3184_v48, %v3168_v24  ;;  %v3196_v44 = vadd.f32 %v3184_v48, %v3170_v50  ;;  %v3414_v53 = vrot.slane %v5195_v63, %v7656_v7 }
 0x17a   : > { %v3198_v39 = vadd.f32 %v3184_v48, %v3172_v17  ;;  %v3218_v35 = vadd.f32 %v3210_v57, %v3192_v6 }
 0x17b   : > { %v3220_v51 = vadd.f32 %v3210_v57, %v3194_v58  ;;  %v3222_v56 = vadd.f32 %v3210_v57, %v3196_v44 }
 0x17c   : > { %v3224_v23 = vadd.f32 %v3210_v57, %v3198_v39  ;;  %v3245_v20 = vadd.f32 %v3237_v62, %v3218_v35 }
 0x17d   : > { %v3247_v52 = vadd.f32 %v3237_v62, %v3220_v51  ;;  %v3249_v8 = vadd.f32 %v3237_v62, %v3222_v56 }
 0x17e   : > { %v3251_v61 = vadd.f32 %v3237_v62, %v3224_v23  ;;  %v3272_v4 = vadd.f32 %v3264_v0, %v3245_v20 }
 0x17f   : > { %v3274_v31 = vadd.f32 %v3264_v0, %v3247_v52  ;;  %v3276_v26 = vadd.f32 %v3264_v0, %v3249_v8  ;;  %v3549_v52 = vld [vmem:[%s7295_s3 + $0x28] sm:$0xff] }
 0x180   : > { %v3278_v5 = vadd.f32 %v3264_v0, %v3251_v61  ;;  %v3299_v37 = vadd.f32 %v3291_v14, %v3272_v4  ;;  %v3581_v8 = vld [vmem:[%s7295_s3 + $0x128] sm:$0xff] }
 0x181   : > { %v3301_v13 = vadd.f32 %v3291_v14, %v3274_v31  ;;  %v3303_v54 = vadd.f32 %v3291_v14, %v3276_v26  ;;  %v5116_v4 = vpack.c.bf16 %v3581_v8, %v3549_v52  ;;  %v3548_v31 = vld [vmem:[%s7295_s3 + $0x20] sm:$0xff]  ;;  %v3562_v8 = vld [vmem:[%s7295_s3 + $0x90] sm:$0xff] }
 0x182   : > { %v3305_v46 = vadd.f32 %v3291_v14, %v3278_v5  ;;  %v3326_v47 = vadd.f32 %v3318_v36, %v3299_v37  ;;  %v3580_v26 = vld [vmem:[%s7295_s3 + $0x120] sm:$0xff]  ;;  %v3470_v5 = vrot.slane %v6998_v2, 1  ;;  %v3585_v2 = vld [vmem:[%s7295_s3 + $0x148] sm:$0xff] }
 0x183   : > { %v3328_v25 = vadd.f32 %v3318_v36, %v3301_v13  ;;  %v3330_v15 = vadd.f32 %v3318_v36, %v3303_v54  ;;  %v5118_v37 = vpack.c.bf16 %v3580_v26, %v3548_v31  ;;  %v3579_v13 = vld [vmem:[%s7295_s3 + $0x118] sm:$0xff]  ;;  %v3553_v54 = vld [vmem:[%s7295_s3 + $0x48] sm:$0xff] }
 0x184   : > { %v3332_v30 = vadd.f32 %v3318_v36, %v3305_v46  ;;  %v3353_v55 = vadd.f32 %v3345_v33, %v3326_v47  ;;  %v5204_v47 = vmov 0.0   ;;  %v3567_v26 = vld [vmem:[%s7295_s3 + $0xb8] sm:$0xff] }
 0x185   : > { %v3355_v43 = vadd.f32 %v3345_v33, %v3328_v25  ;;  %v3357_v10 = vadd.f32 %v3345_v33, %v3330_v15  ;;  %3676 = vmatprep.mubr.f32.mxu1 %v5204_v47  ;;  %v5124_v25 = vpack.c.bf16 %v3585_v2, %v3553_v54  ;;  %v3546_v15 = vld [vmem:[%s7295_s3 + $0x10] sm:$0xff] }
 0x186   : > { %v3359_v12 = vadd.f32 %v3345_v33, %v3332_v30  ;;  %v3361_v60 = vrot.slane %v3353_v55, 4  ;;  %v3547_v33 = vld [vmem:[%s7295_s3 + $0x18] sm:$0xff]  ;;  %v3578_v30 = vld [vmem:[%s7295_s3 + $0x110] sm:$0xff] }
 0x187   : > { %v3373_v28 = vrot.slane %v3355_v43, 4  ;;  %v3385_v32 = vrot.slane %v3357_v10, 4  ;;  %v5112_v46 = vpack.c.bf16 %v3579_v13, %v3547_v33  ;;  %v3605_v33 = vld [vmem:[%s7295_s3 + $0x1e8] sm:$0xff] }
 0x188   : > { %v3362_v41 = vadd.f32 %v3361_v60, %v3353_v55  ;;  %v3397_v3 = vrot.slane %v3359_v12, 4  ;;  %v3552_v55 = vld [vmem:[%s7295_s3 + $0x40] sm:$0xff]  ;;  %v3557_v60 = vld [vmem:[%s7295_s3 + $0x68] sm:$0xff] }
 0x189   : > { %v3374_v38 = vadd.f32 %v3373_v28, %v3355_v43  ;;  %v3386_v40 = vadd.f32 %v3385_v32, %v3357_v10  ;;  %5113 = vmatprep.subr.bf16.mxu1 %v5112_v46  ;;  %v3584_v43 = vld [vmem:[%s7295_s3 + $0x140] sm:$0xff]  ;;  %v3551_v10 = vld [vmem:[%s7295_s3 + $0x38] sm:$0xff]  ;;  %v3589_v28 = vld [vmem:[%s7295_s3 + $0x168] sm:$0xff]  ;;  %v5114_v32 = vpack.c.bf16 %v3578_v30, %v3546_v15 }
 0x18a   : > { %v3363_v27 = vrot.slane %v3362_v41, 2  ;;  %v3398_v59 = vadd.f32 %v3397_v3, %v3359_v12  ;;  %v3583_v12 = vld [vmem:[%s7295_s3 + $0x138] sm:$0xff]  ;;  %v3550_v3 = vld [vmem:[%s7295_s3 + $0x30] sm:$0xff]  ;;  %v3572_v15 = vld [vmem:[%s7295_s3 + $0xe0] sm:$0xff] }
 0x18b   : > { %v3375_v45 = vrot.slane %v3374_v38, 2  ;;  %v3387_v9 = vrot.slane %v3386_v40, 2  ;;  %v3566_v46 = vld [vmem:[%s7295_s3 + $0xb0] sm:$0xff]  ;;  %v3604_v30 = vld [vmem:[%s7295_s3 + $0x1e0] sm:$0xff] }
 0x18c   : > { %v3364_v48 = vadd.f32 %v3363_v27, %v3362_v41  ;;  %v3399_v19 = vrot.slane %v3398_v59, 2  ;;  %v5126_v41 = vpack.c.bf16 %v3584_v43, %v3552_v55  ;;  %v3556_v27 = vld [vmem:[%s7295_s3 + $0x60] sm:$0xff]  ;;  %v3571_v43 = vld [vmem:[%s7295_s3 + $0xd8] sm:$0xff] }
 0x18d   : > { %v3376_v42 = vadd.f32 %v3375_v45, %v3374_v38  ;;  %v3388_v57 = vadd.f32 %v3387_v9, %v3386_v40  ;;  %v5120_v38 = vpack.c.bf16 %v3583_v12, %v3551_v10  ;;  %v3582_v40 = vld [vmem:[%s7295_s3 + $0x130] sm:$0xff]  ;;  %v5132_v9 = vpack.c.bf16 %v3589_v28, %v3557_v60  ;;  %v3603_v10 = vld [vmem:[%s7295_s3 + $0x1d8] sm:$0xff] }
 0x18e   : > { %v3365_v34 = vrot.slane %v3364_v48, 1  ;;  %v3400_v18 = vadd.f32 %v3399_v19, %v3398_v59  ;;  %v3588_v59 = vld [vmem:[%s7295_s3 + $0x160] sm:$0xff]  ;;  %v3587_v19 = vld [vmem:[%s7295_s3 + $0x158] sm:$0xff]  ;;  %v5166_v60 = vpack.c.bf16 %v3604_v30, %v3572_v15  ;;  %v5160_v28 = vpack.c.bf16 %v3603_v10, %v3571_v43 }
 0x18f   : > { %v3377_v21 = vrot.slane %v3376_v42, 1  ;;  %v3389_v29 = vrot.slane %v3388_v57, 1  ;;  %v5134_v63 = vpack.c.bf16 %v3588_v59, %v3556_v27  ;;  %v3574_v59 = vld [vmem:[%s7295_s3 + $0xf0] sm:$0xff] }
 0x190   : > { %v3366_v24 = vadd.f32 %v3365_v34, %v3364_v48  ;;  %v3401_v50 = vrot.slane %v3400_v18, 1  ;;  %v3555_v48 = vld [vmem:[%s7295_s3 + $0x58] sm:$0xff]  ;;  %v3593_v34 = vld [vmem:[%s7295_s3 + $0x188] sm:$0xff] }
 0x191   : > { %v3378_v16 = vadd.f32 %v3377_v21, %v3376_v42  ;;  %v3390_v1 = vadd.f32 %v3389_v29, %v3388_v57  ;;  %v3561_v57 = vld [vmem:[%s7295_s3 + $0x88] sm:$0xff]  ;;  %v5128_v21 = vpack.c.bf16 %v3587_v19, %v3555_v48  ;;  %v3586_v29 = vld [vmem:[%s7295_s3 + $0x150] sm:$0xff] }
 0x192   : > { %v3402_v17 = vadd.f32 %v3401_v50, %v3400_v18  ;;  %v3421_v6 = vadd.f32 %v3414_v53, %v3366_v24  ;;  %v5122_v18 = vpack.c.bf16 %v3582_v40, %v3550_v3  ;;  %v3560_v24 = vld [vmem:[%s7295_s3 + $0x80] sm:$0xff]  ;;  %v3575_v3 = vld [vmem:[%s7295_s3 + $0xf8] sm:$0xff] }
 0x193   : > { %v3423_v62 = vadd.f32 %v3414_v53, %v3378_v16  ;;  %v3425_v58 = vadd.f32 %v3414_v53, %v3390_v1  ;;  %v3592_v50 = vld [vmem:[%s7295_s3 + $0x180] sm:$0xff]  ;;  %v5140_v16 = vpack.c.bf16 %v3593_v34, %v3561_v57  ;;  %v3559_v1 = vld [vmem:[%s7295_s3 + $0x78] sm:$0xff] }
 0x194   : > { %v3427_v44 = vadd.f32 %v3414_v53, %v3402_v17  ;;  %v3429_v49 = vmax.f32 %v3421_v6, 0.0  ;;  %v3554_v53 = vld [vmem:[%s7295_s3 + $0x50] sm:$0xff]  ;;  %v3591_v17 = vld [vmem:[%s7295_s3 + $0x178] sm:$0xff]  ;;  %v3565_v6 = vld [vmem:[%s7295_s3 + $0xa8] sm:$0xff] }
 0x195   : > { %v3431_v39 = vmax.f32 %v3423_v62, 0.0  ;;  %v3433_v35 = vmax.f32 %v3425_v58, 0.0  ;;  %v3597_v62 = vld [vmem:[%s7295_s3 + $0x1a8] sm:$0xff]  ;;  %v5130_v58 = vpack.c.bf16 %v3586_v29, %v3554_v53 }
 0x196   : > { %v3435_v0 = vmax.f32 %v3427_v44, 0.0  ;;  %v3445_v51 = vrot.slane %v3429_v49, 4  ;;  %v5142_v44 = vpack.c.bf16 %v3592_v50, %v3560_v24  ;;  %v3558_v49 = vld [vmem:[%s7295_s3 + $0x70] sm:$0xff] }
 0x197   : > { %v3446_v56 = vrot.slane %v3431_v39, 3  ;;  %v3448_v22 = vrot.slane %v3433_v35, 2  ;;  %v5136_v39 = vpack.c.bf16 %v3591_v17, %v3559_v1  ;;  %v3590_v35 = vld [vmem:[%s7295_s3 + $0x170] sm:$0xff] }
 0x198   : > { %v3450_v23 = vrot.slane %v3435_v0, 1  ;;  %v3564_v0 = vld [vmem:[%s7295_s3 + $0xa0] sm:$0xff] }
 0x199   : > { %v3447_v7 = vsel %vm1932_vm3, %v3446_v56, %v3445_v51  ;;  %v3596_v51 = vld [vmem:[%s7295_s3 + $0x1a0] sm:$0xff]  ;;  %v5148_v56 = vpack.c.bf16 %v3597_v62, %v3565_v6 }
 0x19a   : > { %v3449_v20 = vsel %vm1935_vm4, %v3448_v22, %v3447_v7  ;;  %v3563_v22 = vld [vmem:[%s7295_s3 + $0x98] sm:$0xff]  ;;  %v3569_v7 = vld [vmem:[%s7295_s3 + $0xc8] sm:$0xff]  ;;  %v5150_v52 = vpack.c.bf16 %v3596_v51, %v3564_v0 }
 0x19b   : > { %v3451_v14 = vsel %vm1938_vm5, %v3450_v23, %v3449_v20  ;;  %v3595_v23 = vld [vmem:[%s7295_s3 + $0x198] sm:$0xff]  ;;  %v3601_v20 = vld [vmem:[%s7295_s3 + $0x1c8] sm:$0xff] }
 0x19c   : > { %3461 = vst [vmem:[#allocation3 + $0x10] sm:$0xf0] %v3451_v14  ;;  %v5138_v14 = vpack.c.bf16 %v3590_v35, %v3558_v49  ;;  %v5156_v31 = vpack.c.bf16 %v3601_v20, %v3569_v7 }
 0x1a3   : > { %v3466_v61 = vld [vmem:[#allocation3 + $0x10] sm:$0xff] }
 0x1a4   : > { %v5106_v36 = vpack.c.bf16 %v3466_v61, %v3464_v11  ;;  %v5144_v11 = vpack.c.bf16 %v3595_v23, %v3563_v22  ;;  %v3594_v61 = vld [vmem:[%s7295_s3 + $0x190] sm:$0xff] }
 0x1a5   : > { %v5146_v13 = vpack.c.bf16 %v3594_v61, %v3562_v8 }
 0x1a6   : > { %5107 = vmatpush1.bf16.xpose.msra.mxu0 %v5106_v36  ;;  %v3600_v36 = vld [vmem:[%s7295_s3 + $0x1c0] sm:$0xff] }
 0x1a7   : > { %5117 = vmatprep.subr.bf16.mxu0 %v5116_v4  ;;  %v3568_v4 = vld [vmem:[%s7295_s3 + $0xc0] sm:$0xff] }
 0x1a8   : > { %v5158_v54 = vpack.c.bf16 %v3600_v36, %v3568_v4 }
 0x1ad   : > { %3539 = vmatmul.mubr.f32.vlgmr.msra.gmra.mrb[0].mxu0 %v3470_v5  ;;  %v3599_v5 = vld [vmem:[%s7295_s3 + $0x1b8] sm:$0xff] }
 0x1ae   : > { %5119 = vmatpush1.bf16.msra.mxu0 %v5118_v37  ;;  %3818 = vmatprep.mubr.f32.mxu0 %v5204_v47  ;;  %v3573_v37 = vld [vmem:[%s7295_s3 + $0xe8] sm:$0xff]  ;;  %v5152_v2 = vpack.c.bf16 %v3599_v5, %v3567_v26 }
 0x1af   : > { %5125 = vmatprep.subr.bf16.mxu0 %v5124_v25  ;;  %v3598_v25 = vld [vmem:[%s7295_s3 + $0x1b0] sm:$0xff]  ;;  %v5164_v55 = vpack.c.bf16 %v3605_v33, %v3573_v37 }
 0x1b0   : > { %v5154_v12 = vpack.c.bf16 %v3598_v25, %v3566_v46 }
 0x280   : > { %v7099_v45 = vpop.f32.mrb[0].mxu0 }
 0x281   : > { %v3542_v42 = vpop.f32.mrb[1].mxu0  ;;  %5084 = vmatmul.mubr.msk.f32.vlgmr.msra.gmra.mrb[0].mxu1 %vm3608_vm6, %v7099_v45  ;;  %5086 = vmatmul.mubr.msk.f32.vlgmr.msra.gmra.mrb[2].mxu0 %vm3608_vm6, %v7099_v45 }
 0x282   : > { %5115 = vmatpush1.bf16.msra.mxu1 %v5114_v32  ;;  %5127 = vmatpush1.bf16.msra.mxu0 %v5126_v41  ;;  %v3570_v32 = vld [vmem:[%s7295_s3 + $0xd0] sm:$0xff] }
 0x283   : > { %3747 = vmatprep.mubr.f32.mxu1 %v5204_v47  ;;  %5121 = vmatprep.subr.bf16.mxu1 %v5120_v38  ;;  %v3602_v41 = vld [vmem:[%s7295_s3 + $0x1d0] sm:$0xff]  ;;  %v3607_v38 = vld [vmem:[%s7295_s3 + $0x1f8] sm:$0xff] }
 0x284   : > { %3960 = vmatprep.mubr.f32.mxu0 %v5204_v47  ;;  %5133 = vmatprep.subr.bf16.mxu0 %v5132_v9  ;;  %v5162_v40 = vpack.c.bf16 %v3602_v41, %v3570_v32  ;;  %v5168_v27 = vpack.c.bf16 %v3607_v38, %v3575_v3  ;;  %v3606_v9 = vld [vmem:[%s7295_s3 + $0x1f0] sm:$0xff] }
 0x285   : > { %5085 = vmatmul.mubr.msk.f32.vlgmr.msra.gmra.mrb[2].mxu1 %vm3608_vm6, %v7099_v45  ;;  %5088 = vmatmul.mubr.msk.f32.vlgmr.msra.gmra.mrb[4].mxu0 %vm3608_vm6, %v7099_v45  ;;  %v5170_v48 = vpack.c.bf16 %v3606_v9, %v3574_v59 }
 0x286   : > { %5123 = vmatpush1.bf16.msra.mxu1 %v5122_v18  ;;  %5135 = vmatpush1.bf16.msra.mxu0 %v5134_v63 }
 0x287   : > { %3889 = vmatprep.mubr.f32.mxu1 %v5204_v47  ;;  %5129 = vmatprep.subr.bf16.mxu1 %v5128_v21 }
 0x288   : > { %4102 = vmatprep.mubr.f32.mxu0 %v5204_v47  ;;  %5141 = vmatprep.subr.bf16.mxu0 %v5140_v16 }
 0x289   : > { %5087 = vmatmul.mubr.msk.f32.vlgmr.msra.gmra.mrb[4].mxu1 %vm3608_vm6, %v7099_v45  ;;  %5090 = vmatmul.mubr.msk.f32.vlgmr.msra.gmra.mrb[6].mxu0 %vm3608_vm6, %v7099_v45 }
 0x28a   : > { %5131 = vmatpush1.bf16.msra.mxu1 %v5130_v58  ;;  %5143 = vmatpush1.bf16.msra.mxu0 %v5142_v44 }
 0x28b   : > { %4031 = vmatprep.mubr.f32.mxu1 %v5204_v47  ;;  %5137 = vmatprep.subr.bf16.mxu1 %v5136_v39 }
 0x28c   : > { %4244 = vmatprep.mubr.f32.mxu0 %v5204_v47  ;;  %5149 = vmatprep.subr.bf16.mxu0 %v5148_v56 }
 0x28d   : > { %5089 = vmatmul.mubr.msk.f32.vlgmr.msra.gmra.mrb[6].mxu1 %vm3608_vm6, %v7099_v45  ;;  %5092 = vmatmul.mubr.msk.f32.vlgmr.msra.gmra.mrb[8].mxu0 %vm3608_vm6, %v7099_v45 }
 0x28e   : > { %5139 = vmatpush1.bf16.msra.mxu1 %v5138_v14  ;;  %5151 = vmatpush1.bf16.msra.mxu0 %v5150_v52 }
 0x28f   : > { %4173 = vmatprep.mubr.f32.mxu1 %v5204_v47  ;;  %5145 = vmatprep.subr.bf16.mxu1 %v5144_v11 }
 0x290   : > { %4386 = vmatprep.mubr.f32.mxu0 %v5204_v47  ;;  %5157 = vmatprep.subr.bf16.mxu0 %v5156_v31 }
 0x291   : > { %5091 = vmatmul.mubr.msk.f32.vlgmr.msra.gmra.mrb[8].mxu1 %vm3608_vm6, %v7099_v45  ;;  %5094 = vmatmul.mubr.msk.f32.vlgmr.msra.gmra.mrb[10].mxu0 %vm3608_vm6, %v7099_v45 }
 0x292   : > { %5147 = vmatpush1.bf16.msra.mxu1 %v5146_v13  ;;  %5159 = vmatpush1.bf16.msra.mxu0 %v5158_v54 }
 0x293   : > { %4315 = vmatprep.mubr.f32.mxu1 %v5204_v47  ;;  %5153 = vmatprep.subr.bf16.mxu1 %v5152_v2 }
 0x294   : > { %4528 = vmatprep.mubr.f32.mxu0 %v5204_v47  ;;  %5165 = vmatprep.subr.bf16.mxu0 %v5164_v55 }
 0x295   : > { %5093 = vmatmul.mubr.msk.f32.vlgmr.msra.gmra.mrb[10].mxu1 %vm3608_vm6, %v7099_v45  ;;  %5096 = vmatmul.mubr.msk.f32.vlgmr.msra.gmra.mrb[12].mxu0 %vm3608_vm6, %v7099_v45 }
 0x296   : > { %5155 = vmatpush1.bf16.msra.mxu1 %v5154_v12  ;;  %5167 = vmatpush1.bf16.msra.mxu0 %v5166_v60 }
 0x297   : > { %4457 = vmatprep.mubr.f32.mxu1 %v5204_v47  ;;  %5161 = vmatprep.subr.bf16.mxu1 %v5160_v28 }
 0x298   : > { %4670 = vmatprep.mubr.f32.mxu0 %v5204_v47 }
 0x299   : > { %5095 = vmatmul.mubr.msk.f32.vlgmr.msra.gmra.mrb[12].mxu1 %vm3608_vm6, %v7099_v45  ;;  %5098 = vmatmul.mubr.msk.f32.vlgmr.msra.gmra.mrb[14].mxu0 %vm3608_vm6, %v7099_v45 }
 0x29a   : > { %5163 = vmatpush1.bf16.msra.mxu1 %v5162_v40  ;;  %4599 = vmatprep.mubr.f32.mxu1 %v5204_v47 }
 0x29b   : > { %5169 = vmatprep.subr.bf16.mxu1 %v5168_v27 }
 0x29d   : > { %5097 = vmatmul.mubr.msk.f32.vlgmr.msra.gmra.mrb[14].mxu1 %vm3608_vm6, %v7099_v45 }
 0x29e   : > { %5171 = vmatpush1.bf16.msra.mxu1 %v5170_v48  ;;  %4741 = vmatprep.mubr.f32.mxu1 %v5204_v47 }
 0x2a1   : > { %5099 = vmatmul.mubr.msk.f32.vlgmr.msra.gmra.mrb[16].mxu1 %vm3608_vm6, %v7099_v45 }
 0x354   : > { %v3678_v19 = vpop.f32.mrb[0].mxu1  ;;  %v3820_v42 = vpop.f32.mrb[2].mxu0 }
 0x355   : > { %v3680_v57 = vpop.f32.mrb[1].mxu1  ;;  %v3822_v34 = vpop.f32.mrb[3].mxu0 }
 0x356   : > { %v4780_v18 = vcombine.low %v3678_v19, %v3680_v57  ;;  %v4782_v63 = vcombine.low %v3820_v42, %v3822_v34 }
 0x358   : > { %4812 = vst [vmem:[%s7271_s14] sm:$0x77] %v4780_v18  ;;  %4814 = vst [vmem:[%s7271_s14 + $0x10] sm:$0x77] %v4782_v63  ;;  %v3749_v47 = vpop.f32.mrb[2].mxu1  ;;  %v3962_v45 = vpop.f32.mrb[4].mxu0 }
 0x359   : > { %v3751_v53 = vpop.f32.mrb[3].mxu1  ;;  %v3964_v21 = vpop.f32.mrb[5].mxu0 }
 0x35a   : > { %v4781_v29 = vcombine.low %v3749_v47, %v3751_v53  ;;  %v4784_v24 = vcombine.low %v3962_v45, %v3964_v21 }
 0x35c   : > { %4813 = vst [vmem:[%s7271_s14 + $0x8] sm:$0x77] %v4781_v29  ;;  %4816 = vst [vmem:[%s7271_s14 + $0x20] sm:$0x77] %v4784_v24  ;;  %v3891_v50 = vpop.f32.mrb[4].mxu1  ;;  %v4104_v16 = vpop.f32.mrb[6].mxu0 }
 0x35d   : > { %v3893_v1 = vpop.f32.mrb[5].mxu1  ;;  %v4106_v17 = vpop.f32.mrb[7].mxu0 }
 0x35e   : > { %v4783_v6 = vcombine.low %v3891_v50, %v3893_v1  ;;  %v4786_v62 = vcombine.low %v4104_v16, %v4106_v17 }
 0x360   : > { %4815 = vst [vmem:[%s7271_s14 + $0x18] sm:$0x77] %v4783_v6  ;;  %4818 = vst [vmem:[%s7271_s14 + $0x30] sm:$0x77] %v4786_v62  ;;  %v4033_v58 = vpop.f32.mrb[6].mxu1  ;;  %v4246_v44 = vpop.f32.mrb[8].mxu0 }
 0x361   : > { %v4035_v49 = vpop.f32.mrb[7].mxu1  ;;  %v4248_v39 = vpop.f32.mrb[9].mxu0 }
 0x362   : > { %v4785_v35 = vcombine.low %v4033_v58, %v4035_v49  ;;  %v4788_v0 = vcombine.low %v4246_v44, %v4248_v39 }
 0x364   : > { %4817 = vst [vmem:[%s7271_s14 + $0x28] sm:$0x77] %v4785_v35  ;;  %4820 = vst [vmem:[%s7271_s14 + $0x40] sm:$0x77] %v4788_v0  ;;  %v4175_v51 = vpop.f32.mrb[8].mxu1  ;;  %v4388_v56 = vpop.f32.mrb[10].mxu0 }
 0x365   : > { %v4177_v22 = vpop.f32.mrb[9].mxu1  ;;  %v4390_v23 = vpop.f32.mrb[11].mxu0 }
 0x366   : > { %v4787_v7 = vcombine.low %v4175_v51, %v4177_v22  ;;  %v4790_v20 = vcombine.low %v4388_v56, %v4390_v23 }
 0x368   : > { %4819 = vst [vmem:[%s7271_s14 + $0x38] sm:$0x77] %v4787_v7  ;;  %4822 = vst [vmem:[%s7271_s14 + $0x50] sm:$0x77] %v4790_v20  ;;  %v4317_v14 = vpop.f32.mrb[10].mxu1  ;;  %v4530_v52 = vpop.f32.mrb[12].mxu0 }
 0x369   : > { %v4319_v8 = vpop.f32.mrb[11].mxu1  ;;  %v4532_v11 = vpop.f32.mrb[13].mxu0 }
 0x36a   : > { %v4789_v61 = vcombine.low %v4317_v14, %v4319_v8  ;;  %v4792_v4 = vcombine.low %v4530_v52, %v4532_v11 }
 0x36c   : > { %4821 = vst [vmem:[%s7271_s14 + $0x48] sm:$0x77] %v4789_v61  ;;  %4824 = vst [vmem:[%s7271_s14 + $0x60] sm:$0x77] %v4792_v4  ;;  %v4459_v36 = vpop.f32.mrb[12].mxu1  ;;  %v4672_v31 = vpop.f32.mrb[14].mxu0 }
 0x36d   : > { %v4461_v26 = vpop.f32.mrb[13].mxu1  ;;  %v4674_v5 = vpop.f32.mrb[15].mxu0 }
 0x36e   : > { %v4791_v37 = vcombine.low %v4459_v36, %v4461_v26  ;;  %v4794_v33 = vcombine.low %v4672_v31, %v4674_v5 }
 0x370   : > { %4823 = vst [vmem:[%s7271_s14 + $0x58] sm:$0x77] %v4791_v37  ;;  %4826 = vst [vmem:[%s7271_s14 + $0x70] sm:$0x77] %v4794_v33  ;;  %v4601_v13 = vpop.f32.mrb[14].mxu1 }
 0x371   : > { %v4603_v54 = vpop.f32.mrb[15].mxu1 }
 0x372   : > { %v4793_v46 = vcombine.low %v4601_v13, %v4603_v54 }
 0x374   : > { %4825 = vst [vmem:[%s7271_s14 + $0x68] sm:$0x77] %v4793_v46  ;;  %v4743_v2 = vpop.f32.mrb[16].mxu1 }
 0x375   : > { %v4745_v25 = vpop.f32.mrb[17].mxu1 }
 0x376   : > { %v4795_v15 = vcombine.low %v4743_v2, %v4745_v25 }
 0x378   : > { %4827 = vst [vmem:[%s7271_s14 + $0x78] sm:$0x77] %v4795_v15 }
 0x379 PF: > { %s14_s15 = sadd.s32 1, %s5202_s15  }
 0x37a   : > { %p11_p4 = scmp.ge.s32.totalorder %s14_s15, 4  }
 0x37c   :  { %13 = sbr.rel (!%p11_p4) target bundleno = 1 (0x1), region = 129 }

</bundles_post_ra>
